<compile_context>
chip_gen: v7x
topology: tpu7x:2x2x1
jax: 0.10.0
libtpu: 0.0.40
codegen_flags: <defaults>
</compile_context>

<pallas_src>
import jax
import jax.numpy as jnp
from jax.experimental import pallas as pl
from jax.experimental.pallas import tpu as pltpu


_VMEM_LIMIT = 32 * 1024 * 1024  # explicit scoped-VMEM budget (fits v5e/v6e/v7x)


def _round_up(v, m):
    return ((v + m - 1) // m) * m


def _pick_row_tile(m, cap):
    """Largest tile <= cap that is a multiple of 8 and divides m (else cap)."""
    if m <= cap:
        return m
    return next((t for t in range(cap, 7, -8) if m % t == 0), cap)


# ----------------------------------------------------------------------------
# Pallas kernels
# ----------------------------------------------------------------------------
def _make_matmul_bias_act_kernel(alpha):
    """K-tiled matmul + bias (+ optional PReLU) with an f32 VMEM accumulator.

    `alpha` is a trace-time Python constant; None means no activation
    (the plain final Linear)."""

    def kernel(x_ref, w_ref, b_ref, o_ref, acc_ref):
        k = pl.program_id(2)

        @pl.when(k == 0)
        def _init():
            acc_ref[...] = jnp.zeros_like(acc_ref)

        acc_ref[...] += jnp.dot(x_ref[...], w_ref[...],
                                preferred_element_type=jnp.float32)

        @pl.when(k == pl.num_programs(2) - 1)
        def _finalize():
            y = acc_ref[...] + b_ref[...]          # bias / activation in f32
            if alpha is not None:
                y = jnp.where(y >= 0.0, y, alpha * y)
            o_ref[...] = y.astype(o_ref.dtype)

    return kernel


def _max4_kernel(a_ref, b_ref, c_ref, d_ref, o_ref):
    # Elementwise max over the 4 corners of each 2x2 pooling window.
    o_ref[...] = jnp.maximum(jnp.maximum(a_ref[...], b_ref[...]),
                             jnp.maximum(c_ref[...], d_ref[...]))


# ----------------------------------------------------------------------------
# Wrappers
# ----------------------------------------------------------------------------
def matmul_bias_act(x, w, b, alpha=None, out_dtype=jnp.bfloat16,
                    tm_cap=512, tk=512):
    """(PReLU_alpha)(x @ w + b).  x:(M,K)  w:(K,N)  b:(N,).  bf16 MXU, f32 acc."""
    M, K = x.shape
    Kw, N = w.shape
    assert K == Kw

    TM = _pick_row_tile(M, tm_cap)
    Mp = _round_up(M, TM)
    if K <= tk:                       # single full-K block, no padding needed
        TK, Kp = K, K
    else:                             # K-tiled reduction with VMEM accumulator
        TK, Kp = tk, _round_up(K, tk)
    if N <= 512:                      # lane-dense single N block (all layers here)
        TN, Np = N, N
    else:
        TN, Np = 256, _round_up(N, 256)

    xp = x.astype(jnp.bfloat16)
    wp = w.astype(jnp.bfloat16)
    if (Mp, Kp) != (M, K):
        xp = jnp.pad(xp, ((0, Mp - M), (0, Kp - K)))
    if (Kp, Np) != (K, N):
        wp = jnp.pad(wp, ((0, Kp - K), (0, Np - N)))
    bp = b.astype(jnp.float32).reshape(1, N)
    if Np != N:
        bp = jnp.pad(bp, ((0, 0), (0, Np - N)))

    out = pl.pallas_call(
        _make_matmul_bias_act_kernel(alpha),
        out_shape=jax.ShapeDtypeStruct((Mp, Np), out_dtype),
        grid=(Mp // TM, Np // TN, Kp // TK),
        in_specs=[
            pl.BlockSpec((TM, TK), lambda i, j, k: (i, k)),   # activation tile
            pl.BlockSpec((TK, TN), lambda i, j, k: (k, j)),   # weight tile
            pl.BlockSpec((1, TN), lambda i, j, k: (0, j)),    # bias (f32)
        ],
        out_specs=pl.BlockSpec((TM, TN), lambda i, j, k: (i, j)),
        scratch_shapes=[pltpu.VMEM((TM, TN), jnp.float32)],
        compiler_params=pltpu.CompilerParams(
            dimension_semantics=("parallel", "parallel", "arbitrary"),
            vmem_limit_bytes=_VMEM_LIMIT),
    )(xp, wp, bp)

    if (Mp, Np) != (M, N):
        out = out[:M, :N]
    return out


def conv2d_prelu(x_nhwc, w2d, b, alpha, k, cout):
    """'valid' conv (stride 1) + bias + PReLU via im2col + K-tiled Pallas matmul."""
    N, H, W, Cin = x_nhwc.shape
    OH, OW = H - k + 1, W - k + 1
    # im2col glue; feature order (kh, kw, cin) matches the weight reshape.
    # TODO(synk): replace with a window-extraction conv kernel (no HBM im2col)
    # for the full input_size=256 configuration.
    cols = [x_nhwc[:, di:di + OH, dj:dj + OW, :]
            for di in range(k) for dj in range(k)]
    patches = jnp.concatenate(cols, axis=-1).reshape(N * OH * OW, k * k * Cin)
    y = matmul_bias_act(patches, w2d, b, alpha=alpha, out_dtype=jnp.bfloat16)
    return y.reshape(N, OH, OW, cout)


def maxpool_2x2(x_nhwc):
    """MaxPool2d(2, stride=2) (floor).  The max runs in a tiled, lane-dense
    Pallas kernel over (rows, PW*C) slabs.
    TODO(synk): fuse this into the conv kernel epilogue to drop the extra
    HBM passes from the strided corner slices."""
    N, H, W, C = x_nhwc.shape
    PH, PW = H // 2, W // 2
    corners = [x_nhwc[:, di:PH * 2:2, dj:PW * 2:2, :].reshape(N * PH, PW * C)
               for di in (0, 1) for dj in (0, 1)]
    rows = N * PH
    TR = _pick_row_tile(rows, 512)
    rows_p = _round_up(rows, TR)
    if rows_p != rows:
        corners = [jnp.pad(c, ((0, rows_p - rows), (0, 0))) for c in corners]

    out = pl.pallas_call(
        _max4_kernel,
        out_shape=jax.ShapeDtypeStruct((rows_p, PW * C), x_nhwc.dtype),
        grid=(rows_p // TR,),
        in_specs=[pl.BlockSpec((TR, PW * C), lambda i: (i, 0))] * 4,
        out_specs=pl.BlockSpec((TR, PW * C), lambda i: (i, 0)),
        compiler_params=pltpu.CompilerParams(
            dimension_semantics=("parallel",),
            vmem_limit_bytes=_VMEM_LIMIT),
    )(*corners)
    if rows_p != rows:
        out = out[:rows]
    return out.reshape(N, PH, PW, C)


# ----------------------------------------------------------------------------
# toy_network
# ----------------------------------------------------------------------------
class ToyNetworkPallas:
    def __init__(self, input_size=32, emb_dim=64, key=jax.random.PRNGKey(42)):
        self.input_size = input_size
        self.emb_dim = emb_dim
        self.conv_size_1 = 32
        self.conv_size_2 = 64
        self.kernel_size = 5
        self.conv_final_dim = int(int(input_size / 2) / 2) - 3
        fc_in = 64 * self.conv_final_dim * self.conv_final_dim

        ks = jax.random.split(key, 8)
        s = 0.05
        k = self.kernel_size

        def conv_w2d(w_oihw):
            # (Cout, Cin, KH, KW) -> (KH, KW, Cin, Cout) -> (k*k*Cin, Cout), bf16
            cout = w_oihw.shape[0]
            return jnp.transpose(w_oihw, (2, 3, 1, 0)).reshape(-1, cout).astype(jnp.bfloat16)

        conv1_w = jax.random.normal(ks[0], (self.conv_size_1, 3, k, k), jnp.float32) * s
        conv2_w = jax.random.normal(ks[2], (self.conv_size_2, self.conv_size_1, k, k), jnp.float32) * s
        fc1_w = jax.random.normal(ks[4], (512, fc_in), jnp.float32) * s
        fc2_w = jax.random.normal(ks[6], (emb_dim, 512), jnp.float32) * s

        # weights pre-reshaped / pre-transposed / pre-cast once at init
        self.conv1_w2d = conv_w2d(conv1_w)
        self.conv2_w2d = conv_w2d(conv2_w)
        self.fc1_wt = fc1_w.T.astype(jnp.bfloat16)      # (fc_in, 512)
        self.fc2_wt = fc2_w.T.astype(jnp.bfloat16)      # (512, emb_dim)

        self.conv1_b = jax.random.normal(ks[1], (self.conv_size_1,), jnp.float32) * s
        self.conv2_b = jax.random.normal(ks[3], (self.conv_size_2,), jnp.float32) * s
        self.fc1_b = jax.random.normal(ks[5], (512,), jnp.float32) * s
        self.fc2_b = jax.random.normal(ks[7], (emb_dim,), jnp.float32) * s

        # nn.PReLU() default: single parameter, init 0.25
        self.prelu1_a = 0.25
        self.prelu2_a = 0.25
        self.prelu3_a = 0.25

    def __call__(self, x_nchw):
        # check_input_size: spatial dims must already match.
        # TODO(synk): image-resize fallback (transforms.resuze) not implemented.
        assert x_nchw.shape[2] == self.input_size and x_nchw.shape[3] == self.input_size
        k = self.kernel_size

        # NCHW -> NHWC internal layout, bf16 activations between layers
        x = jnp.transpose(x_nchw, (0, 2, 3, 1)).astype(jnp.bfloat16)

        x = conv2d_prelu(x, self.conv1_w2d, self.conv1_b, self.prelu1_a, k, self.conv_size_1)
        x = maxpool_2x2(x)
        # Dropout(0.3): identity at inference
        x = conv2d_prelu(x, self.conv2_w2d, self.conv2_b, self.prelu2_a, k, self.conv_size_2)
        x = maxpool_2x2(x)
        # Dropout(0.3): identity at inference

        n = x.shape[0]
        # flatten in PyTorch NCHW (C, H, W) order to match x.view(-1, 64*d*d)
        x = jnp.transpose(x, (0, 3, 1, 2)).reshape(n, -1)
        x = matmul_bias_act(x, self.fc1_wt, self.fc1_b, alpha=self.prelu3_a,
                            out_dtype=jnp.bfloat16)
        x = matmul_bias_act(x, self.fc2_wt, self.fc2_b, alpha=None,
                            out_dtype=jnp.float32)   # final Linear, no activation
        return x


if __name__ == "__main__":
    INPUT_SIZE = 32   # original module hardcodes 256; scaled down for the self-test
    BATCH = 2

    net = ToyNetworkPallas(input_size=INPUT_SIZE)
    key = jax.random.PRNGKey(0)
    x = jax.random.normal(key, (BATCH, 3, INPUT_SIZE, INPUT_SIZE), jnp.float32)

    fwd = jax.jit(net.__call__)
    out = jax.block_until_ready(fwd(x))

    assert out.shape == (BATCH, net.emb_dim), out.shape
    assert bool(jnp.all(jnp.isfinite(out)))
    print("KERNEL_OK")
</pallas_src>

<mosaic_0001>
module attributes {stable_mosaic.version = 11 : i64} {
  func.func @kernel(%arg0: i32, %arg1: i32, %arg2: i32, %arg3: memref<392x75xbf16, #tpu.memory_space<vmem>>, %arg4: memref<75x32xbf16, #tpu.memory_space<vmem>>, %arg5: memref<1x32xf32, #tpu.memory_space<vmem>>, %arg6: memref<392x32xbf16, #tpu.memory_space<vmem>>, %arg7: memref<392x32xf32, #tpu.memory_space<vmem>>) attributes {dimension_semantics = [#tpu.dimension_semantics<parallel>, #tpu.dimension_semantics<parallel>, #tpu.dimension_semantics<arbitrary>], iteration_bounds = array<i64: 4, 1, 1>, scalar_prefetch = 0 : i64, scratch_operands = 1 : i64, tpu.core_type = #tpu.core_type<tc>, window_params = [{transform_indices = @transform_0, window_bounds = array<i64: 392, 75>}, {transform_indices = @transform_1, window_bounds = array<i64: 75, 32>}, {transform_indices = @transform_2, window_bounds = array<i64: 1, 32>}, {transform_indices = @transform_3, window_bounds = array<i64: 392, 32>}]} {
    %c0_i32 = arith.constant 0 : i32
    %0 = arith.cmpi eq, %arg2, %c0_i32 : i32
    %1 = arith.extui %0 : i1 to i32
    %c0_i32_0 = arith.constant 0 : i32
    %2 = arith.cmpi ne, %1, %c0_i32_0 : i32
    scf.if %2 {
      %cst_10 = arith.constant 0.000000e+00 : f32
      %12 = vector.broadcast %cst_10 : f32 to vector<392x32xf32>
      %c0_11 = arith.constant 0 : index
      %c0_12 = arith.constant 0 : index
      %13 = vector.load %arg7[%c0_11, %c0_12] : memref<392x32xf32, #tpu.memory_space<vmem>>, vector<392x32xf32>
      tpu.vector_store %arg7[%c0_11, %c0_12], %12 {strides = array<i32>} : memref<392x32xf32, #tpu.memory_space<vmem>>, vector<392x32xf32>,
    } else {
    }
    %c0 = arith.constant 0 : index
    %c0_1 = arith.constant 0 : index
    %3 = vector.load %arg7[%c0, %c0_1] : memref<392x32xf32, #tpu.memory_space<vmem>>, vector<392x32xf32>
    %c0_2 = arith.constant 0 : index
    %c0_3 = arith.constant 0 : index
    %4 = vector.load %arg3[%c0_2, %c0_3] : memref<392x75xbf16, #tpu.memory_space<vmem>>, vector<392x75xbf16>
    %c0_4 = arith.constant 0 : index
    %c0_5 = arith.constant 0 : index
    %5 = vector.load %arg4[%c0_4, %c0_5] : memref<75x32xbf16, #tpu.memory_space<vmem>>, vector<75x32xbf16>
    %cst = arith.constant dense<0.000000e+00> : vector<392x32xf32>
    %6 = tpu.matmul %4, %5, %cst {dimension_numbers = #tpu.dot_dimension_numbers<[1], [0], [0], [1], [0, 0, 1, 1], [], []>} : vector<392x75xbf16>, vector<75x32xbf16>, vector<392x32xf32> -> vector<392x32xf32>
    %7 = arith.addf %3, %6 : vector<392x32xf32>
    %c0_6 = arith.constant 0 : index
    %c0_7 = arith.constant 0 : index
    %8 = vector.load %arg7[%c0_6, %c0_7] : memref<392x32xf32, #tpu.memory_space<vmem>>, vector<392x32xf32>
    tpu.vector_store %arg7[%c0_6, %c0_7], %7 {strides = array<i32>} : memref<392x32xf32, #tpu.memory_space<vmem>>, vector<392x32xf32>,
    %c0_i32_8 = arith.constant 0 : i32
    %9 = arith.cmpi eq, %arg2, %c0_i32_8 : i32
    %10 = arith.extui %9 : i1 to i32
    %c0_i32_9 = arith.constant 0 : i32
    %11 = arith.cmpi ne, %10, %c0_i32_9 : i32
    scf.if %11 {
      %c0_10 = arith.constant 0 : index
      %c0_11 = arith.constant 0 : index
      %12 = vector.load %arg7[%c0_10, %c0_11] : memref<392x32xf32, #tpu.memory_space<vmem>>, vector<392x32xf32>
      %c0_12 = arith.constant 0 : index
      %c0_13 = arith.constant 0 : index
      %13 = vector.load %arg5[%c0_12, %c0_13] : memref<1x32xf32, #tpu.memory_space<vmem>>, vector<1x32xf32>
      %14 = vector.broadcast %13 : vector<1x32xf32> to vector<392x32xf32>
      %15 = arith.addf %12, %14 : vector<392x32xf32>
      %cst_14 = arith.constant 0.000000e+00 : f32
      %16 = vector.broadcast %cst_14 : f32 to vector<392x32xf32>
      %17 = arith.cmpf oge, %15, %16 : vector<392x32xf32>
      %cst_15 = arith.constant 2.500000e-01 : f32
      %18 = vector.broadcast %cst_15 : f32 to vector<392x32xf32>
      %19 = arith.mulf %18, %15 : vector<392x32xf32>
      %20 = arith.select %17, %15, %19 : vector<392x32xi1>, vector<392x32xf32>
      %21 = arith.truncf %20 : vector<392x32xf32> to vector<392x32xbf16>
      %c0_16 = arith.constant 0 : index
      %c0_17 = arith.constant 0 : index
      %22 = vector.load %arg6[%c0_16, %c0_17] : memref<392x32xbf16, #tpu.memory_space<vmem>>, vector<392x32xbf16>
      tpu.vector_store %arg6[%c0_16, %c0_17], %21 {strides = array<i32>} : memref<392x32xbf16, #tpu.memory_space<vmem>>, vector<392x32xbf16>,
    } else {
    }
    return
  }
  func.func @transform_0(%arg0: i32, %arg1: i32, %arg2: i32) -> (i32, i32) {
    %c0_i32 = arith.constant 0 : i32
    return %arg0, %arg2 : i32, i32
  }
  func.func @transform_1(%arg0: i32, %arg1: i32, %arg2: i32) -> (i32, i32) {
    %c0_i32 = arith.constant 0 : i32
    return %arg2, %arg1 : i32, i32
  }
  func.func @transform_2(%arg0: i32, %arg1: i32, %arg2: i32) -> (i32, i32) {
    %c0_i32 = arith.constant 0 : i32
    %c0_i32_0 = arith.constant 0 : i32
    return %c0_i32, %arg1 : i32, i32
  }
  func.func @transform_3(%arg0: i32, %arg1: i32, %arg2: i32) -> (i32, i32) {
    %c0_i32 = arith.constant 0 : i32
    return %arg0, %arg1 : i32, i32
  }
}

module attributes {stable_mosaic.version = 11 : i64} {
  func.func @_max4_kernel(%arg0: i32, %arg1: memref<28x448xbf16, #tpu.memory_space<vmem>>, %arg2: memref<28x448xbf16, #tpu.memory_space<vmem>>, %arg3: memref<28x448xbf16, #tpu.memory_space<vmem>>, %arg4: memref<28x448xbf16, #tpu.memory_space<vmem>>, %arg5: memref<28x448xbf16, #tpu.memory_space<vmem>>) attributes {dimension_semantics = [#tpu.dimension_semantics<parallel>], iteration_bounds = array<i64: 1>, scalar_prefetch = 0 : i64, scratch_operands = 0 : i64, tpu.core_type = #tpu.core_type<tc>, window_params = [{transform_indices = @transform_0, window_bounds = array<i64: 28, 448>}, {transform_indices = @transform_1, window_bounds = array<i64: 28, 448>}, {transform_indices = @transform_2, window_bounds = array<i64: 28, 448>}, {transform_indices = @transform_3, window_bounds = array<i64: 28, 448>}, {transform_indices = @transform_4, window_bounds = array<i64: 28, 448>}]} {
    %c0 = arith.constant 0 : index
    %c0_0 = arith.constant 0 : index
    %0 = vector.load %arg1[%c0, %c0_0] : memref<28x448xbf16, #tpu.memory_space<vmem>>, vector<28x448xbf16>
    %c0_1 = arith.constant 0 : index
    %c0_2 = arith.constant 0 : index
    %1 = vector.load %arg2[%c0_1, %c0_2] : memref<28x448xbf16, #tpu.memory_space<vmem>>, vector<28x448xbf16>
    %2 = arith.maximumf %0, %1 : vector<28x448xbf16>
    %c0_3 = arith.constant 0 : index
    %c0_4 = arith.constant 0 : index
    %3 = vector.load %arg3[%c0_3, %c0_4] : memref<28x448xbf16, #tpu.memory_space<vmem>>, vector<28x448xbf16>
    %c0_5 = arith.constant 0 : index
    %c0_6 = arith.constant 0 : index
    %4 = vector.load %arg4[%c0_5, %c0_6] : memref<28x448xbf16, #tpu.memory_space<vmem>>, vector<28x448xbf16>
    %5 = arith.maximumf %3, %4 : vector<28x448xbf16>
    %6 = arith.maximumf %2, %5 : vector<28x448xbf16>
    %c0_7 = arith.constant 0 : index
    %c0_8 = arith.constant 0 : index
    %7 = vector.load %arg5[%c0_7, %c0_8] : memref<28x448xbf16, #tpu.memory_space<vmem>>, vector<28x448xbf16>
    tpu.vector_store %arg5[%c0_7, %c0_8], %6 {strides = array<i32>} : memref<28x448xbf16, #tpu.memory_space<vmem>>, vector<28x448xbf16>,
    return
  }
  func.func @transform_0(%arg0: i32) -> (i32, i32) {
    %c0_i32 = arith.constant 0 : i32
    %c0_i32_0 = arith.constant 0 : i32
    return %arg0, %c0_i32 : i32, i32
  }
  func.func @transform_1(%arg0: i32) -> (i32, i32) {
    %c0_i32 = arith.constant 0 : i32
    %c0_i32_0 = arith.constant 0 : i32
    return %arg0, %c0_i32 : i32, i32
  }
  func.func @transform_2(%arg0: i32) -> (i32, i32) {
    %c0_i32 = arith.constant 0 : i32
    %c0_i32_0 = arith.constant 0 : i32
    return %arg0, %c0_i32 : i32, i32
  }
  func.func @transform_3(%arg0: i32) -> (i32, i32) {
    %c0_i32 = arith.constant 0 : i32
    %c0_i32_0 = arith.constant 0 : i32
    return %arg0, %c0_i32 : i32, i32
  }
  func.func @transform_4(%arg0: i32) -> (i32, i32) {
    %c0_i32 = arith.constant 0 : i32
    %c0_i32_0 = arith.constant 0 : i32
    return %arg0, %c0_i32 : i32, i32
  }
}

module attributes {stable_mosaic.version = 11 : i64} {
  func.func @kernel(%arg0: i32, %arg1: i32, %arg2: i32, %arg3: memref<200x512xbf16, #tpu.memory_space<vmem>>, %arg4: memref<512x64xbf16, #tpu.memory_space<vmem>>, %arg5: memref<1x64xf32, #tpu.memory_space<vmem>>, %arg6: memref<200x64xbf16, #tpu.memory_space<vmem>>, %arg7: memref<200x64xf32, #tpu.memory_space<vmem>>) attributes {dimension_semantics = [#tpu.dimension_semantics<parallel>, #tpu.dimension_semantics<parallel>, #tpu.dimension_semantics<arbitrary>], iteration_bounds = array<i64: 1, 1, 2>, scalar_prefetch = 0 : i64, scratch_operands = 1 : i64, tpu.core_type = #tpu.core_type<tc>, window_params = [{transform_indices = @transform_0, window_bounds = array<i64: 200, 512>}, {transform_indices = @transform_1, window_bounds = array<i64: 512, 64>}, {transform_indices = @transform_2, window_bounds = array<i64: 1, 64>}, {transform_indices = @transform_3, window_bounds = array<i64: 200, 64>}]} {
    %c0_i32 = arith.constant 0 : i32
    %0 = arith.cmpi eq, %arg2, %c0_i32 : i32
    %1 = arith.extui %0 : i1 to i32
    %c0_i32_0 = arith.constant 0 : i32
    %2 = arith.cmpi ne, %1, %c0_i32_0 : i32
    scf.if %2 {
      %cst_9 = arith.constant 0.000000e+00 : f32
      %12 = vector.broadcast %cst_9 : f32 to vector<200x64xf32>
      %c0_10 = arith.constant 0 : index
      %c0_11 = arith.constant 0 : index
      %13 = vector.load %arg7[%c0_10, %c0_11] : memref<200x64xf32, #tpu.memory_space<vmem>>, vector<200x64xf32>
      tpu.vector_store %arg7[%c0_10, %c0_11], %12 {strides = array<i32>} : memref<200x64xf32, #tpu.memory_space<vmem>>, vector<200x64xf32>,
    } else {
    }
    %c0 = arith.constant 0 : index
    %c0_1 = arith.constant 0 : index
    %3 = vector.load %arg7[%c0, %c0_1] : memref<200x64xf32, #tpu.memory_space<vmem>>, vector<200x64xf32>
    %c0_2 = arith.constant 0 : index
    %c0_3 = arith.constant 0 : index
    %4 = vector.load %arg3[%c0_2, %c0_3] : memref<200x512xbf16, #tpu.memory_space<vmem>>, vector<200x512xbf16>
    %c0_4 = arith.constant 0 : index
    %c0_5 = arith.constant 0 : index
    %5 = vector.load %arg4[%c0_4, %c0_5] : memref<512x64xbf16, #tpu.memory_space<vmem>>, vector<512x64xbf16>
    %cst = arith.constant dense<0.000000e+00> : vector<200x64xf32>
    %6 = tpu.matmul %4, %5, %cst {dimension_numbers = #tpu.dot_dimension_numbers<[1], [0], [0], [1], [0, 0, 1, 1], [], []>} : vector<200x512xbf16>, vector<512x64xbf16>, vector<200x64xf32> -> vector<200x64xf32>
    %7 = arith.addf %3, %6 : vector<200x64xf32>
    %c0_6 = arith.constant 0 : index
    %c0_7 = arith.constant 0 : index
    %8 = vector.load %arg7[%c0_6, %c0_7] : memref<200x64xf32, #tpu.memory_space<vmem>>, vector<200x64xf32>
    tpu.vector_store %arg7[%c0_6, %c0_7], %7 {strides = array<i32>} : memref<200x64xf32, #tpu.memory_space<vmem>>, vector<200x64xf32>,
    %c1_i32 = arith.constant 1 : i32
    %9 = arith.cmpi eq, %arg2, %c1_i32 : i32
    %10 = arith.extui %9 : i1 to i32
    %c0_i32_8 = arith.constant 0 : i32
    %11 = arith.cmpi ne, %10, %c0_i32_8 : i32
    scf.if %11 {
      %c0_9 = arith.constant 0 : index
      %c0_10 = arith.constant 0 : index
      %12 = vector.load %arg7[%c0_9, %c0_10] : memref<200x64xf32, #tpu.memory_space<vmem>>, vector<200x64xf32>
      %c0_11 = arith.constant 0 : index
      %c0_12 = arith.constant 0 : index
      %13 = vector.load %arg5[%c0_11, %c0_12] : memref<1x64xf32, #tpu.memory_space<vmem>>, vector<1x64xf32>
      %14 = vector.broadcast %13 : vector<1x64xf32> to vector<200x64xf32>
      %15 = arith.addf %12, %14 : vector<200x64xf32>
      %cst_13 = arith.constant 0.000000e+00 : f32
      %16 = vector.broadcast %cst_13 : f32 to vector<200x64xf32>
      %17 = arith.cmpf oge, %15, %16 : vector<200x64xf32>
      %cst_14 = arith.constant 2.500000e-01 : f32
      %18 = vector.broadcast %cst_14 : f32 to vector<200x64xf32>
      %19 = arith.mulf %18, %15 : vector<200x64xf32>
      %20 = arith.select %17, %15, %19 : vector<200x64xi1>, vector<200x64xf32>
      %21 = arith.truncf %20 : vector<200x64xf32> to vector<200x64xbf16>
      %c0_15 = arith.constant 0 : index
      %c0_16 = arith.constant 0 : index
      %22 = vector.load %arg6[%c0_15, %c0_16] : memref<200x64xbf16, #tpu.memory_space<vmem>>, vector<200x64xbf16>
      tpu.vector_store %arg6[%c0_15, %c0_16], %21 {strides = array<i32>} : memref<200x64xbf16, #tpu.memory_space<vmem>>, vector<200x64xbf16>,
    } else {
    }
    return
  }
  func.func @transform_0(%arg0: i32, %arg1: i32, %arg2: i32) -> (i32, i32) {
    %c0_i32 = arith.constant 0 : i32
    return %arg0, %arg2 : i32, i32
  }
  func.func @transform_1(%arg0: i32, %arg1: i32, %arg2: i32) -> (i32, i32) {
    %c0_i32 = arith.constant 0 : i32
    return %arg2, %arg1 : i32, i32
  }
  func.func @transform_2(%arg0: i32, %arg1: i32, %arg2: i32) -> (i32, i32) {
    %c0_i32 = arith.constant 0 : i32
    %c0_i32_0 = arith.constant 0 : i32
    return %c0_i32, %arg1 : i32, i32
  }
  func.func @transform_3(%arg0: i32, %arg1: i32, %arg2: i32) -> (i32, i32) {
    %c0_i32 = arith.constant 0 : i32
    return %arg0, %arg1 : i32, i32
  }
}

module attributes {stable_mosaic.version = 11 : i64} {
  func.func @_max4_kernel(%arg0: i32, %arg1: memref<10x320xbf16, #tpu.memory_space<vmem>>, %arg2: memref<10x320xbf16, #tpu.memory_space<vmem>>, %arg3: memref<10x320xbf16, #tpu.memory_space<vmem>>, %arg4: memref<10x320xbf16, #tpu.memory_space<vmem>>, %arg5: memref<10x320xbf16, #tpu.memory_space<vmem>>) attributes {dimension_semantics = [#tpu.dimension_semantics<parallel>], iteration_bounds = array<i64: 1>, scalar_prefetch = 0 : i64, scratch_operands = 0 : i64, tpu.core_type = #tpu.core_type<tc>, window_params = [{transform_indices = @transform_0, window_bounds = array<i64: 10, 320>}, {transform_indices = @transform_1, window_bounds = array<i64: 10, 320>}, {transform_indices = @transform_2, window_bounds = array<i64: 10, 320>}, {transform_indices = @transform_3, window_bounds = array<i64: 10, 320>}, {transform_indices = @transform_4, window_bounds = array<i64: 10, 320>}]} {
    %c0 = arith.constant 0 : index
    %c0_0 = arith.constant 0 : index
    %0 = vector.load %arg1[%c0, %c0_0] : memref<10x320xbf16, #tpu.memory_space<vmem>>, vector<10x320xbf16>
    %c0_1 = arith.constant 0 : index
    %c0_2 = arith.constant 0 : index
    %1 = vector.load %arg2[%c0_1, %c0_2] : memref<10x320xbf16, #tpu.memory_space<vmem>>, vector<10x320xbf16>
    %2 = arith.maximumf %0, %1 : vector<10x320xbf16>
    %c0_3 = arith.constant 0 : index
    %c0_4 = arith.constant 0 : index
    %3 = vector.load %arg3[%c0_3, %c0_4] : memref<10x320xbf16, #tpu.memory_space<vmem>>, vector<10x320xbf16>
    %c0_5 = arith.constant 0 : index
    %c0_6 = arith.constant 0 : index
    %4 = vector.load %arg4[%c0_5, %c0_6] : memref<10x320xbf16, #tpu.memory_space<vmem>>, vector<10x320xbf16>
    %5 = arith.maximumf %3, %4 : vector<10x320xbf16>
    %6 = arith.maximumf %2, %5 : vector<10x320xbf16>
    %c0_7 = arith.constant 0 : index
    %c0_8 = arith.constant 0 : index
    %7 = vector.load %arg5[%c0_7, %c0_8] : memref<10x320xbf16, #tpu.memory_space<vmem>>, vector<10x320xbf16>
    tpu.vector_store %arg5[%c0_7, %c0_8], %6 {strides = array<i32>} : memref<10x320xbf16, #tpu.memory_space<vmem>>, vector<10x320xbf16>,
    return
  }
  func.func @transform_0(%arg0: i32) -> (i32, i32) {
    %c0_i32 = arith.constant 0 : i32
    %c0_i32_0 = arith.constant 0 : i32
    return %arg0, %c0_i32 : i32, i32
  }
  func.func @transform_1(%arg0: i32) -> (i32, i32) {
    %c0_i32 = arith.constant 0 : i32
    %c0_i32_0 = arith.constant 0 : i32
    return %arg0, %c0_i32 : i32, i32
  }
  func.func @transform_2(%arg0: i32) -> (i32, i32) {
    %c0_i32 = arith.constant 0 : i32
    %c0_i32_0 = arith.constant 0 : i32
    return %arg0, %c0_i32 : i32, i32
  }
  func.func @transform_3(%arg0: i32) -> (i32, i32) {
    %c0_i32 = arith.constant 0 : i32
    %c0_i32_0 = arith.constant 0 : i32
    return %arg0, %c0_i32 : i32, i32
  }
  func.func @transform_4(%arg0: i32) -> (i32, i32) {
    %c0_i32 = arith.constant 0 : i32
    %c0_i32_0 = arith.constant 0 : i32
    return %arg0, %c0_i32 : i32, i32
  }
}

module attributes {stable_mosaic.version = 11 : i64} {
  func.func @kernel(%arg0: i32, %arg1: i32, %arg2: i32, %arg3: memref<2x512xbf16, #tpu.memory_space<vmem>>, %arg4: memref<512x64xbf16, #tpu.memory_space<vmem>>, %arg5: memref<1x64xf32, #tpu.memory_space<vmem>>, %arg6: memref<2x64xf32, #tpu.memory_space<vmem>>, %arg7: memref<2x64xf32, #tpu.memory_space<vmem>>) attributes {dimension_semantics = [#tpu.dimension_semantics<parallel>, #tpu.dimension_semantics<parallel>, #tpu.dimension_semantics<arbitrary>], iteration_bounds = array<i64: 1, 1, 1>, scalar_prefetch = 0 : i64, scratch_operands = 1 : i64, tpu.core_type = #tpu.core_type<tc>, window_params = [{transform_indices = @transform_0, window_bounds = array<i64: 2, 512>}, {transform_indices = @transform_1, window_bounds = array<i64: 512, 64>}, {transform_indices = @transform_2, window_bounds = array<i64: 1, 64>}, {transform_indices = @transform_3, window_bounds = array<i64: 2, 64>}]} {
    %c0_i32 = arith.constant 0 : i32
    %0 = arith.cmpi eq, %arg2, %c0_i32 : i32
    %1 = arith.extui %0 : i1 to i32
    %c0_i32_0 = arith.constant 0 : i32
    %2 = arith.cmpi ne, %1, %c0_i32_0 : i32
    scf.if %2 {
      %cst_10 = arith.constant 0.000000e+00 : f32
      %12 = vector.broadcast %cst_10 : f32 to vector<2x64xf32>
      %c0_11 = arith.constant 0 : index
      %c0_12 = arith.constant 0 : index
      %13 = vector.load %arg7[%c0_11, %c0_12] : memref<2x64xf32, #tpu.memory_space<vmem>>, vector<2x64xf32>
      tpu.vector_store %arg7[%c0_11, %c0_12], %12 {strides = array<i32>} : memref<2x64xf32, #tpu.memory_space<vmem>>, vector<2x64xf32>,
    } else {
    }
    %c0 = arith.constant 0 : index
    %c0_1 = arith.constant 0 : index
    %3 = vector.load %arg7[%c0, %c0_1] : memref<2x64xf32, #tpu.memory_space<vmem>>, vector<2x64xf32>
    %c0_2 = arith.constant 0 : index
    %c0_3 = arith.constant 0 : index
    %4 = vector.load %arg3[%c0_2, %c0_3] : memref<2x512xbf16, #tpu.memory_space<vmem>>, vector<2x512xbf16>
    %c0_4 = arith.constant 0 : index
    %c0_5 = arith.constant 0 : index
    %5 = vector.load %arg4[%c0_4, %c0_5] : memref<512x64xbf16, #tpu.memory_space<vmem>>, vector<512x64xbf16>
    %cst = arith.constant dense<0.000000e+00> : vector<2x64xf32>
    %6 = tpu.matmul %4, %5, %cst {dimension_numbers = #tpu.dot_dimension_numbers<[1], [0], [0], [1], [0, 0, 1, 1], [], []>} : vector<2x512xbf16>, vector<512x64xbf16>, vector<2x64xf32> -> vector<2x64xf32>
    %7 = arith.addf %3, %6 : vector<2x64xf32>
    %c0_6 = arith.constant 0 : index
    %c0_7 = arith.constant 0 : index
    %8 = vector.load %arg7[%c0_6, %c0_7] : memref<2x64xf32, #tpu.memory_space<vmem>>, vector<2x64xf32>
    tpu.vector_store %arg7[%c0_6, %c0_7], %7 {strides = array<i32>} : memref<2x64xf32, #tpu.memory_space<vmem>>, vector<2x64xf32>,
    %c0_i32_8 = arith.constant 0 : i32
    %9 = arith.cmpi eq, %arg2, %c0_i32_8 : i32
    %10 = arith.extui %9 : i1 to i32
    %c0_i32_9 = arith.constant 0 : i32
    %11 = arith.cmpi ne, %10, %c0_i32_9 : i32
    scf.if %11 {
      %c0_10 = arith.constant 0 : index
      %c0_11 = arith.constant 0 : index
      %12 = vector.load %arg7[%c0_10, %c0_11] : memref<2x64xf32, #tpu.memory_space<vmem>>, vector<2x64xf32>
      %c0_12 = arith.constant 0 : index
      %c0_13 = arith.constant 0 : index
      %13 = vector.load %arg5[%c0_12, %c0_13] : memref<1x64xf32, #tpu.memory_space<vmem>>, vector<1x64xf32>
      %14 = vector.broadcast %13 : vector<1x64xf32> to vector<2x64xf32>
      %15 = arith.addf %12, %14 : vector<2x64xf32>
      %c0_14 = arith.constant 0 : index
      %c0_15 = arith.constant 0 : index
      %16 = vector.load %arg6[%c0_14, %c0_15] : memref<2x64xf32, #tpu.memory_space<vmem>>, vector<2x64xf32>
      tpu.vector_store %arg6[%c0_14, %c0_15], %15 {strides = array<i32>} : memref<2x64xf32, #tpu.memory_space<vmem>>, vector<2x64xf32>,
    } else {
    }
    return
  }
  func.func @transform_0(%arg0: i32, %arg1: i32, %arg2: i32) -> (i32, i32) {
    %c0_i32 = arith.constant 0 : i32
    return %arg0, %arg2 : i32, i32
  }
  func.func @transform_1(%arg0: i32, %arg1: i32, %arg2: i32) -> (i32, i32) {
    %c0_i32 = arith.constant 0 : i32
    return %arg2, %arg1 : i32, i32
  }
  func.func @transform_2(%arg0: i32, %arg1: i32, %arg2: i32) -> (i32, i32) {
    %c0_i32 = arith.constant 0 : i32
    %c0_i32_0 = arith.constant 0 : i32
    return %c0_i32, %arg1 : i32, i32
  }
  func.func @transform_3(%arg0: i32, %arg1: i32, %arg2: i32) -> (i32, i32) {
    %c0_i32 = arith.constant 0 : i32
    return %arg0, %arg1 : i32, i32
  }
}

module attributes {stable_mosaic.version = 11 : i64} {
  func.func @kernel(%arg0: i32, %arg1: i32, %arg2: i32, %arg3: memref<2x512xbf16, #tpu.memory_space<vmem>>, %arg4: memref<512x512xbf16, #tpu.memory_space<vmem>>, %arg5: memref<1x512xf32, #tpu.memory_space<vmem>>, %arg6: memref<2x512xbf16, #tpu.memory_space<vmem>>, %arg7: memref<2x512xf32, #tpu.memory_space<vmem>>) attributes {dimension_semantics = [#tpu.dimension_semantics<parallel>, #tpu.dimension_semantics<parallel>, #tpu.dimension_semantics<arbitrary>], iteration_bounds = array<i64: 1, 1, 4>, scalar_prefetch = 0 : i64, scratch_operands = 1 : i64, tpu.core_type = #tpu.core_type<tc>, window_params = [{transform_indices = @transform_0, window_bounds = array<i64: 2, 512>}, {transform_indices = @transform_1, window_bounds = array<i64: 512, 512>}, {transform_indices = @transform_2, window_bounds = array<i64: 1, 512>}, {transform_indices = @transform_3, window_bounds = array<i64: 2, 512>}]} {
    %c0_i32 = arith.constant 0 : i32
    %0 = arith.cmpi eq, %arg2, %c0_i32 : i32
    %1 = arith.extui %0 : i1 to i32
    %c0_i32_0 = arith.constant 0 : i32
    %2 = arith.cmpi ne, %1, %c0_i32_0 : i32
    scf.if %2 {
      %cst_9 = arith.constant 0.000000e+00 : f32
      %12 = vector.broadcast %cst_9 : f32 to vector<2x512xf32>
      %c0_10 = arith.constant 0 : index
      %c0_11 = arith.constant 0 : index
      %13 = vector.load %arg7[%c0_10, %c0_11] : memref<2x512xf32, #tpu.memory_space<vmem>>, vector<2x512xf32>
      tpu.vector_store %arg7[%c0_10, %c0_11], %12 {strides = array<i32>} : memref<2x512xf32, #tpu.memory_space<vmem>>, vector<2x512xf32>,
    } else {
    }
    %c0 = arith.constant 0 : index
    %c0_1 = arith.constant 0 : index
    %3 = vector.load %arg7[%c0, %c0_1] : memref<2x512xf32, #tpu.memory_space<vmem>>, vector<2x512xf32>
    %c0_2 = arith.constant 0 : index
    %c0_3 = arith.constant 0 : index
    %4 = vector.load %arg3[%c0_2, %c0_3] : memref<2x512xbf16, #tpu.memory_space<vmem>>, vector<2x512xbf16>
    %c0_4 = arith.constant 0 : index
    %c0_5 = arith.constant 0 : index
    %5 = vector.load %arg4[%c0_4, %c0_5] : memref<512x512xbf16, #tpu.memory_space<vmem>>, vector<512x512xbf16>
    %cst = arith.constant dense<0.000000e+00> : vector<2x512xf32>
    %6 = tpu.matmul %4, %5, %cst {dimension_numbers = #tpu.dot_dimension_numbers<[1], [0], [0], [1], [0, 0, 1, 1], [], []>} : vector<2x512xbf16>, vector<512x512xbf16>, vector<2x512xf32> -> vector<2x512xf32>
    %7 = arith.addf %3, %6 : vector<2x512xf32>
    %c0_6 = arith.constant 0 : index
    %c0_7 = arith.constant 0 : index
    %8 = vector.load %arg7[%c0_6, %c0_7] : memref<2x512xf32, #tpu.memory_space<vmem>>, vector<2x512xf32>
    tpu.vector_store %arg7[%c0_6, %c0_7], %7 {strides = array<i32>} : memref<2x512xf32, #tpu.memory_space<vmem>>, vector<2x512xf32>,
    %c3_i32 = arith.constant 3 : i32
    %9 = arith.cmpi eq, %arg2, %c3_i32 : i32
    %10 = arith.extui %9 : i1 to i32
    %c0_i32_8 = arith.constant 0 : i32
    %11 = arith.cmpi ne, %10, %c0_i32_8 : i32
    scf.if %11 {
      %c0_9 = arith.constant 0 : index
      %c0_10 = arith.constant 0 : index
      %12 = vector.load %arg7[%c0_9, %c0_10] : memref<2x512xf32, #tpu.memory_space<vmem>>, vector<2x512xf32>
      %c0_11 = arith.constant 0 : index
      %c0_12 = arith.constant 0 : index
      %13 = vector.load %arg5[%c0_11, %c0_12] : memref<1x512xf32, #tpu.memory_space<vmem>>, vector<1x512xf32>
      %14 = vector.broadcast %13 : vector<1x512xf32> to vector<2x512xf32>
      %15 = arith.addf %12, %14 : vector<2x512xf32>
      %cst_13 = arith.constant 0.000000e+00 : f32
      %16 = vector.broadcast %cst_13 : f32 to vector<2x512xf32>
      %17 = arith.cmpf oge, %15, %16 : vector<2x512xf32>
      %cst_14 = arith.constant 2.500000e-01 : f32
      %18 = vector.broadcast %cst_14 : f32 to vector<2x512xf32>
      %19 = arith.mulf %18, %15 : vector<2x512xf32>
      %20 = arith.select %17, %15, %19 : vector<2x512xi1>, vector<2x512xf32>
      %21 = arith.truncf %20 : vector<2x512xf32> to vector<2x512xbf16>
      %c0_15 = arith.constant 0 : index
      %c0_16 = arith.constant 0 : index
      %22 = vector.load %arg6[%c0_15, %c0_16] : memref<2x512xbf16, #tpu.memory_space<vmem>>, vector<2x512xbf16>
      tpu.vector_store %arg6[%c0_15, %c0_16], %21 {strides = array<i32>} : memref<2x512xbf16, #tpu.memory_space<vmem>>, vector<2x512xbf16>,
    } else {
    }
    return
  }
  func.func @transform_0(%arg0: i32, %arg1: i32, %arg2: i32) -> (i32, i32) {
    %c0_i32 = arith.constant 0 : i32
    return %arg0, %arg2 : i32, i32
  }
  func.func @transform_1(%arg0: i32, %arg1: i32, %arg2: i32) -> (i32, i32) {
    %c0_i32 = arith.constant 0 : i32
    return %arg2, %arg1 : i32, i32
  }
  func.func @transform_2(%arg0: i32, %arg1: i32, %arg2: i32) -> (i32, i32) {
    %c0_i32 = arith.constant 0 : i32
    %c0_i32_0 = arith.constant 0 : i32
    return %c0_i32, %arg1 : i32, i32
  }
  func.func @transform_3(%arg0: i32, %arg1: i32, %arg2: i32) -> (i32, i32) {
    %c0_i32 = arith.constant 0 : i32
    return %arg0, %arg1 : i32, i32
  }
}

</mosaic_0001>

<bundles_post_ra>
// kernel: a_call__.6
= control target key start
LH: loop header
LB: loop body
LE: loop exit
PB: predicated region body
PF: predicated region fallthrough
CT: control target
= control target key end

     0   :  { %s2021_s12 = smov 0   ;;  %s2023_s13 = smov 0   ;;  %s2495_s0 = inlined_call_operand.vmem [shape: bf16[1568,75], index: 0, kind: input, shape index: {}]   ;;  %s2496_s1 = inlined_call_operand.vmem [shape: bf16[75,32], index: 1, kind: input, shape index: {}]   ;;  %s2497_s2 = inlined_call_operand.vmem [shape: f32[1,32], index: 2, kind: input, shape index: {}]   ;;  %s2498_s3 = inlined_call_operand.vmem [shape: bf16[1568,32], index: 3, kind: output, shape index: {}]  }
   0x1   :  { %s2025_s14 = smov 0  }
   0x2 LB: > { %s32_s15 = sadd.s32 1, %s1992_s13  ;;  %p1607_p0 = scmp.ge.s32.totalorder %s1996_s14, 1  ;;  %s1996_s14 = sphi %s2025_s14, %s13_s14   ;;  %s1992_s13 = sphi %s2023_s13, %s2500_s13   ;;  %s1988_s12 = sphi %s2021_s12, %s2499_s12  }
   0x3   : > { %p34_p1 = scmp.ge.s32.totalorder %s32_s15, 4  ;;  %p188_p2 = scmp.lt.s32.totalorder %s1996_s14, 5 }
   0x5   : > { %s2502_s15 = smov (%p34_p1, %s32_s15), 0  ;;  %p189_p3 = pnand %p1607_p0, %p188_p2 }
   0x6   : > { %v1943_v0 = vld [vmem:[%s2496_s1] sm:$0xff] (!%p189_p3)   ;;  %v1998_v1 = vmov (!%p189_p3), 0.0   ;;  %v1944_v2 = vld [vmem:[%s2496_s1 + $0x8] sm:$0xff] (!%p189_p3)   ;;  %vm650_vm0 = vcmask (!%p189_p3), 1044480   ;;  %s229_s20 = smul.u32 (!%p189_p3), 49, %s1988_s12  ;;  %vm264_vm1 = vcmask (!%p189_p3), 261120  }
   0x7   : > { %192 = sbr.rel (%p189_p3) target bundleno = 356 (0x164), region = 32  ;;  %1796 = vmatprep.subr.bf16.mxu0 (!%p189_p3), %v1998_v1  ;;  %1906 = vmatprep.subr.bf16.mxu1 (!%p189_p3), %v1998_v1  ;;  %v1945_v3 = vld [vmem:[%s2496_s1 + $0x10] sm:$0xff] (!%p189_p3)   ;;  %265 = vst.msk [vmem:[#allocation2] sm:$0xff] (!%p189_p3), %vm264_vm1, %v1998_v1  ;;  %266 = vst.msk [vmem:[#allocation2 + $0x8] sm:$0xff] (!%p189_p3), %vm264_vm1, %v1998_v1  ;;  %vm651_vm2 = vcmask (!%p189_p3), 1045504   ;;  %v1999_v4 = vmov (!%p189_p3), 65535  }
   0x8   : > { %1797 = vmatpush3.bf16.msra.mxu0 (!%p189_p3), %v1943_v0  ;;  %1911 = vmatpush3.bf16.msra.mxu1 (!%p189_p3), %v1943_v0  ;;  %267 = vst.msk [vmem:[#allocation2 + $0x10] sm:$0xff] (!%p189_p3), %vm264_vm1, %v1998_v1  ;;  %268 = vst.msk [vmem:[#allocation2 + $0x18] sm:$0xff] (!%p189_p3), %vm264_vm1, %v1998_v1  ;;  %p230_p4 = scmp.lt.s32.totalorder (!%p189_p3), %s229_s20, 195  ;;  %v652_v5 = vsel (!%p189_p3), %vm650_vm0, 4294967295, %v1999_v4  ;;  %vm2000_vm3 = vmmov (!%p189_p3), 0   ;;  %v1946_v6 = vld [vmem:[%s2496_s1 + $0x18] sm:$0xff] (!%p189_p3)  }
   0x9   : > { %1798 = vmatprep.subr.bf16.mxu0 (!%p189_p3), %v1998_v1  ;;  %1907 = vmatprep.subr.bf16.mxu1 (!%p189_p3), %v1998_v1  ;;  %269 = vst.msk [vmem:[#allocation2 + $0x20] sm:$0xff] (!%p189_p3), %vm264_vm1, %v1998_v1  ;;  %270 = vst.msk [vmem:[#allocation2 + $0x28] sm:$0xff] (!%p189_p3), %vm264_vm1, %v1998_v1  ;;  %v1947_v7 = vld [vmem:[%s2496_s1 + $0x20] sm:$0x3f] (!%p189_p3)   ;;  %v653_v8 = vsel (!%p189_p3), %vm651_vm2, %v652_v5, 0  ;;  %vm574_vm4 = vcmask (!%p189_p3), 613376  }
   0xa   : > { %271 = vst.msk [vmem:[#allocation2 + $0x30] sm:$0xff] (!%p189_p3), %vm264_vm1, %v1998_v1  ;;  %272 = vst.msk [vmem:[#allocation2 + $0x38] sm:$0xff] (!%p189_p3), %vm264_vm1, %v1998_v1  ;;  %1806 = vmatprep.mubr.msk.bf16.mxu0 (!%p189_p3), %vm2000_vm3, %v1998_v1  ;;  %1858 = vmatprep.mubr.msk.bf16.mxu1 (!%p189_p3), %vm2000_vm3, %v1998_v1  ;;  %v655_v9 = vand.u32 (!%p189_p3), %v1947_v7, %v653_v8  ;;  %v2287_v53 = vld [vmem:[%s2497_s2] ss:$0 sm:$0xff] (!%p189_p3)  ;;  %vm1440_vm7 = vcmask (!%p189_p3), 257024  }
   0xb   : > { %273 = vst.msk [vmem:[#allocation2 + $0x40] sm:$0xff] (!%p189_p3), %vm264_vm1, %v1998_v1  ;;  %274 = vst.msk [vmem:[#allocation2 + $0x48] sm:$0xff] (!%p189_p3), %vm264_vm1, %v1998_v1 }
   0xc   : > { %1799 = vmatpush3.bf16.msra.mxu0 (!%p189_p3), %v1944_v2  ;;  %1912 = vmatpush3.bf16.msra.mxu1 (!%p189_p3), %v1944_v2  ;;  %275 = vst.msk [vmem:[#allocation2 + $0x50] sm:$0xff] (!%p189_p3), %vm264_vm1, %v1998_v1  ;;  %276 = vst.msk [vmem:[#allocation2 + $0x58] sm:$0xff] (!%p189_p3), %vm264_vm1, %v1998_v1 }
   0xd   : > { %277 = vst.msk [vmem:[#allocation2 + $0x60] sm:$0xff] (!%p189_p3), %vm264_vm1, %v1998_v1  ;;  %278 = vst.msk [vmem:[#allocation2 + $0x68] sm:$0xff] (!%p189_p3), %vm264_vm1, %v1998_v1  ;;  %1800 = vmatprep.subr.bf16.mxu0 (!%p189_p3), %v1998_v1  ;;  %1908 = vmatprep.subr.bf16.mxu1 (!%p189_p3), %v1998_v1 }
   0xe   : > { %279 = vst.msk [vmem:[#allocation2 + $0x70] sm:$0xff] %vm264_vm1, %v1998_v1  ;;  %280 = vst.msk [vmem:[#allocation2 + $0x78] sm:$0xff] %vm264_vm1, %v1998_v1  ;;  %s2504_s20 = smov (!%p230_p4, %s229_s20), 195  ;;  %v314_v35 = vld [vmem:[#allocation2] sm:$0xff]  ;;  %v315_v38 = vld [vmem:[#allocation2 + $0x8] sm:$0xff] }
   0xf   : > { %281 = vst.msk [vmem:[#allocation2 + $0x80] sm:$0xff] %vm264_vm1, %v1998_v1  ;;  %282 = vst.msk [vmem:[#allocation2 + $0x88] sm:$0xff] %vm264_vm1, %v1998_v1  ;;  %s1608_s27 = sshll.u32 %s2504_s20, 2  ;;  %v316_v51 = vld [vmem:[#allocation2 + $0x10] sm:$0xff]  ;;  %v317_v55 = vld [vmem:[#allocation2 + $0x18] sm:$0xff] }
  0x10   : > { %283 = vst.msk [vmem:[#allocation2 + $0x90] sm:$0xff] %vm264_vm1, %v1998_v1  ;;  %284 = vst.msk [vmem:[#allocation2 + $0x98] sm:$0xff] %vm264_vm1, %v1998_v1  ;;  %1801 = vmatpush3.bf16.msra.mxu0 %v1945_v3  ;;  %1913 = vmatpush3.bf16.msra.mxu1 %v1945_v3  ;;  %s2180_s30 = scalar_lea.vmem %s2495_s0, %s1608_s27  ;;  %s2302_s8 = scalar_lea.vmem %s2498_s3, %s1608_s27 }
  0x11   : > { %285 = vst.msk [vmem:[#allocation2 + $0xa0] sm:$0xff] %vm264_vm1, %v1998_v1  ;;  %286 = vst.msk [vmem:[#allocation2 + $0xa8] sm:$0xff] %vm264_vm1, %v1998_v1  ;;  %1802 = vmatprep.subr.bf16.mxu0 %v1998_v1  ;;  %1909 = vmatprep.subr.bf16.mxu1 %v1998_v1  ;;  %v1948_v10 = vld [vmem:[%s2180_s30] sm:$0xff]   ;;  %v1949_v11 = vld [vmem:[%s2180_s30 + $0x68] sm:$0xff]  }
  0x12   : > { %287 = vst.msk [vmem:[#allocation2 + $0xb0] sm:$0xff] %vm264_vm1, %v1998_v1  ;;  %288 = vst.msk [vmem:[#allocation2 + $0xb8] sm:$0xff] %vm264_vm1, %v1998_v1  ;;  %v1950_v12 = vld [vmem:[%s2180_s30 + $0x8] sm:$0xff]   ;;  %v1951_v13 = vld [vmem:[%s2180_s30 + $0x70] sm:$0xff]  }
  0x13   : > { %289 = vst.msk [vmem:[#allocation2 + $0xc0] sm:$0xff] %vm264_vm1, %v1998_v1  ;;  %290 = vst.msk [vmem:[#allocation2 + $0xc8] sm:$0xff] %vm264_vm1, %v1998_v1  ;;  %v1952_v14 = vld [vmem:[%s2180_s30 + $0x10] sm:$0xff]   ;;  %v1953_v15 = vld [vmem:[%s2180_s30 + $0x78] sm:$0xff]  }
  0x14   : > { %291 = vst.msk [vmem:[#allocation2 + $0xd0] sm:$0xff] %vm264_vm1, %v1998_v1  ;;  %292 = vst.msk [vmem:[#allocation2 + $0xd8] sm:$0xff] %vm264_vm1, %v1998_v1  ;;  %1803 = vmatpush3.bf16.msra.mxu0 %v1946_v6  ;;  %1914 = vmatpush3.bf16.msra.mxu1 %v1946_v6  ;;  %v1954_v16 = vld [vmem:[%s2180_s30 + $0x18] sm:$0xff]   ;;  %v1955_v17 = vld [vmem:[%s2180_s30 + $0x80] sm:$0xff]  }
  0x15   : > { %293 = vst.msk [vmem:[#allocation2 + $0xe0] sm:$0xff] %vm264_vm1, %v1998_v1  ;;  %294 = vst.msk [vmem:[#allocation2 + $0xe8] sm:$0xff] %vm264_vm1, %v1998_v1  ;;  %1804 = vmatprep.subr.bf16.mxu0 %v1998_v1  ;;  %1910 = vmatprep.subr.bf16.mxu1 %v1998_v1  ;;  %v1956_v18 = vld [vmem:[%s2180_s30 + $0x20] sm:$0xff]   ;;  %v1957_v19 = vld [vmem:[%s2180_s30 + $0x88] sm:$0xff]  }
  0x16   : > { %295 = vst.msk [vmem:[#allocation2 + $0xf0] sm:$0xff] %vm264_vm1, %v1998_v1  ;;  %296 = vst.msk [vmem:[#allocation2 + $0xf8] sm:$0xff] %vm264_vm1, %v1998_v1  ;;  %v1958_v20 = vld [vmem:[%s2180_s30 + $0x28] sm:$0xff]   ;;  %v1959_v21 = vld [vmem:[%s2180_s30 + $0x90] sm:$0xff]  }
  0x17   : > { %297 = vst.msk [vmem:[#allocation2 + $0x100] sm:$0xff] %vm264_vm1, %v1998_v1  ;;  %298 = vst.msk [vmem:[#allocation2 + $0x108] sm:$0xff] %vm264_vm1, %v1998_v1  ;;  %v1960_v22 = vld [vmem:[%s2180_s30 + $0x30] sm:$0xff]   ;;  %v1961_v23 = vld [vmem:[%s2180_s30 + $0x98] sm:$0xff]  }
  0x18   : > { %299 = vst.msk [vmem:[#allocation2 + $0x110] sm:$0xff] %vm264_vm1, %v1998_v1  ;;  %300 = vst.msk [vmem:[#allocation2 + $0x118] sm:$0xff] %vm264_vm1, %v1998_v1  ;;  %1805 = vmatpush3.bf16.msra.mxu0 %v655_v9  ;;  %1915 = vmatpush3.bf16.msra.mxu1 %v655_v9  ;;  %v1962_v24 = vld [vmem:[%s2180_s30 + $0x38] sm:$0xff]   ;;  %v1963_v25 = vld [vmem:[%s2180_s30 + $0xa0] sm:$0xff]  }
  0x19   : > { %301 = vst.msk [vmem:[#allocation2 + $0x120] sm:$0xff] %vm264_vm1, %v1998_v1  ;;  %302 = vst.msk [vmem:[#allocation2 + $0x128] sm:$0xff] %vm264_vm1, %v1998_v1  ;;  %v1964_v26 = vld [vmem:[%s2180_s30 + $0x40] sm:$0xff]   ;;  %v1965_v27 = vld [vmem:[%s2180_s30 + $0xa8] sm:$0xff]  }
  0x1a   : > { %303 = vst.msk [vmem:[#allocation2 + $0x130] sm:$0xff] %vm264_vm1, %v1998_v1  ;;  %304 = vst.msk [vmem:[#allocation2 + $0x138] sm:$0xff] %vm264_vm1, %v1998_v1  ;;  %v1966_v28 = vld [vmem:[%s2180_s30 + $0x48] sm:$0xff]   ;;  %v1967_v29 = vld [vmem:[%s2180_s30 + $0xb0] sm:$0xff]  }
  0x1b   : > { %305 = vst.msk [vmem:[#allocation2 + $0x140] sm:$0xff] %vm264_vm1, %v1998_v1  ;;  %306 = vst.msk [vmem:[#allocation2 + $0x148] sm:$0xff] %vm264_vm1, %v1998_v1  ;;  %1807 = vmatmul.mubr.msk.bf16.vlgmr.msra.gmra.mrb[0].mxu0 %vm574_vm4, %v1948_v10  ;;  %1859 = vmatmul.mubr.msk.bf16.vlgmr.msra.gmra.mrb[0].mxu1 %vm574_vm4, %v1949_v11  ;;  %v1968_v30 = vld [vmem:[%s2180_s30 + $0x50] sm:$0xff]   ;;  %v1969_v31 = vld [vmem:[%s2180_s30 + $0xb8] sm:$0xff]  }
  0x1c   : > { %307 = vst.msk [vmem:[#allocation2 + $0x150] sm:$0xff] %vm264_vm1, %v1998_v1  ;;  %308 = vst.msk [vmem:[#allocation2 + $0x158] sm:$0xff] %vm264_vm1, %v1998_v1  ;;  %1810 = vmatprep.mubr.msk.bf16.mxu0 %vm2000_vm3, %v1998_v1  ;;  %1862 = vmatprep.mubr.msk.bf16.mxu1 %vm2000_vm3, %v1998_v1  ;;  %v1970_v32 = vld [vmem:[%s2180_s30 + $0x58] sm:$0xff]   ;;  %v1971_v33 = vld [vmem:[%s2180_s30 + $0xc0] ss:$0 sps:$4 sm:$0xff]  }
  0x1d   : > { %309 = vst.msk [vmem:[#allocation2 + $0x160] sm:$0xff] %vm264_vm1, %v1998_v1  ;;  %310 = vst.msk [vmem:[#allocation2 + $0x168] sm:$0xff] %vm264_vm1, %v1998_v1  ;;  %v1972_v34 = vld [vmem:[%s2180_s30 + $0x60] sm:$0xff]   ;;  %v340_v36 = vld [vmem:[#allocation2 + $0xd0] sm:$0xff] }
  0x1e   : > { %311 = vst.msk [vmem:[#allocation2 + $0x170] sm:$0xff] %vm264_vm1, %v1998_v1  ;;  %312 = vst.msk [vmem:[#allocation2 + $0x178] sm:$0xff] %vm264_vm1, %v1998_v1  ;;  %v341_v40 = vld [vmem:[#allocation2 + $0xd8] sm:$0xff]  ;;  %v342_v52 = vld [vmem:[#allocation2 + $0xe0] sm:$0xff] }
  0x1f   : > { %313 = vst.msk [vmem:[#allocation2 + $0x180] sm:$0xff] %vm264_vm1, %v1998_v1  ;;  %v343_v57 = vld [vmem:[#allocation2 + $0xe8] sm:$0xff] }
  0x23   : > { %1811 = vmatmul.mubr.msk.bf16.gmra.mrb[4].mxu0 %vm574_vm4, %v1950_v12  ;;  %1863 = vmatmul.mubr.msk.bf16.gmra.mrb[4].mxu1 %vm574_vm4, %v1951_v13 }
  0x24   : > { %1814 = vmatprep.mubr.msk.bf16.mxu0 %vm2000_vm3, %v1998_v1  ;;  %1866 = vmatprep.mubr.msk.bf16.mxu1 %vm2000_vm3, %v1998_v1 }
  0x2b   : > { %1815 = vmatmul.mubr.msk.bf16.gmra.mrb[8].mxu0 %vm574_vm4, %v1952_v14  ;;  %1867 = vmatmul.mubr.msk.bf16.gmra.mrb[8].mxu1 %vm574_vm4, %v1953_v15  ;;  %v318_v14 = vld [vmem:[#allocation2 + $0x20] sm:$0xff]  ;;  %v344_v15 = vld [vmem:[#allocation2 + $0xf0] sm:$0xff] }
  0x2c   : > { %1818 = vmatprep.mubr.msk.bf16.mxu0 %vm2000_vm3, %v1998_v1  ;;  %1870 = vmatprep.mubr.msk.bf16.mxu1 %vm2000_vm3, %v1998_v1 }
  0x33   : > { %1819 = vmatmul.mubr.msk.bf16.gmra.mrb[12].mxu0 %vm574_vm4, %v1954_v16  ;;  %1871 = vmatmul.mubr.msk.bf16.gmra.mrb[12].mxu1 %vm574_vm4, %v1955_v17 }
  0x34   : > { %1822 = vmatprep.mubr.msk.bf16.mxu0 %vm2000_vm3, %v1998_v1  ;;  %1874 = vmatprep.mubr.msk.bf16.mxu1 %vm2000_vm3, %v1998_v1 }
  0x3b   : > { %1823 = vmatmul.mubr.msk.bf16.gmra.mrb[16].mxu0 %vm574_vm4, %v1956_v18  ;;  %1875 = vmatmul.mubr.msk.bf16.gmra.mrb[16].mxu1 %vm574_vm4, %v1957_v19 }
  0x3c   : > { %1826 = vmatprep.mubr.msk.bf16.mxu0 %vm2000_vm3, %v1998_v1  ;;  %1878 = vmatprep.mubr.msk.bf16.mxu1 %vm2000_vm3, %v1998_v1 }
  0x43   : > { %1827 = vmatmul.mubr.msk.bf16.gmra.mrb[20].mxu0 %vm574_vm4, %v1958_v20  ;;  %1879 = vmatmul.mubr.msk.bf16.gmra.mrb[20].mxu1 %vm574_vm4, %v1959_v21 }
  0x44   : > { %1830 = vmatprep.mubr.msk.bf16.mxu0 %vm2000_vm3, %v1998_v1  ;;  %1882 = vmatprep.mubr.msk.bf16.mxu1 %vm2000_vm3, %v1998_v1 }
  0x4b   : > { %1831 = vmatmul.mubr.msk.bf16.gmra.mrb[24].mxu0 %vm574_vm4, %v1960_v22  ;;  %1883 = vmatmul.mubr.msk.bf16.gmra.mrb[24].mxu1 %vm574_vm4, %v1961_v23  ;;  %v319_v22 = vld [vmem:[#allocation2 + $0x28] sm:$0xff] }
  0x4c   : > { %1834 = vmatprep.mubr.msk.bf16.mxu0 %vm2000_vm3, %v1998_v1  ;;  %1886 = vmatprep.mubr.msk.bf16.mxu1 %vm2000_vm3, %v1998_v1 }
  0x53   : > { %1835 = vmatmul.mubr.msk.bf16.gmra.mrb[28].mxu0 %vm574_vm4, %v1962_v24  ;;  %1887 = vmatmul.mubr.msk.bf16.gmra.mrb[28].mxu1 %vm574_vm4, %v1963_v25 }
  0x54   : > { %1838 = vmatprep.mubr.msk.bf16.mxu0 %vm2000_vm3, %v1998_v1  ;;  %1890 = vmatprep.mubr.msk.bf16.mxu1 %vm2000_vm3, %v1998_v1 }
  0x5b   : > { %1839 = vmatmul.mubr.msk.bf16.gmra.mrb[32].mxu0 %vm574_vm4, %v1964_v26  ;;  %1891 = vmatmul.mubr.msk.bf16.gmra.mrb[32].mxu1 %vm574_vm4, %v1965_v27 }
  0x5c   : > { %1842 = vmatprep.mubr.msk.bf16.mxu0 %vm2000_vm3, %v1998_v1  ;;  %1894 = vmatprep.mubr.msk.bf16.mxu1 %vm2000_vm3, %v1998_v1 }
  0x63   : > { %1843 = vmatmul.mubr.msk.bf16.gmra.mrb[36].mxu0 %vm574_vm4, %v1966_v28  ;;  %1895 = vmatmul.mubr.msk.bf16.gmra.mrb[36].mxu1 %vm574_vm4, %v1967_v29 }
  0x64   : > { %1846 = vmatprep.mubr.msk.bf16.mxu0 %vm2000_vm3, %v1998_v1  ;;  %1898 = vmatprep.mubr.msk.bf16.mxu1 %vm2000_vm3, %v1998_v1 }
  0x6b   : > { %1847 = vmatmul.mubr.msk.bf16.gmra.mrb[40].mxu0 %vm574_vm4, %v1968_v30  ;;  %1899 = vmatmul.mubr.msk.bf16.gmra.mrb[40].mxu1 %vm574_vm4, %v1969_v31  ;;  %v345_v30 = vld [vmem:[#allocation2 + $0xf8] sm:$0xff] }
  0x6c   : > { %1850 = vmatprep.mubr.msk.bf16.mxu0 %vm2000_vm3, %v1998_v1  ;;  %1902 = vmatprep.mubr.msk.bf16.mxu1 %vm2000_vm3, %v1998_v1 }
  0x73   : > { %1851 = vmatmul.mubr.msk.bf16.gmra.mrb[44].mxu0 %vm574_vm4, %v1970_v32  ;;  %1903 = vmatmul.mubr.msk.bf16.gmra.mrb[44].mxu1 %vm574_vm4, %v1971_v33 }
  0x74   : > { %1854 = vmatprep.mubr.msk.bf16.mxu0 %vm2000_vm3, %v1998_v1 }
  0x7b   : > { %1855 = vmatmul.mubr.msk.bf16.gmra.mrb[48].mxu0 %vm574_vm4, %v1972_v34 }
  0xee   : > { %v691_v37 = vpop.f32.mrb[0].mxu0  ;;  %v795_v39 = vpop.f32.mrb[0].mxu1 }
  0xef   : > { %v889_v41 = vadd.f32 %v691_v37, %v314_v35  ;;  %v1808_v42 = vpop.f32.mrb[1].mxu0  ;;  %v915_v43 = vadd.f32 %v795_v39, %v340_v36  ;;  %v1860_v44 = vpop.f32.mrb[1].mxu1 }
  0xf0   : > { %v694_v45 = vpop.f32.mrb[2].mxu0  ;;  %v798_v46 = vpop.f32.mrb[2].mxu1 }
  0xf1   : > { %939 = vst.msk [vmem:[#allocation2] sm:$0xff] %vm264_vm1, %v889_v41  ;;  %v890_v47 = vadd.f32 %v694_v45, %v315_v38  ;;  %v1809_v48 = vpop.f32.mrb[3].mxu0  ;;  %965 = vst.msk [vmem:[#allocation2 + $0xd0] sm:$0xff] %vm264_vm1, %v915_v43  ;;  %v916_v49 = vadd.f32 %v798_v46, %v341_v40  ;;  %v1861_v50 = vpop.f32.mrb[3].mxu1 }
  0xf2   : > { %v320_v50 = vld [vmem:[#allocation2 + $0x30] sm:$0xff] }
  0xf3   : > { %940 = vst.msk [vmem:[#allocation2 + $0x8] sm:$0xff] %vm264_vm1, %v890_v47  ;;  %966 = vst.msk [vmem:[#allocation2 + $0xd8] sm:$0xff] %vm264_vm1, %v916_v49 }
  0xf6   : > { %v699_v54 = vpop.f32.mrb[4].mxu0  ;;  %v803_v56 = vpop.f32.mrb[4].mxu1 }
  0xf7   : > { %v891_v58 = vadd.f32 %v699_v54, %v316_v51  ;;  %v1812_v59 = vpop.f32.mrb[5].mxu0  ;;  %v917_v60 = vadd.f32 %v803_v56, %v342_v52  ;;  %v1864_v61 = vpop.f32.mrb[5].mxu1  ;;  %v346_v51 = vld [vmem:[#allocation2 + $0x100] sm:$0xff] }
  0xf8   : > { %v991_v62 = vld [vmem:[#allocation2] sm:$0xff]  ;;  %v1017_v63 = vld [vmem:[#allocation2 + $0xd0] sm:$0xff]  ;;  %v702_v0 = vpop.f32.mrb[6].mxu0  ;;  %v806_v1 = vpop.f32.mrb[6].mxu1  ;;  %v321_v59 = vld [vmem:[#allocation2 + $0x38] sm:$0xff] }
  0xf9   : > { %v1047_v2 = vadd.f32 %v2287_v53, %v991_v62  ;;  %v1073_v3 = vadd.f32 %v2287_v53, %v1017_v63  ;;  %941 = vst.msk [vmem:[#allocation2 + $0x10] sm:$0xff] %vm264_vm1, %v891_v58  ;;  %v892_v4 = vadd.f32 %v702_v0, %v317_v55  ;;  %v1813_v5 = vpop.f32.mrb[7].mxu0  ;;  %967 = vst.msk [vmem:[#allocation2 + $0xe0] sm:$0xff] %vm264_vm1, %v917_v60  ;;  %v1865_v7 = vpop.f32.mrb[7].mxu1 }
  0xfa   : > { %v918_v6 = vadd.f32 %v806_v1, %v343_v57  ;;  %v992_v8 = vld [vmem:[#allocation2 + $0x8] sm:$0xff]  ;;  %v1018_v9 = vld [vmem:[#allocation2 + $0xd8] sm:$0xff] }
  0xfb   : > { %vm1096_vm5 = vcmp.ge.f32.partialorder %v1047_v2, 0.0  ;;  %v1145_v10 = vmul.f32 0.25, %v1047_v2  ;;  %v1048_v11 = vadd.f32 %v2287_v53, %v992_v8  ;;  %vm1122_vm6 = vcmp.ge.f32.partialorder %v1073_v3, 0.0  ;;  %942 = vst.msk [vmem:[#allocation2 + $0x18] sm:$0xff] %vm264_vm1, %v892_v4 }
  0xfc   : > { %968 = vst.msk [vmem:[#allocation2 + $0xe8] sm:$0xff] %vm264_vm1, %v918_v6  ;;  %v1171_v12 = vmul.f32 0.25, %v1073_v3  ;;  %v1074_v13 = vadd.f32 %v2287_v53, %v1018_v9 }
  0xfd   : > { %v1194_v16 = vsel %vm1096_vm5, %v1047_v2, %v1145_v10  ;;  %vm1097_vm8 = vcmp.ge.f32.partialorder %v1048_v11, 0.0  ;;  %v1146_v17 = vmul.f32 0.25, %v1048_v11 }
  0xfe   : > { %v1717_v18 = vpack.c.bf16 %v1194_v16, %v1194_v16  ;;  %v1220_v19 = vsel %vm1122_vm6, %v1073_v3, %v1171_v12  ;;  %vm1123_vm9 = vcmp.ge.f32.partialorder %v1074_v13, 0.0  ;;  %v1172_v20 = vmul.f32 0.25, %v1074_v13  ;;  %v707_v21 = vpop.f32.mrb[8].mxu0  ;;  %v811_v23 = vpop.f32.mrb[8].mxu1  ;;  %v347_v3 = vld [vmem:[#allocation2 + $0x108] sm:$0xff] }
  0xff   : > { %v1195_v24 = vsel %vm1097_vm8, %v1048_v11, %v1146_v17  ;;  %v1743_v25 = vpack.c.bf16 %v1220_v19, %v1220_v19  ;;  %v893_v26 = vadd.f32 %v707_v21, %v318_v14  ;;  %v1816_v27 = vpop.f32.mrb[9].mxu0  ;;  %v919_v28 = vadd.f32 %v811_v23, %v344_v15  ;;  %v1868_v29 = vpop.f32.mrb[9].mxu1  ;;  %v322_v23 = vld [vmem:[#allocation2 + $0x40] sm:$0xff] }
 0x100   : > { %1441 = vst.msk [vmem:[%s2302_s8] sm:$0xf] %vm1440_vm7, %v1717_v18  ;;  %v1718_v31 = vpack.c.bf16 %v1195_v24, %v1195_v24  ;;  %v993_v32 = vld [vmem:[#allocation2 + $0x10] sm:$0xff]  ;;  %v1221_v33 = vsel %vm1123_vm9, %v1074_v13, %v1172_v20  ;;  %v1019_v34 = vld [vmem:[#allocation2 + $0xe0] sm:$0xff]  ;;  %v710_v35 = vpop.f32.mrb[10].mxu0  ;;  %v814_v36 = vpop.f32.mrb[10].mxu1 }
 0x101   : > { %1467 = vst.msk [vmem:[%s2302_s8 + $0x68] sm:$0xf] %vm1440_vm7, %v1743_v25  ;;  %v1049_v37 = vadd.f32 %v2287_v53, %v993_v32  ;;  %v1744_v38 = vpack.c.bf16 %v1221_v33, %v1221_v33  ;;  %v1075_v39 = vadd.f32 %v2287_v53, %v1019_v34  ;;  %v894_v40 = vadd.f32 %v710_v35, %v319_v22  ;;  %v1817_v41 = vpop.f32.mrb[11].mxu0  ;;  %v1869_v42 = vpop.f32.mrb[11].mxu1  ;;  %v348_v24 = vld [vmem:[#allocation2 + $0x110] sm:$0xff] }
 0x102   : > { %943 = vst.msk [vmem:[#allocation2 + $0x20] sm:$0xff] %vm264_vm1, %v893_v26  ;;  %969 = vst.msk [vmem:[#allocation2 + $0xf0] sm:$0xff] %vm264_vm1, %v919_v28  ;;  %v994_v43 = vld [vmem:[#allocation2 + $0x18] sm:$0xff]  ;;  %v920_v45 = vadd.f32 %v814_v36, %v345_v30 }
 0x103   : > { %1442 = vst.msk [vmem:[%s2302_s8 + $0x4] sm:$0xf] %vm1440_vm7, %v1718_v31  ;;  %v1020_v44 = vld [vmem:[#allocation2 + $0xe8] sm:$0xff]  ;;  %vm1098_vm10 = vcmp.ge.f32.partialorder %v1049_v37, 0.0  ;;  %v1147_v46 = vmul.f32 0.25, %v1049_v37  ;;  %v1050_v47 = vadd.f32 %v2287_v53, %v994_v43  ;;  %vm1124_vm11 = vcmp.ge.f32.partialorder %v1075_v39, 0.0 }
 0x104   : > { %1468 = vst.msk [vmem:[%s2302_s8 + $0x6c] sm:$0xf] %vm1440_vm7, %v1744_v38  ;;  %v1173_v48 = vmul.f32 0.25, %v1075_v39  ;;  %v1076_v49 = vadd.f32 %v2287_v53, %v1020_v44  ;;  %v323_v31 = vld [vmem:[#allocation2 + $0x48] sm:$0xff] }
 0x105   : > { %944 = vst.msk [vmem:[#allocation2 + $0x28] sm:$0xff] %vm264_vm1, %v894_v40  ;;  %970 = vst.msk [vmem:[#allocation2 + $0xf8] sm:$0xff] %vm264_vm1, %v920_v45  ;;  %v1196_v52 = vsel %vm1098_vm10, %v1049_v37, %v1147_v46  ;;  %vm1099_vm12 = vcmp.ge.f32.partialorder %v1050_v47, 0.0  ;;  %v1148_v54 = vmul.f32 0.25, %v1050_v47 }
 0x106   : > { %v1719_v55 = vpack.c.bf16 %v1196_v52, %v1196_v52  ;;  %v1222_v56 = vsel %vm1124_vm11, %v1075_v39, %v1173_v48  ;;  %vm1125_vm13 = vcmp.ge.f32.partialorder %v1076_v49, 0.0  ;;  %v1174_v57 = vmul.f32 0.25, %v1076_v49  ;;  %v715_v58 = vpop.f32.mrb[12].mxu0  ;;  %v819_v60 = vpop.f32.mrb[12].mxu1  ;;  %v349_v39 = vld [vmem:[#allocation2 + $0x118] sm:$0xff] }
 0x107   : > { %v1197_v61 = vsel %vm1099_vm12, %v1050_v47, %v1148_v54  ;;  %v1745_v62 = vpack.c.bf16 %v1222_v56, %v1222_v56  ;;  %v895_v63 = vadd.f32 %v715_v58, %v320_v50  ;;  %v1820_v0 = vpop.f32.mrb[13].mxu0  ;;  %v921_v1 = vadd.f32 %v819_v60, %v346_v51  ;;  %v1872_v2 = vpop.f32.mrb[13].mxu1  ;;  %v324_v60 = vld [vmem:[#allocation2 + $0x50] sm:$0xff] }
 0x108   : > { %1443 = vst.msk [vmem:[%s2302_s8 + $0x8] sm:$0xf] %vm1440_vm7, %v1719_v55  ;;  %v1720_v4 = vpack.c.bf16 %v1197_v61, %v1197_v61  ;;  %v1223_v6 = vsel %vm1125_vm13, %v1076_v49, %v1174_v57  ;;  %v718_v8 = vpop.f32.mrb[14].mxu0  ;;  %v822_v9 = vpop.f32.mrb[14].mxu1  ;;  %v350_v61 = vld [vmem:[#allocation2 + $0x120] sm:$0xff] }
 0x109   : > { %v995_v5 = vld [vmem:[#allocation2 + $0x20] sm:$0xff]  ;;  %v1021_v7 = vld [vmem:[#allocation2 + $0xf0] sm:$0xff]  ;;  %1469 = vst.msk [vmem:[%s2302_s8 + $0x70] sm:$0xf] %vm1440_vm7, %v1745_v62  ;;  %v1746_v11 = vpack.c.bf16 %v1223_v6, %v1223_v6  ;;  %v896_v13 = vadd.f32 %v718_v8, %v321_v59  ;;  %v1821_v14 = vpop.f32.mrb[15].mxu0  ;;  %v1873_v15 = vpop.f32.mrb[15].mxu1  ;;  %v922_v17 = vadd.f32 %v822_v9, %v347_v3 }
 0x10a   : > { %v1051_v10 = vadd.f32 %v2287_v53, %v995_v5  ;;  %v1077_v12 = vadd.f32 %v2287_v53, %v1021_v7  ;;  %945 = vst.msk [vmem:[#allocation2 + $0x30] sm:$0xff] %vm264_vm1, %v895_v63  ;;  %971 = vst.msk [vmem:[#allocation2 + $0x100] sm:$0xff] %vm264_vm1, %v921_v1 }
 0x10b   : > { %1444 = vst.msk [vmem:[%s2302_s8 + $0xc] sm:$0xf] %vm1440_vm7, %v1720_v4  ;;  %1470 = vst.msk [vmem:[%s2302_s8 + $0x74] sm:$0xf] %vm1440_vm7, %v1746_v11  ;;  %v325_v4 = vld [vmem:[#allocation2 + $0x58] sm:$0xff] }
 0x10c   : > { %v996_v16 = vld [vmem:[#allocation2 + $0x28] sm:$0xff]  ;;  %vm1100_vm14 = vcmp.ge.f32.partialorder %v1051_v10, 0.0  ;;  %v1149_v18 = vmul.f32 0.25, %v1051_v10  ;;  %vm1126_vm15 = vcmp.ge.f32.partialorder %v1077_v12, 0.0  ;;  %v1022_v20 = vld [vmem:[#allocation2 + $0xf8] sm:$0xff]  ;;  %946 = vst.msk [vmem:[#allocation2 + $0x38] sm:$0xff] %vm264_vm1, %v896_v13 }
 0x10d   : > { %v1052_v19 = vadd.f32 %v2287_v53, %v996_v16  ;;  %v1175_v21 = vmul.f32 0.25, %v1077_v12  ;;  %v1078_v22 = vadd.f32 %v2287_v53, %v1022_v20  ;;  %972 = vst.msk [vmem:[#allocation2 + $0x108] sm:$0xff] %vm264_vm1, %v922_v17 }
 0x10e   : > { %v1198_v25 = vsel %vm1100_vm14, %v1051_v10, %v1149_v18  ;;  %v723_v30 = vpop.f32.mrb[16].mxu0  ;;  %v827_v32 = vpop.f32.mrb[16].mxu1 }
 0x10f   : > { %vm1101_vm0 = vcmp.ge.f32.partialorder %v1052_v19, 0.0  ;;  %v1150_v26 = vmul.f32 0.25, %v1052_v19  ;;  %v1721_v27 = vpack.c.bf16 %v1198_v25, %v1198_v25  ;;  %v1224_v28 = vsel %vm1126_vm15, %v1077_v12, %v1175_v21  ;;  %v1824_v36 = vpop.f32.mrb[17].mxu0  ;;  %v1876_v38 = vpop.f32.mrb[17].mxu1  ;;  %v351_v12 = vld [vmem:[#allocation2 + $0x128] sm:$0xff] }
 0x110   : > { %vm1127_vm2 = vcmp.ge.f32.partialorder %v1078_v22, 0.0  ;;  %v1176_v29 = vmul.f32 0.25, %v1078_v22  ;;  %v1747_v34 = vpack.c.bf16 %v1224_v28, %v1224_v28  ;;  %v897_v35 = vadd.f32 %v723_v30, %v322_v23  ;;  %v726_v44 = vpop.f32.mrb[18].mxu0  ;;  %v830_v45 = vpop.f32.mrb[18].mxu1 }
 0x111   : > { %v1199_v33 = vsel %vm1101_vm0, %v1052_v19, %v1150_v26  ;;  %v923_v37 = vadd.f32 %v827_v32, %v348_v24  ;;  %1445 = vst.msk [vmem:[%s2302_s8 + $0x10] sm:$0xf] %vm1440_vm7, %v1721_v27  ;;  %v997_v41 = vld [vmem:[#allocation2 + $0x30] sm:$0xff]  ;;  %v1023_v43 = vld [vmem:[#allocation2 + $0x100] sm:$0xff]  ;;  %v898_v49 = vadd.f32 %v726_v44, %v323_v31  ;;  %v1825_v50 = vpop.f32.mrb[19].mxu0  ;;  %v1877_v51 = vpop.f32.mrb[19].mxu1  ;;  %v924_v54 = vadd.f32 %v830_v45, %v349_v39 }
 0x112   : > { %v1722_v40 = vpack.c.bf16 %v1199_v33, %v1199_v33  ;;  %v1225_v42 = vsel %vm1127_vm2, %v1078_v22, %v1176_v29  ;;  %1471 = vst.msk [vmem:[%s2302_s8 + $0x78] sm:$0xf] %vm1440_vm7, %v1747_v34  ;;  %v1053_v46 = vadd.f32 %v2287_v53, %v997_v41  ;;  %v1079_v48 = vadd.f32 %v2287_v53, %v1023_v43  ;;  %v326_v32 = vld [vmem:[#allocation2 + $0x60] sm:$0xff]  ;;  %v352_v33 = vld [vmem:[#allocation2 + $0x130] sm:$0xff] }
 0x113   : > { %v1748_v47 = vpack.c.bf16 %v1225_v42, %v1225_v42  ;;  %947 = vst.msk [vmem:[#allocation2 + $0x40] sm:$0xff] %vm264_vm1, %v897_v35  ;;  %973 = vst.msk [vmem:[#allocation2 + $0x110] sm:$0xff] %vm264_vm1, %v923_v37  ;;  %v998_v52 = vld [vmem:[#allocation2 + $0x38] sm:$0xff] }
 0x114   : > { %1446 = vst.msk [vmem:[%s2302_s8 + $0x14] sm:$0xf] %vm1440_vm7, %v1722_v40  ;;  %vm1102_vm3 = vcmp.ge.f32.partialorder %v1053_v46, 0.0  ;;  %v1151_v55 = vmul.f32 0.25, %v1053_v46  ;;  %v1054_v56 = vadd.f32 %v2287_v53, %v998_v52  ;;  %vm1128_vm4 = vcmp.ge.f32.partialorder %v1079_v48, 0.0  ;;  %v1024_v57 = vld [vmem:[#allocation2 + $0x108] sm:$0xff] }
 0x115   : > { %1472 = vst.msk [vmem:[%s2302_s8 + $0x7c] sm:$0xf] %vm1440_vm7, %v1748_v47  ;;  %v1177_v58 = vmul.f32 0.25, %v1079_v48  ;;  %v1080_v59 = vadd.f32 %v2287_v53, %v1024_v57  ;;  %v327_v40 = vld [vmem:[#allocation2 + $0x68] sm:$0xff] }
 0x116   : > { %948 = vst.msk [vmem:[#allocation2 + $0x48] sm:$0xff] %vm264_vm1, %v898_v49  ;;  %974 = vst.msk [vmem:[#allocation2 + $0x118] sm:$0xff] %vm264_vm1, %v924_v54  ;;  %v1200_v62 = vsel %vm1102_vm3, %v1053_v46, %v1151_v55  ;;  %vm1103_vm5 = vcmp.ge.f32.partialorder %v1054_v56, 0.0  ;;  %v1152_v63 = vmul.f32 0.25, %v1054_v56  ;;  %v731_v3 = vpop.f32.mrb[20].mxu0  ;;  %v835_v5 = vpop.f32.mrb[20].mxu1 }
 0x117   : > { %v1723_v0 = vpack.c.bf16 %v1200_v62, %v1200_v62  ;;  %v1226_v1 = vsel %vm1128_vm4, %v1079_v48, %v1177_v58  ;;  %vm1129_vm6 = vcmp.ge.f32.partialorder %v1080_v59, 0.0  ;;  %v1178_v2 = vmul.f32 0.25, %v1080_v59  ;;  %v1828_v9 = vpop.f32.mrb[21].mxu0  ;;  %v1880_v11 = vpop.f32.mrb[21].mxu1  ;;  %v353_v48 = vld [vmem:[#allocation2 + $0x138] sm:$0xff] }
 0x118   : > { %v1201_v6 = vsel %vm1103_vm5, %v1054_v56, %v1152_v63  ;;  %v1749_v7 = vpack.c.bf16 %v1226_v1, %v1226_v1  ;;  %v899_v8 = vadd.f32 %v731_v3, %v324_v60  ;;  %v925_v10 = vadd.f32 %v835_v5, %v350_v61  ;;  %v734_v17 = vpop.f32.mrb[22].mxu0  ;;  %v838_v18 = vpop.f32.mrb[22].mxu1  ;;  %v328_v5 = vld [vmem:[#allocation2 + $0x70] sm:$0xff] }
 0x119   : > { %1447 = vst.msk [vmem:[%s2302_s8 + $0x18] sm:$0xf] %vm1440_vm7, %v1723_v0  ;;  %v1724_v13 = vpack.c.bf16 %v1201_v6, %v1201_v6  ;;  %v1227_v15 = vsel %vm1129_vm6, %v1080_v59, %v1178_v2  ;;  %v900_v22 = vadd.f32 %v734_v17, %v325_v4  ;;  %v1829_v23 = vpop.f32.mrb[23].mxu0  ;;  %v1881_v24 = vpop.f32.mrb[23].mxu1  ;;  %v926_v26 = vadd.f32 %v838_v18, %v351_v12  ;;  %v354_v6 = vld [vmem:[#allocation2 + $0x140] sm:$0xff] }
 0x11a   : > { %v999_v14 = vld [vmem:[#allocation2 + $0x40] sm:$0xff]  ;;  %v1025_v16 = vld [vmem:[#allocation2 + $0x110] sm:$0xff]  ;;  %1473 = vst.msk [vmem:[%s2302_s8 + $0x80] sm:$0xf] %vm1440_vm7, %v1749_v7  ;;  %v1750_v20 = vpack.c.bf16 %v1227_v15, %v1227_v15 }
 0x11b   : > { %v1055_v19 = vadd.f32 %v2287_v53, %v999_v14  ;;  %v1081_v21 = vadd.f32 %v2287_v53, %v1025_v16  ;;  %949 = vst.msk [vmem:[#allocation2 + $0x50] sm:$0xff] %vm264_vm1, %v899_v8  ;;  %975 = vst.msk [vmem:[#allocation2 + $0x120] sm:$0xff] %vm264_vm1, %v925_v10 }
 0x11c   : > { %1448 = vst.msk [vmem:[%s2302_s8 + $0x1c] sm:$0xf] %vm1440_vm7, %v1724_v13  ;;  %1474 = vst.msk [vmem:[%s2302_s8 + $0x84] sm:$0xf] %vm1440_vm7, %v1750_v20  ;;  %v329_v13 = vld [vmem:[#allocation2 + $0x78] sm:$0xff] }
 0x11d   : > { %v1000_v25 = vld [vmem:[#allocation2 + $0x48] sm:$0xff]  ;;  %vm1104_vm8 = vcmp.ge.f32.partialorder %v1055_v19, 0.0  ;;  %v1153_v27 = vmul.f32 0.25, %v1055_v19  ;;  %vm1130_vm9 = vcmp.ge.f32.partialorder %v1081_v21, 0.0  ;;  %v1026_v29 = vld [vmem:[#allocation2 + $0x118] sm:$0xff]  ;;  %950 = vst.msk [vmem:[#allocation2 + $0x58] sm:$0xff] %vm264_vm1, %v900_v22 }
 0x11e   : > { %v1056_v28 = vadd.f32 %v2287_v53, %v1000_v25  ;;  %v1179_v30 = vmul.f32 0.25, %v1081_v21  ;;  %v1082_v31 = vadd.f32 %v2287_v53, %v1026_v29  ;;  %976 = vst.msk [vmem:[#allocation2 + $0x128] sm:$0xff] %vm264_vm1, %v926_v26  ;;  %v739_v39 = vpop.f32.mrb[24].mxu0  ;;  %v843_v41 = vpop.f32.mrb[24].mxu1 }
 0x11f   : > { %v1202_v34 = vsel %vm1104_vm8, %v1055_v19, %v1153_v27  ;;  %v901_v44 = vadd.f32 %v739_v39, %v326_v32  ;;  %v1832_v45 = vpop.f32.mrb[25].mxu0  ;;  %v927_v46 = vadd.f32 %v843_v41, %v352_v33  ;;  %v1884_v47 = vpop.f32.mrb[25].mxu1  ;;  %v330_v41 = vld [vmem:[#allocation2 + $0x80] sm:$0xff] }
 0x120   : > { %vm1105_vm10 = vcmp.ge.f32.partialorder %v1056_v28, 0.0  ;;  %v1154_v35 = vmul.f32 0.25, %v1056_v28  ;;  %v1725_v36 = vpack.c.bf16 %v1202_v34, %v1202_v34  ;;  %v1228_v37 = vsel %vm1130_vm9, %v1081_v21, %v1179_v30  ;;  %v742_v54 = vpop.f32.mrb[26].mxu0  ;;  %v846_v55 = vpop.f32.mrb[26].mxu1  ;;  %v355_v21 = vld [vmem:[#allocation2 + $0x148] sm:$0xff] }
 0x121   : > { %vm1131_vm11 = vcmp.ge.f32.partialorder %v1082_v31, 0.0  ;;  %v1180_v38 = vmul.f32 0.25, %v1082_v31  ;;  %v1751_v43 = vpack.c.bf16 %v1228_v37, %v1228_v37  ;;  %951 = vst.msk [vmem:[#allocation2 + $0x60] sm:$0xff] %vm264_vm1, %v901_v44  ;;  %v902_v59 = vadd.f32 %v742_v54, %v327_v40  ;;  %v1833_v60 = vpop.f32.mrb[27].mxu0  ;;  %977 = vst.msk [vmem:[#allocation2 + $0x130] sm:$0xff] %vm264_vm1, %v927_v46  ;;  %v1885_v61 = vpop.f32.mrb[27].mxu1 }
 0x122   : > { %v1203_v42 = vsel %vm1105_vm10, %v1056_v28, %v1154_v35  ;;  %1449 = vst.msk [vmem:[%s2302_s8 + $0x20] sm:$0xf] %vm1440_vm7, %v1725_v36  ;;  %v1001_v50 = vld [vmem:[#allocation2 + $0x50] sm:$0xff]  ;;  %v1027_v52 = vld [vmem:[#allocation2 + $0x120] sm:$0xff]  ;;  %v928_v63 = vadd.f32 %v846_v55, %v353_v48 }
 0x123   : > { %v1726_v49 = vpack.c.bf16 %v1203_v42, %v1203_v42  ;;  %v1229_v51 = vsel %vm1131_vm11, %v1082_v31, %v1180_v38  ;;  %1475 = vst.msk [vmem:[%s2302_s8 + $0x88] sm:$0xf] %vm1440_vm7, %v1751_v43  ;;  %v1057_v56 = vadd.f32 %v2287_v53, %v1001_v50  ;;  %v1083_v58 = vadd.f32 %v2287_v53, %v1027_v52  ;;  %v356_v42 = vld [vmem:[#allocation2 + $0x150] sm:$0xff] }
 0x124   : > { %v1752_v57 = vpack.c.bf16 %v1229_v51, %v1229_v51  ;;  %v1002_v62 = vld [vmem:[#allocation2 + $0x58] sm:$0xff]  ;;  %952 = vst.msk [vmem:[#allocation2 + $0x68] sm:$0xff] %vm264_vm1, %v902_v59  ;;  %978 = vst.msk [vmem:[#allocation2 + $0x138] sm:$0xff] %vm264_vm1, %v928_v63 }
 0x125   : > { %1450 = vst.msk [vmem:[%s2302_s8 + $0x24] sm:$0xf] %vm1440_vm7, %v1726_v49  ;;  %vm1106_vm12 = vcmp.ge.f32.partialorder %v1057_v56, 0.0  ;;  %v1155_v0 = vmul.f32 0.25, %v1057_v56  ;;  %v1058_v1 = vadd.f32 %v2287_v53, %v1002_v62  ;;  %vm1132_vm13 = vcmp.ge.f32.partialorder %v1083_v58, 0.0  ;;  %v1028_v2 = vld [vmem:[#allocation2 + $0x128] sm:$0xff] }
 0x126   : > { %1476 = vst.msk [vmem:[%s2302_s8 + $0x8c] sm:$0xf] %vm1440_vm7, %v1752_v57  ;;  %v1181_v3 = vmul.f32 0.25, %v1083_v58  ;;  %v1084_v4 = vadd.f32 %v2287_v53, %v1028_v2  ;;  %v747_v12 = vpop.f32.mrb[28].mxu0  ;;  %v851_v14 = vpop.f32.mrb[28].mxu1  ;;  %v331_v49 = vld [vmem:[#allocation2 + $0x88] sm:$0xff] }
 0x127   : > { %v1204_v7 = vsel %vm1106_vm12, %v1057_v56, %v1155_v0  ;;  %vm1107_vm14 = vcmp.ge.f32.partialorder %v1058_v1, 0.0  ;;  %v1156_v8 = vmul.f32 0.25, %v1058_v1  ;;  %v903_v17 = vadd.f32 %v747_v12, %v328_v5  ;;  %v1836_v18 = vpop.f32.mrb[29].mxu0  ;;  %v1888_v20 = vpop.f32.mrb[29].mxu1 }
 0x128   : > { %v1727_v9 = vpack.c.bf16 %v1204_v7, %v1204_v7  ;;  %v1230_v10 = vsel %vm1132_vm13, %v1083_v58, %v1181_v3  ;;  %vm1133_vm15 = vcmp.ge.f32.partialorder %v1084_v4, 0.0  ;;  %v1182_v11 = vmul.f32 0.25, %v1084_v4  ;;  %v1003_v23 = vld [vmem:[#allocation2 + $0x60] sm:$0xff]  ;;  %v1029_v25 = vld [vmem:[#allocation2 + $0x130] sm:$0xff]  ;;  %v750_v26 = vpop.f32.mrb[30].mxu0  ;;  %v854_v27 = vpop.f32.mrb[30].mxu1 }
 0x129   : > { %v1205_v15 = vsel %vm1107_vm14, %v1058_v1, %v1156_v8  ;;  %v1753_v16 = vpack.c.bf16 %v1230_v10, %v1230_v10  ;;  %v929_v19 = vadd.f32 %v851_v14, %v354_v6  ;;  %v1059_v28 = vadd.f32 %v2287_v53, %v1003_v23  ;;  %953 = vst.msk [vmem:[#allocation2 + $0x70] sm:$0xff] %vm264_vm1, %v903_v17  ;;  %v1837_v32 = vpop.f32.mrb[31].mxu0  ;;  %v1889_v33 = vpop.f32.mrb[31].mxu1  ;;  %v357_v58 = vld [vmem:[#allocation2 + $0x158] sm:$0xff]  ;;  %v332_v14 = vld [vmem:[#allocation2 + $0x90] sm:$0xff] }
 0x12a   : > { %1451 = vst.msk [vmem:[%s2302_s8 + $0x28] sm:$0xf] %vm1440_vm7, %v1727_v9  ;;  %v1728_v22 = vpack.c.bf16 %v1205_v15, %v1205_v15  ;;  %v1231_v24 = vsel %vm1133_vm15, %v1084_v4, %v1182_v11  ;;  %v1085_v30 = vadd.f32 %v2287_v53, %v1029_v25  ;;  %v904_v31 = vadd.f32 %v750_v26, %v329_v13  ;;  %v358_v15 = vld [vmem:[#allocation2 + $0x160] sm:$0xff] }
 0x12b   : > { %1477 = vst.msk [vmem:[%s2302_s8 + $0x90] sm:$0xf] %vm1440_vm7, %v1753_v16  ;;  %v1754_v29 = vpack.c.bf16 %v1231_v24, %v1231_v24  ;;  %v1004_v34 = vld [vmem:[#allocation2 + $0x68] sm:$0xff]  ;;  %v930_v35 = vadd.f32 %v854_v27, %v355_v21  ;;  %vm1108_vm0 = vcmp.ge.f32.partialorder %v1059_v28, 0.0  ;;  %v1157_v36 = vmul.f32 0.25, %v1059_v28  ;;  %v1030_v38 = vld [vmem:[#allocation2 + $0x138] sm:$0xff] }
 0x12c   : > { %979 = vst.msk [vmem:[#allocation2 + $0x140] sm:$0xff] %vm264_vm1, %v929_v19  ;;  %v1060_v37 = vadd.f32 %v2287_v53, %v1004_v34  ;;  %vm1134_vm2 = vcmp.ge.f32.partialorder %v1085_v30, 0.0  ;;  %954 = vst.msk [vmem:[#allocation2 + $0x78] sm:$0xff] %vm264_vm1, %v904_v31  ;;  %v1183_v39 = vmul.f32 0.25, %v1085_v30  ;;  %v1086_v40 = vadd.f32 %v2287_v53, %v1030_v38 }
 0x12d   : > { %1452 = vst.msk [vmem:[%s2302_s8 + $0x2c] sm:$0xf] %vm1440_vm7, %v1728_v22  ;;  %1478 = vst.msk [vmem:[%s2302_s8 + $0x94] sm:$0xf] %vm1440_vm7, %v1754_v29  ;;  %v1206_v43 = vsel %vm1108_vm0, %v1059_v28, %v1157_v36  ;;  %v333_v22 = vld [vmem:[#allocation2 + $0x98] sm:$0xff] }
 0x12e   : > { %980 = vst.msk [vmem:[#allocation2 + $0x148] sm:$0xff] %vm264_vm1, %v930_v35  ;;  %vm1109_vm3 = vcmp.ge.f32.partialorder %v1060_v37, 0.0  ;;  %v1158_v44 = vmul.f32 0.25, %v1060_v37  ;;  %v1729_v45 = vpack.c.bf16 %v1206_v43, %v1206_v43  ;;  %v1232_v46 = vsel %vm1134_vm2, %v1085_v30, %v1183_v39  ;;  %v755_v48 = vpop.f32.mrb[32].mxu0  ;;  %v859_v50 = vpop.f32.mrb[32].mxu1  ;;  %v359_v30 = vld [vmem:[#allocation2 + $0x168] sm:$0xff] }
 0x12f   : > { %vm1135_vm4 = vcmp.ge.f32.partialorder %v1086_v40, 0.0  ;;  %v1184_v47 = vmul.f32 0.25, %v1086_v40  ;;  %v1755_v52 = vpack.c.bf16 %v1232_v46, %v1232_v46  ;;  %v905_v54 = vadd.f32 %v755_v48, %v330_v41  ;;  %v1840_v55 = vpop.f32.mrb[33].mxu0  ;;  %v1892_v57 = vpop.f32.mrb[33].mxu1 }
 0x130   : > { %v1207_v51 = vsel %vm1109_vm3, %v1060_v37, %v1158_v44  ;;  %v931_v56 = vadd.f32 %v859_v50, %v356_v42  ;;  %1453 = vst.msk [vmem:[%s2302_s8 + $0x30] sm:$0xf] %vm1440_vm7, %v1729_v45  ;;  %v1005_v60 = vld [vmem:[#allocation2 + $0x70] sm:$0xff]  ;;  %v758_v63 = vpop.f32.mrb[34].mxu0  ;;  %v862_v0 = vpop.f32.mrb[34].mxu1  ;;  %v334_v50 = vld [vmem:[#allocation2 + $0xa0] sm:$0xff] }
 0x131   : > { %v1730_v59 = vpack.c.bf16 %v1207_v51, %v1207_v51  ;;  %v1233_v61 = vsel %vm1135_vm4, %v1086_v40, %v1184_v47  ;;  %1479 = vst.msk [vmem:[%s2302_s8 + $0x98] sm:$0xf] %vm1440_vm7, %v1755_v52  ;;  %v1061_v1 = vadd.f32 %v2287_v53, %v1005_v60  ;;  %v906_v4 = vadd.f32 %v758_v63, %v331_v49  ;;  %v1841_v5 = vpop.f32.mrb[35].mxu0  ;;  %v1893_v6 = vpop.f32.mrb[35].mxu1  ;;  %v360_v51 = vld [vmem:[#allocation2 + $0x170] sm:$0xff] }
 0x132   : > { %v1756_v2 = vpack.c.bf16 %v1233_v61, %v1233_v61  ;;  %955 = vst.msk [vmem:[#allocation2 + $0x80] sm:$0xff] %vm264_vm1, %v905_v54  ;;  %981 = vst.msk [vmem:[#allocation2 + $0x150] sm:$0xff] %vm264_vm1, %v931_v56  ;;  %v932_v8 = vadd.f32 %v862_v0, %v357_v58 }
 0x133   : > { %v1031_v62 = vld [vmem:[#allocation2 + $0x140] sm:$0xff]  ;;  %1454 = vst.msk [vmem:[%s2302_s8 + $0x34] sm:$0xf] %vm1440_vm7, %v1730_v59  ;;  %v1006_v7 = vld [vmem:[#allocation2 + $0x78] sm:$0xff]  ;;  %vm1110_vm5 = vcmp.ge.f32.partialorder %v1061_v1, 0.0  ;;  %v1159_v9 = vmul.f32 0.25, %v1061_v1 }
 0x134   : > { %v1087_v3 = vadd.f32 %v2287_v53, %v1031_v62  ;;  %1480 = vst.msk [vmem:[%s2302_s8 + $0x9c] sm:$0xf] %vm1440_vm7, %v1756_v2  ;;  %v1062_v10 = vadd.f32 %v2287_v53, %v1006_v7  ;;  %v335_v59 = vld [vmem:[#allocation2 + $0xa8] sm:$0xff] }
 0x135   : > { %v1032_v11 = vld [vmem:[#allocation2 + $0x148] sm:$0xff]  ;;  %956 = vst.msk [vmem:[#allocation2 + $0x88] sm:$0xff] %vm264_vm1, %v906_v4  ;;  %982 = vst.msk [vmem:[#allocation2 + $0x158] sm:$0xff] %vm264_vm1, %v932_v8  ;;  %v1208_v16 = vsel %vm1110_vm5, %v1061_v1, %v1159_v9 }
 0x136   : > { %vm1136_vm6 = vcmp.ge.f32.partialorder %v1087_v3, 0.0  ;;  %v1185_v12 = vmul.f32 0.25, %v1087_v3  ;;  %v1088_v13 = vadd.f32 %v2287_v53, %v1032_v11  ;;  %vm1111_vm8 = vcmp.ge.f32.partialorder %v1062_v10, 0.0  ;;  %v763_v21 = vpop.f32.mrb[36].mxu0  ;;  %v867_v23 = vpop.f32.mrb[36].mxu1 }
 0x137   : > { %v1160_v17 = vmul.f32 0.25, %v1062_v10  ;;  %v1731_v18 = vpack.c.bf16 %v1208_v16, %v1208_v16  ;;  %v907_v26 = vadd.f32 %v763_v21, %v332_v14  ;;  %v1844_v27 = vpop.f32.mrb[37].mxu0  ;;  %v933_v28 = vadd.f32 %v867_v23, %v358_v15  ;;  %v1896_v29 = vpop.f32.mrb[37].mxu1  ;;  %v336_v23 = vld [vmem:[#allocation2 + $0xb0] sm:$0xff] }
 0x138   : > { %v1234_v19 = vsel %vm1136_vm6, %v1087_v3, %v1185_v12  ;;  %vm1137_vm9 = vcmp.ge.f32.partialorder %v1088_v13, 0.0  ;;  %v1186_v20 = vmul.f32 0.25, %v1088_v13  ;;  %v766_v35 = vpop.f32.mrb[38].mxu0  ;;  %v870_v36 = vpop.f32.mrb[38].mxu1  ;;  %v361_v3 = vld [vmem:[#allocation2 + $0x178] sm:$0xff] }
 0x139   : > { %v1209_v24 = vsel %vm1111_vm8, %v1062_v10, %v1160_v17  ;;  %v1757_v25 = vpack.c.bf16 %v1234_v19, %v1234_v19  ;;  %1455 = vst.msk [vmem:[%s2302_s8 + $0x38] sm:$0xf] %vm1440_vm7, %v1731_v18  ;;  %v1007_v32 = vld [vmem:[#allocation2 + $0x80] sm:$0xff]  ;;  %v1033_v34 = vld [vmem:[#allocation2 + $0x150] sm:$0xff]  ;;  %v908_v40 = vadd.f32 %v766_v35, %v333_v22  ;;  %v1845_v41 = vpop.f32.mrb[39].mxu0  ;;  %v1897_v42 = vpop.f32.mrb[39].mxu1  ;;  %v934_v44 = vadd.f32 %v870_v36, %v359_v30 }
 0x13a   : > { %v1732_v31 = vpack.c.bf16 %v1209_v24, %v1209_v24  ;;  %v1235_v33 = vsel %vm1137_vm9, %v1088_v13, %v1186_v20  ;;  %v1063_v37 = vadd.f32 %v2287_v53, %v1007_v32  ;;  %v1089_v39 = vadd.f32 %v2287_v53, %v1033_v34  ;;  %957 = vst.msk [vmem:[#allocation2 + $0x90] sm:$0xff] %vm264_vm1, %v907_v26  ;;  %v362_v24 = vld [vmem:[#allocation2 + $0x180] sm:$0xff] }
 0x13b   : > { %1481 = vst.msk [vmem:[%s2302_s8 + $0xa0] sm:$0xf] %vm1440_vm7, %v1757_v25  ;;  %v1758_v38 = vpack.c.bf16 %v1235_v33, %v1235_v33 }
 0x13c   : > { %983 = vst.msk [vmem:[#allocation2 + $0x160] sm:$0xff] %vm264_vm1, %v933_v28  ;;  %v1008_v43 = vld [vmem:[#allocation2 + $0x88] sm:$0xff]  ;;  %vm1112_vm10 = vcmp.ge.f32.partialorder %v1063_v37, 0.0  ;;  %v1161_v45 = vmul.f32 0.25, %v1063_v37  ;;  %vm1138_vm11 = vcmp.ge.f32.partialorder %v1089_v39, 0.0  ;;  %v1034_v47 = vld [vmem:[#allocation2 + $0x158] sm:$0xff] }
 0x13d   : > { %1456 = vst.msk [vmem:[%s2302_s8 + $0x3c] sm:$0xf] %vm1440_vm7, %v1732_v31  ;;  %1482 = vst.msk [vmem:[%s2302_s8 + $0xa4] sm:$0xf] %vm1440_vm7, %v1758_v38  ;;  %v1064_v46 = vadd.f32 %v2287_v53, %v1008_v43  ;;  %v1187_v48 = vmul.f32 0.25, %v1089_v39  ;;  %v1090_v49 = vadd.f32 %v2287_v53, %v1034_v47  ;;  %v337_v31 = vld [vmem:[#allocation2 + $0xb8] sm:$0xff] }
 0x13e   : > { %958 = vst.msk [vmem:[#allocation2 + $0x98] sm:$0xff] %vm264_vm1, %v908_v40  ;;  %984 = vst.msk [vmem:[#allocation2 + $0x168] sm:$0xff] %vm264_vm1, %v934_v44  ;;  %v1210_v52 = vsel %vm1112_vm10, %v1063_v37, %v1161_v45  ;;  %v771_v58 = vpop.f32.mrb[40].mxu0  ;;  %v875_v60 = vpop.f32.mrb[40].mxu1 }
 0x13f   : > { %vm1113_vm12 = vcmp.ge.f32.partialorder %v1064_v46, 0.0  ;;  %v1162_v54 = vmul.f32 0.25, %v1064_v46  ;;  %v1733_v55 = vpack.c.bf16 %v1210_v52, %v1210_v52  ;;  %v1236_v56 = vsel %vm1138_vm11, %v1089_v39, %v1187_v48  ;;  %v1848_v0 = vpop.f32.mrb[41].mxu0  ;;  %v1900_v2 = vpop.f32.mrb[41].mxu1 }
 0x140   : > { %vm1139_vm13 = vcmp.ge.f32.partialorder %v1090_v49, 0.0  ;;  %v1188_v57 = vmul.f32 0.25, %v1090_v49  ;;  %v1759_v62 = vpack.c.bf16 %v1236_v56, %v1236_v56  ;;  %v909_v63 = vadd.f32 %v771_v58, %v334_v50  ;;  %v774_v8 = vpop.f32.mrb[42].mxu0  ;;  %v878_v9 = vpop.f32.mrb[42].mxu1  ;;  %v338_v58 = vld [vmem:[#allocation2 + $0xc0] sm:$0xff] }
 0x141   : > { %v1211_v61 = vsel %vm1113_vm12, %v1064_v46, %v1162_v54  ;;  %v935_v1 = vadd.f32 %v875_v60, %v360_v51  ;;  %1457 = vst.msk [vmem:[%s2302_s8 + $0x40] sm:$0xf] %vm1440_vm7, %v1733_v55  ;;  %v1009_v5 = vld [vmem:[#allocation2 + $0x90] sm:$0xff]  ;;  %v910_v13 = vadd.f32 %v774_v8, %v335_v59  ;;  %v1849_v14 = vpop.f32.mrb[43].mxu0  ;;  %v1901_v15 = vpop.f32.mrb[43].mxu1  ;;  %v936_v17 = vadd.f32 %v878_v9, %v361_v3 }
 0x142   : > { %v1734_v4 = vpack.c.bf16 %v1211_v61, %v1211_v61  ;;  %v1237_v6 = vsel %vm1139_vm13, %v1090_v49, %v1188_v57  ;;  %1483 = vst.msk [vmem:[%s2302_s8 + $0xa8] sm:$0xf] %vm1440_vm7, %v1759_v62  ;;  %v1065_v10 = vadd.f32 %v2287_v53, %v1009_v5 }
 0x143   : > { %v1035_v7 = vld [vmem:[#allocation2 + $0x160] sm:$0xff]  ;;  %v1760_v11 = vpack.c.bf16 %v1237_v6, %v1237_v6  ;;  %959 = vst.msk [vmem:[#allocation2 + $0xa0] sm:$0xff] %vm264_vm1, %v909_v63  ;;  %985 = vst.msk [vmem:[#allocation2 + $0x170] sm:$0xff] %vm264_vm1, %v935_v1  ;;  %v339_v1 = vld [vmem:[#allocation2 + $0xc8] sm:$0xff] }
 0x144   : > { %v1091_v12 = vadd.f32 %v2287_v53, %v1035_v7  ;;  %1458 = vst.msk [vmem:[%s2302_s8 + $0x44] sm:$0xf] %vm1440_vm7, %v1734_v4  ;;  %vm1114_vm14 = vcmp.ge.f32.partialorder %v1065_v10, 0.0  ;;  %v1163_v18 = vmul.f32 0.25, %v1065_v10 }
 0x145   : > { %v1010_v16 = vld [vmem:[#allocation2 + $0x98] sm:$0xff]  ;;  %1484 = vst.msk [vmem:[%s2302_s8 + $0xac] sm:$0xf] %vm1440_vm7, %v1760_v11  ;;  %v1036_v20 = vld [vmem:[#allocation2 + $0x168] sm:$0xff] }
 0x146   : > { %v1066_v19 = vadd.f32 %v2287_v53, %v1010_v16  ;;  %vm1140_vm15 = vcmp.ge.f32.partialorder %v1091_v12, 0.0  ;;  %960 = vst.msk [vmem:[#allocation2 + $0xa8] sm:$0xff] %vm264_vm1, %v910_v13  ;;  %v1189_v21 = vmul.f32 0.25, %v1091_v12  ;;  %v1092_v22 = vadd.f32 %v2287_v53, %v1036_v20  ;;  %986 = vst.msk [vmem:[#allocation2 + $0x178] sm:$0xff] %vm264_vm1, %v936_v17  ;;  %v779_v30 = vpop.f32.mrb[44].mxu0  ;;  %v883_v32 = vpop.f32.mrb[44].mxu1 }
 0x147   : > { %v1212_v25 = vsel %vm1114_vm14, %v1065_v10, %v1163_v18  ;;  %v911_v35 = vadd.f32 %v779_v30, %v336_v23  ;;  %v1852_v36 = vpop.f32.mrb[45].mxu0  ;;  %v937_v37 = vadd.f32 %v883_v32, %v362_v24  ;;  %v1904_v38 = vpop.f32.mrb[45].mxu1  ;;  %v1973_v10 = vld [vmem:[%s2497_s2] ss:$0 sm:$0xff] }
 0x148   : > { %vm1115_vm0 = vcmp.ge.f32.partialorder %v1066_v19, 0.0  ;;  %v1164_v26 = vmul.f32 0.25, %v1066_v19  ;;  %v1735_v27 = vpack.c.bf16 %v1212_v25, %v1212_v25  ;;  %v1238_v28 = vsel %vm1140_vm15, %v1091_v12, %v1189_v21  ;;  %v782_v43 = vpop.f32.mrb[46].mxu0  ;;  %v886_v44 = vpop.f32.mrb[46].mxu1 }
 0x149   : > { %vm1141_vm2 = vcmp.ge.f32.partialorder %v1092_v22, 0.0  ;;  %v1190_v29 = vmul.f32 0.25, %v1092_v22  ;;  %v1761_v34 = vpack.c.bf16 %v1238_v28, %v1238_v28  ;;  %961 = vst.msk [vmem:[#allocation2 + $0xb0] sm:$0xff] %vm264_vm1, %v911_v35  ;;  %v912_v48 = vadd.f32 %v782_v43, %v337_v31  ;;  %v1853_v49 = vpop.f32.mrb[47].mxu0  ;;  %987 = vst.msk [vmem:[#allocation2 + $0x180] sm:$0xff] %vm264_vm1, %v937_v37  ;;  %v1905_v50 = vpop.f32.mrb[47].mxu1 }
 0x14a   : > { %v1213_v33 = vsel %vm1115_vm0, %v1066_v19, %v1164_v26  ;;  %1459 = vst.msk [vmem:[%s2302_s8 + $0x48] sm:$0xf] %vm1440_vm7, %v1735_v27  ;;  %v1011_v40 = vld [vmem:[#allocation2 + $0xa0] sm:$0xff]  ;;  %v1037_v42 = vld [vmem:[#allocation2 + $0x170] sm:$0xff] }
 0x14b   : > { %v1736_v39 = vpack.c.bf16 %v1213_v33, %v1213_v33  ;;  %v1239_v41 = vsel %vm1141_vm2, %v1092_v22, %v1190_v29  ;;  %1485 = vst.msk [vmem:[%s2302_s8 + $0xb0] sm:$0xf] %vm1440_vm7, %v1761_v34  ;;  %v1067_v45 = vadd.f32 %v2287_v53, %v1011_v40  ;;  %v1093_v47 = vadd.f32 %v2287_v53, %v1037_v42 }
 0x14c   : > { %v1762_v46 = vpack.c.bf16 %v1239_v41, %v1239_v41  ;;  %962 = vst.msk [vmem:[#allocation2 + $0xb8] sm:$0xff] %vm264_vm1, %v912_v48 }
 0x14d   : > { %1460 = vst.msk [vmem:[%s2302_s8 + $0x4c] sm:$0xf] %vm1440_vm7, %v1736_v39  ;;  %v1012_v51 = vld [vmem:[#allocation2 + $0xa8] sm:$0xff]  ;;  %vm1116_vm3 = vcmp.ge.f32.partialorder %v1067_v45, 0.0  ;;  %v1165_v52 = vmul.f32 0.25, %v1067_v45  ;;  %vm1142_vm4 = vcmp.ge.f32.partialorder %v1093_v47, 0.0 }
 0x14e   : > { %1486 = vst.msk [vmem:[%s2302_s8 + $0xb4] sm:$0xf] %vm1440_vm7, %v1762_v46  ;;  %v1068_v54 = vadd.f32 %v2287_v53, %v1012_v51  ;;  %v1038_v55 = vld [vmem:[#allocation2 + $0x178] sm:$0xff]  ;;  %v1191_v56 = vmul.f32 0.25, %v1093_v47  ;;  %v787_v0 = vpop.f32.mrb[48].mxu0 }
 0x14f   : > { %v1094_v57 = vadd.f32 %v2287_v53, %v1038_v55  ;;  %v1214_v59 = vsel %vm1116_vm3, %v1067_v45, %v1165_v52  ;;  %v913_v4 = vadd.f32 %v787_v0, %v338_v58  ;;  %v1856_v5 = vpop.f32.mrb[49].mxu0 }
 0x150   : > { %vm1117_vm5 = vcmp.ge.f32.partialorder %v1068_v54, 0.0  ;;  %v1166_v60 = vmul.f32 0.25, %v1068_v54  ;;  %v1737_v61 = vpack.c.bf16 %v1214_v59, %v1214_v59  ;;  %v1240_v62 = vsel %vm1142_vm4, %v1093_v47, %v1191_v56  ;;  %v1013_v53 = vld [vmem:[#allocation2 + $0xb0] sm:$0xff]  ;;  %v1039_v8 = vld [vmem:[#allocation2 + $0x180] sm:$0xff]  ;;  %v790_v9 = vpop.f32.mrb[50].mxu0 }
 0x151   : > { %vm1143_vm6 = vcmp.ge.f32.partialorder %v1094_v57, 0.0  ;;  %v1192_v63 = vmul.f32 0.25, %v1094_v57  ;;  %v1763_v3 = vpack.c.bf16 %v1240_v62, %v1240_v62  ;;  %v1069_v11 = vadd.f32 %v1973_v10, %v1013_v53  ;;  %963 = vst.msk [vmem:[#allocation2 + $0xc0] sm:$0xff] %vm264_vm1, %v913_v4  ;;  %v1857_v15 = vpop.f32.mrb[51].mxu0 }
 0x152   : > { %v1215_v2 = vsel %vm1117_vm5, %v1068_v54, %v1166_v60  ;;  %1461 = vst.msk [vmem:[%s2302_s8 + $0x50] sm:$0xf] %vm1440_vm7, %v1737_v61  ;;  %v1095_v13 = vadd.f32 %v1973_v10, %v1039_v8  ;;  %v914_v14 = vadd.f32 %v790_v9, %v339_v1 }
 0x153   : > { %v1738_v6 = vpack.c.bf16 %v1215_v2, %v1215_v2  ;;  %v1241_v7 = vsel %vm1143_vm6, %v1094_v57, %v1192_v63  ;;  %1487 = vst.msk [vmem:[%s2302_s8 + $0xb8] sm:$0xf] %vm1440_vm7, %v1763_v3  ;;  %v1014_v16 = vld [vmem:[#allocation2 + $0xb8] sm:$0xff]  ;;  %vm1118_vm8 = vcmp.ge.f32.partialorder %v1069_v11, 0.0  ;;  %v1167_v17 = vmul.f32 0.25, %v1069_v11 }
 0x154   : > { %v1764_v12 = vpack.c.bf16 %v1241_v7, %v1241_v7  ;;  %v1070_v18 = vadd.f32 %v1973_v10, %v1014_v16  ;;  %vm1144_vm9 = vcmp.ge.f32.partialorder %v1095_v13, 0.0  ;;  %964 = vst.msk [vmem:[#allocation2 + $0xc8] sm:$0xff] %vm264_vm1, %v914_v14  ;;  %v1193_v19 = vmul.f32 0.25, %v1095_v13 }
 0x155   : > { %1462 = vst.msk [vmem:[%s2302_s8 + $0x54] sm:$0xf] %vm1440_vm7, %v1738_v6  ;;  %v1216_v20 = vsel %vm1118_vm8, %v1069_v11, %v1167_v17 }
 0x156   : > { %1488 = vst.msk [vmem:[%s2302_s8 + $0xbc] sm:$0xf] %vm1440_vm7, %v1764_v12  ;;  %vm1119_vm10 = vcmp.ge.f32.partialorder %v1070_v18, 0.0  ;;  %v1168_v21 = vmul.f32 0.25, %v1070_v18  ;;  %v1739_v22 = vpack.c.bf16 %v1216_v20, %v1216_v20  ;;  %v1242_v23 = vsel %vm1144_vm9, %v1095_v13, %v1193_v19 }
 0x157   : > { %v1765_v25 = vpack.c.bf16 %v1242_v23, %v1242_v23 }
 0x158   : > { %v1217_v24 = vsel %vm1119_vm10, %v1070_v18, %v1168_v21  ;;  %1463 = vst.msk [vmem:[%s2302_s8 + $0x58] sm:$0xf] %vm1440_vm7, %v1739_v22  ;;  %v1015_v27 = vld [vmem:[#allocation2 + $0xc0] sm:$0xff] }
 0x159   : > { %v1740_v26 = vpack.c.bf16 %v1217_v24, %v1217_v24  ;;  %1489 = vst.msk [vmem:[%s2302_s8 + $0xc0] sm:$0xf] %vm1440_vm7, %v1765_v25  ;;  %v1071_v28 = vadd.f32 %v1973_v10, %v1015_v27 }
 0x15b   : > { %1464 = vst.msk [vmem:[%s2302_s8 + $0x5c] sm:$0xf] %vm1440_vm7, %v1740_v26  ;;  %v1016_v29 = vld [vmem:[#allocation2 + $0xc8] sm:$0xff]  ;;  %vm1120_vm1 = vcmp.ge.f32.partialorder %v1071_v28, 0.0  ;;  %v1169_v30 = vmul.f32 0.25, %v1071_v28 }
 0x15c   : > { %v1072_v31 = vadd.f32 %v1973_v10, %v1016_v29 }
 0x15d   : > { %v1218_v32 = vsel %vm1120_vm1, %v1071_v28, %v1169_v30 }
 0x15e   : > { %vm1121_vm11 = vcmp.ge.f32.partialorder %v1072_v31, 0.0  ;;  %v1170_v33 = vmul.f32 0.25, %v1072_v31  ;;  %v1741_v34 = vpack.c.bf16 %v1218_v32, %v1218_v32 }
 0x160   : > { %v1219_v35 = vsel %vm1121_vm11, %v1072_v31, %v1170_v33  ;;  %1465 = vst.msk [vmem:[%s2302_s8 + $0x60] sm:$0xf] %vm1440_vm7, %v1741_v34 }
 0x161   : > { %v1742_v36 = vpack.c.bf16 %v1219_v35, %v1219_v35 }
 0x163   : > { %1466 = vst.msk [vmem:[%s2302_s8 + $0x64] sm:$0xf] %vm1440_vm7, %v1742_v36 }
 0x164 PF: > { %s13_s14 = sadd.s32 1, %s1996_s14   ;;  %s2499_s12 = smov %s1992_s13 }
 0x165   : > { %p10_p5 = scmp.ge.s32.totalorder %s13_s14, 6   ;;  %s2500_s13 = smov %s2502_s15 }
 0x167   :  { %12 = sbr.rel (!%p10_p5) target bundleno = 2 (0x2), region = 76 }

// kernel: a_call__.7
= control target key start
LH: loop header
LB: loop body
LE: loop exit
PB: predicated region body
PF: predicated region fallthrough
CT: control target
= control target key end

     0   :  { %vm74_vm0 = vcmask 1043456   ;;  %vm75_vm1 = vcmask 523268   ;;  %vm83_vm3 = vcmask 1041408   ;;  %vm84_vm4 = vcmask 521220   ;;  %s248_s0 = inlined_call_operand.vmem [shape: bf16[28,448], index: 0, kind: input, shape index: {}]   ;;  %s249_s1 = inlined_call_operand.vmem [shape: bf16[28,448], index: 1, kind: input, shape index: {}]   ;;  %s250_s2 = inlined_call_operand.vmem [shape: bf16[28,448], index: 2, kind: input, shape index: {}]   ;;  %s251_s3 = inlined_call_operand.vmem [shape: bf16[28,448], index: 3, kind: input, shape index: {}]   ;;  %s252_s4 = inlined_call_operand.vmem [shape: bf16[28,448], index: 4, kind: output, shape index: {}]  }
   0x1   :  { %v17_v0 = vld [vmem:[%s248_s0] sm:$0xff]  ;;  %v18_v5 = vld [vmem:[%s248_s0 + $0x8] sm:$0xff]  ;;  %vm140_vm2 = vmor %vm75_vm1, %vm74_vm0 }
   0x2   :  { %v25_v1 = vld [vmem:[%s249_s1] sm:$0xff]  ;;  %v26_v6 = vld [vmem:[%s249_s1 + $0x8] sm:$0xff]  ;;  %v19_v13 = vld [vmem:[%s248_s0 + $0x10] sm:$0xff] }
   0x3   :  { %v41_v2 = vld [vmem:[%s250_s2] sm:$0xff]  ;;  %v33_v3 = vmax.bf16 %v25_v1, %v17_v0  ;;  %v34_v8 = vmax.bf16 %v26_v6, %v18_v5  ;;  %v42_v9 = vld [vmem:[%s250_s2 + $0x8] sm:$0xff]  ;;  %v27_v14 = vld [vmem:[%s249_s1 + $0x10] sm:$0xff] }
   0x4   :  { %v49_v4 = vld [vmem:[%s251_s3] sm:$0xff]  ;;  %v50_v10 = vld [vmem:[%s251_s3 + $0x8] sm:$0xff]  ;;  %v43_v15 = vld [vmem:[%s250_s2 + $0x10] sm:$0xff]  ;;  %v35_v17 = vmax.bf16 %v27_v14, %v19_v13 }
   0x5   :  { %v57_v7 = vmax.bf16 %v49_v4, %v41_v2  ;;  %v58_v12 = vmax.bf16 %v50_v10, %v42_v9  ;;  %v51_v18 = vld [vmem:[%s251_s3 + $0x10] sm:$0xff]  ;;  %v20_v19 = vld [vmem:[%s248_s0 + $0x18] sm:$0xff]  ;;  %v21_v26 = vld [vmem:[%s248_s0 + $0x20] sm:$0xff] }
   0x6   :  { %v28_v20 = vld [vmem:[%s249_s1 + $0x18] sm:$0xff]  ;;  %v59_v22 = vmax.bf16 %v51_v18, %v43_v15  ;;  %v29_v28 = vld [vmem:[%s249_s1 + $0x20] sm:$0xff]  ;;  %v22_v34 = vld [vmem:[%s248_s0 + $0x28] sm:$0xff] }
   0x7   :  { %v65_v16 = vmax.bf16 %v57_v7, %v33_v3  ;;  %v66_v21 = vmax.bf16 %v58_v12, %v34_v8  ;;  %v36_v23 = vmax.bf16 %v28_v20, %v20_v19  ;;  %v44_v24 = vld [vmem:[%s250_s2 + $0x18] sm:$0xff]  ;;  %v45_v29 = vld [vmem:[%s250_s2 + $0x20] sm:$0xff]  ;;  %v37_v32 = vmax.bf16 %v29_v28, %v21_v26  ;;  %v30_v35 = vld [vmem:[%s249_s1 + $0x28] sm:$0xff] }
   0x8   :  { %v52_v25 = vld [vmem:[%s251_s3 + $0x18] sm:$0xff]  ;;  %v53_v30 = vld [vmem:[%s251_s3 + $0x20] sm:$0xff]  ;;  %v67_v31 = vmax.bf16 %v59_v22, %v35_v17  ;;  %v46_v36 = vld [vmem:[%s250_s2 + $0x28] sm:$0xff]  ;;  %v38_v38 = vmax.bf16 %v30_v35, %v22_v34 }
   0x9   :  { %73 = vst [vmem:[%s252_s4] sm:$0xff] %v65_v16  ;;  %v60_v27 = vmax.bf16 %v52_v25, %v44_v24  ;;  %77 = vst.msk [vmem:[%s252_s4 + $0x8] sm:$0xff] %vm140_vm2, %v66_v21  ;;  %v61_v33 = vmax.bf16 %v53_v30, %v45_v29  ;;  %v54_v39 = vld [vmem:[%s251_s3 + $0x28] sm:$0xff]  ;;  %v23_v40 = vld [vmem:[%s248_s0 + $0x30] sm:$0x33] }
   0xa   :  { %v31_v41 = vld [vmem:[%s249_s1 + $0x30] sm:$0x33]  ;;  %78 = vst [vmem:[%s252_s4 + $0x10] sm:$0xff] %v67_v31  ;;  %v62_v43 = vmax.bf16 %v54_v39, %v46_v36  ;;  %v24_v47 = vld [vmem:[%s248_s0 + $0x38] sm:$0x33]  ;;  %vm85_vm5 = vmor %vm84_vm4, %vm83_vm3 }
   0xb   :  { %v68_v37 = vmax.bf16 %v60_v27, %v36_v23  ;;  %v69_v42 = vmax.bf16 %v61_v33, %v37_v32  ;;  %v39_v44 = vmax.bf16 %v31_v41, %v23_v40  ;;  %v47_v45 = vld [vmem:[%s250_s2 + $0x30] sm:$0x33]  ;;  %v32_v49 = vld [vmem:[%s249_s1 + $0x38] sm:$0x33] }
   0xc   :  { %v55_v46 = vld [vmem:[%s251_s3 + $0x30] sm:$0x33]  ;;  %v48_v50 = vld [vmem:[%s250_s2 + $0x38] sm:$0x33]  ;;  %v70_v52 = vmax.bf16 %v62_v43, %v38_v38  ;;  %v40_v53 = vmax.bf16 %v32_v49, %v24_v47 }
   0xd   :  { %79 = vst.msk [vmem:[%s252_s4 + $0x18] sm:$0xff] %vm140_vm2, %v68_v37  ;;  %v63_v48 = vmax.bf16 %v55_v46, %v47_v45  ;;  %v56_v51 = vld [vmem:[%s251_s3 + $0x38] sm:$0x33]  ;;  %80 = vst [vmem:[%s252_s4 + $0x20] sm:$0xff] %v69_v42 }
   0xe   :  { %v64_v54 = vmax.bf16 %v56_v51, %v48_v50  ;;  %81 = vst.msk [vmem:[%s252_s4 + $0x28] sm:$0xff] %vm140_vm2, %v70_v52 }
   0xf   :  { %v71_v55 = vmax.bf16 %v63_v48, %v39_v44 }
  0x10   :  { %v72_v56 = vmax.bf16 %v64_v54, %v40_v53 }
  0x11   :  { %82 = vst [vmem:[%s252_s4 + $0x30] sm:$0x33] %v71_v55 }
  0x12   :  { %86 = vst.msk [vmem:[%s252_s4 + $0x38] sm:$0x33] %vm85_vm5, %v72_v56 }

// kernel: a_call__.8
= control target key start
LH: loop header
LB: loop body
LE: loop exit
PB: predicated region body
PF: predicated region fallthrough
CT: control target
= control target key end

     0   :  { %s2235_s12 = smov 0   ;;  %s2237_s13 = smov 0   ;;  %s2673_s0 = inlined_call_operand.vmem [shape: bf16[200,1024], index: 0, kind: input, shape index: {}]   ;;  %s2674_s1 = inlined_call_operand.vmem [shape: bf16[1024,64], index: 1, kind: input, shape index: {}]   ;;  %s2675_s2 = inlined_call_operand.vmem [shape: f32[1,64], index: 2, kind: input, shape index: {}]   ;;  %s2676_s3 = inlined_call_operand.vmem [shape: bf16[200,64], index: 3, kind: output, shape index: {}]  }
   0x1   :  { %s2239_s14 = smov 0   ;;  %s2241_s15 = smov 0  }
   0x2   :  { %s2243_s16 = smov 0  }
   0x3 LB: > { %s25_s17 = sadd.s32 1, %s2208_s15  ;;  %p48_p1 = scmp.ne.s32.totalorder %s2200_s13, %s2196_s12  ;;  %s2212_s16 = sphi %s2243_s16, %s13_s16   ;;  %s2208_s15 = sphi %s2241_s15, %s2680_s15   ;;  %s2204_s14 = sphi %s2239_s14, %s2679_s14   ;;  %s2200_s13 = sphi %s2237_s13, %s2678_s13   ;;  %s2196_s12 = sphi %s2235_s12, %s2677_s12  }
   0x4   : > { %p26_p0 = scmp.ge.s32.totalorder %s25_s17, 2  ;;  %p49_p2 = scmp.eq.s32.totalorder %s2212_s16, 0 }
   0x5   : > { %s41_s19 = sadd.s32 1, %s2200_s13  ;;  %p1687_p5 = scmp.ge.s32.totalorder %s2212_s16, 2 }
   0x6   : > { %s2682_s17 = smov (%p26_p0, %s25_s17), 0  ;;  %p50_p3 = por %p49_p2, %p48_p1 }
   0x7   : > { %s37_s18 = ssub.s32 %s2208_s15, %s2682_s17  ;;  %162 = sbr.rel (%p1687_p5) target bundleno = 43 (0x2b), region = 20 }
   0x8   : > { %p39_p4 = scmp.eq.s32.totalorder %s37_s18, 0 }
   0xa   : > { %s2270_s20 = scalar_select %p39_p4, %s2200_s13, %s41_s19  }
   0xe   : > { %165 = sbr.rel (!%p50_p3) target bundleno = 43 (0x2b), region = 24  ;;  %s167_s21 = sand.u32 (%p50_p3), 1, %s2200_s13  }
   0xf   : > { %s1809_s22 = sshll.u32 (%p50_p3), %s2208_s15, 4  ;;  %s2023_s23 = smul.u32 (%p50_p3), 400, %s167_s21 }
  0x10   : > { %s2278_s26 = scalar_lea.vmem (%p50_p3), %s2673_s0, %s1809_s22 }
  0x11   : > { %v188_v0 = vld [vmem:[%s2278_s26] sm:$0xff] (%p50_p3)  ;;  %v190_v1 = vld [vmem:[%s2278_s26 + $0x8] sm:$0xff] (%p50_p3)  ;;  %s2286_s27 = scalar_lea.vmem (%p50_p3), [#allocation3], %s2023_s23 }
  0x12   : > { %v192_v2 = vld [vmem:[%s2278_s26 + $0x20] sm:$0xff] (%p50_p3)  ;;  %v194_v3 = vld [vmem:[%s2278_s26 + $0x28] sm:$0xff] (%p50_p3)  ;;  %189 = vst [vmem:[%s2286_s27] sm:$0xff] (%p50_p3), %v188_v0  ;;  %191 = vst [vmem:[%s2286_s27 + $0x8] sm:$0xff] (%p50_p3), %v190_v1 }
  0x13   : > { %v196_v4 = vld [vmem:[%s2278_s26 + $0x40] sm:$0xff] (%p50_p3)  ;;  %v198_v5 = vld [vmem:[%s2278_s26 + $0x48] sm:$0xff] (%p50_p3)  ;;  %193 = vst [vmem:[%s2286_s27 + $0x10] sm:$0xff] (%p50_p3), %v192_v2  ;;  %195 = vst [vmem:[%s2286_s27 + $0x18] sm:$0xff] (%p50_p3), %v194_v3 }
  0x14   : > { %197 = vst [vmem:[%s2286_s27 + $0x20] sm:$0xff] (%p50_p3), %v196_v4  ;;  %199 = vst [vmem:[%s2286_s27 + $0x28] sm:$0xff] (%p50_p3), %v198_v5  ;;  %v200_v6 = vld [vmem:[%s2278_s26 + $0x60] sm:$0xff] (%p50_p3)  ;;  %v202_v7 = vld [vmem:[%s2278_s26 + $0x68] sm:$0xff] (%p50_p3) }
  0x15   : > { %v204_v8 = vld [vmem:[%s2278_s26 + $0x80] sm:$0xff]  ;;  %201 = vst [vmem:[%s2286_s27 + $0x30] sm:$0xff] %v200_v6  ;;  %203 = vst [vmem:[%s2286_s27 + $0x38] sm:$0xff] %v202_v7  ;;  %v206_v9 = vld [vmem:[%s2278_s26 + $0x88] sm:$0xff] }
  0x16   : > { %205 = vst [vmem:[%s2286_s27 + $0x40] sm:$0xff] %v204_v8  ;;  %v208_v10 = vld [vmem:[%s2278_s26 + $0xa0] sm:$0xff]  ;;  %v210_v11 = vld [vmem:[%s2278_s26 + $0xa8] sm:$0xff]  ;;  %207 = vst [vmem:[%s2286_s27 + $0x48] sm:$0xff] %v206_v9 }
  0x17   : > { %209 = vst [vmem:[%s2286_s27 + $0x50] sm:$0xff] %v208_v10  ;;  %211 = vst [vmem:[%s2286_s27 + $0x58] sm:$0xff] %v210_v11  ;;  %v212_v12 = vld [vmem:[%s2278_s26 + $0xc0] sm:$0xff]  ;;  %v214_v13 = vld [vmem:[%s2278_s26 + $0xc8] sm:$0xff] }
  0x18   : > { %v216_v14 = vld [vmem:[%s2278_s26 + $0xe0] sm:$0xff]  ;;  %213 = vst [vmem:[%s2286_s27 + $0x60] sm:$0xff] %v212_v12  ;;  %215 = vst [vmem:[%s2286_s27 + $0x68] sm:$0xff] %v214_v13  ;;  %v218_v15 = vld [vmem:[%s2278_s26 + $0xe8] sm:$0xff] }
  0x19   : > { %217 = vst [vmem:[%s2286_s27 + $0x70] sm:$0xff] %v216_v14  ;;  %v220_v16 = vld [vmem:[%s2278_s26 + $0x100] sm:$0xff]  ;;  %v222_v17 = vld [vmem:[%s2278_s26 + $0x108] sm:$0xff]  ;;  %219 = vst [vmem:[%s2286_s27 + $0x78] sm:$0xff] %v218_v15 }
  0x1a   : > { %221 = vst [vmem:[%s2286_s27 + $0x80] sm:$0xff] %v220_v16  ;;  %223 = vst [vmem:[%s2286_s27 + $0x88] sm:$0xff] %v222_v17  ;;  %v224_v18 = vld [vmem:[%s2278_s26 + $0x120] sm:$0xff]  ;;  %v226_v19 = vld [vmem:[%s2278_s26 + $0x128] sm:$0xff] }
  0x1b   : > { %v228_v20 = vld [vmem:[%s2278_s26 + $0x140] sm:$0xff]  ;;  %225 = vst [vmem:[%s2286_s27 + $0x90] sm:$0xff] %v224_v18  ;;  %227 = vst [vmem:[%s2286_s27 + $0x98] sm:$0xff] %v226_v19  ;;  %v230_v21 = vld [vmem:[%s2278_s26 + $0x148] sm:$0xff] }
  0x1c   : > { %229 = vst [vmem:[%s2286_s27 + $0xa0] sm:$0xff] %v228_v20  ;;  %v232_v22 = vld [vmem:[%s2278_s26 + $0x160] sm:$0xff]  ;;  %v234_v23 = vld [vmem:[%s2278_s26 + $0x168] sm:$0xff]  ;;  %231 = vst [vmem:[%s2286_s27 + $0xa8] sm:$0xff] %v230_v21 }
  0x1d   : > { %233 = vst [vmem:[%s2286_s27 + $0xb0] sm:$0xff] %v232_v22  ;;  %235 = vst [vmem:[%s2286_s27 + $0xb8] sm:$0xff] %v234_v23  ;;  %v236_v24 = vld [vmem:[%s2278_s26 + $0x180] sm:$0xff]  ;;  %v238_v25 = vld [vmem:[%s2278_s26 + $0x188] sm:$0xff] }
  0x1e   : > { %v240_v26 = vld [vmem:[%s2278_s26 + $0x1a0] sm:$0xff]  ;;  %237 = vst [vmem:[%s2286_s27 + $0xc0] sm:$0xff] %v236_v24  ;;  %239 = vst [vmem:[%s2286_s27 + $0xc8] sm:$0xff] %v238_v25  ;;  %v242_v27 = vld [vmem:[%s2278_s26 + $0x1a8] sm:$0xff] }
  0x1f   : > { %241 = vst [vmem:[%s2286_s27 + $0xd0] sm:$0xff] %v240_v26  ;;  %v244_v28 = vld [vmem:[%s2278_s26 + $0x1c0] sm:$0xff]  ;;  %v246_v29 = vld [vmem:[%s2278_s26 + $0x1c8] sm:$0xff]  ;;  %243 = vst [vmem:[%s2286_s27 + $0xd8] sm:$0xff] %v242_v27 }
  0x20   : > { %245 = vst [vmem:[%s2286_s27 + $0xe0] sm:$0xff] %v244_v28  ;;  %247 = vst [vmem:[%s2286_s27 + $0xe8] sm:$0xff] %v246_v29  ;;  %v248_v30 = vld [vmem:[%s2278_s26 + $0x1e0] sm:$0xff]  ;;  %v250_v31 = vld [vmem:[%s2278_s26 + $0x1e8] sm:$0xff] }
  0x21   : > { %v252_v32 = vld [vmem:[%s2278_s26 + $0x200] sm:$0xff]  ;;  %249 = vst [vmem:[%s2286_s27 + $0xf0] sm:$0xff] %v248_v30  ;;  %251 = vst [vmem:[%s2286_s27 + $0xf8] sm:$0xff] %v250_v31  ;;  %v254_v33 = vld [vmem:[%s2278_s26 + $0x208] sm:$0xff] }
  0x22   : > { %253 = vst [vmem:[%s2286_s27 + $0x100] sm:$0xff] %v252_v32  ;;  %v256_v34 = vld [vmem:[%s2278_s26 + $0x220] sm:$0xff]  ;;  %v258_v35 = vld [vmem:[%s2278_s26 + $0x228] sm:$0xff]  ;;  %255 = vst [vmem:[%s2286_s27 + $0x108] sm:$0xff] %v254_v33 }
  0x23   : > { %257 = vst [vmem:[%s2286_s27 + $0x110] sm:$0xff] %v256_v34  ;;  %259 = vst [vmem:[%s2286_s27 + $0x118] sm:$0xff] %v258_v35  ;;  %v260_v36 = vld [vmem:[%s2278_s26 + $0x240] sm:$0xff]  ;;  %v262_v37 = vld [vmem:[%s2278_s26 + $0x248] sm:$0xff] }
  0x24   : > { %v264_v38 = vld [vmem:[%s2278_s26 + $0x260] sm:$0xff]  ;;  %261 = vst [vmem:[%s2286_s27 + $0x120] sm:$0xff] %v260_v36  ;;  %263 = vst [vmem:[%s2286_s27 + $0x128] sm:$0xff] %v262_v37  ;;  %v266_v39 = vld [vmem:[%s2278_s26 + $0x268] sm:$0xff] }
  0x25   : > { %265 = vst [vmem:[%s2286_s27 + $0x130] sm:$0xff] %v264_v38  ;;  %v268_v40 = vld [vmem:[%s2278_s26 + $0x280] sm:$0xff]  ;;  %v270_v41 = vld [vmem:[%s2278_s26 + $0x288] sm:$0xff]  ;;  %267 = vst [vmem:[%s2286_s27 + $0x138] sm:$0xff] %v266_v39 }
  0x26   : > { %269 = vst [vmem:[%s2286_s27 + $0x140] sm:$0xff] %v268_v40  ;;  %271 = vst [vmem:[%s2286_s27 + $0x148] sm:$0xff] %v270_v41  ;;  %v272_v42 = vld [vmem:[%s2278_s26 + $0x2a0] sm:$0xff]  ;;  %v274_v43 = vld [vmem:[%s2278_s26 + $0x2a8] sm:$0xff] }
  0x27   : > { %v276_v44 = vld [vmem:[%s2278_s26 + $0x2c0] sm:$0xff]  ;;  %273 = vst [vmem:[%s2286_s27 + $0x150] sm:$0xff] %v272_v42  ;;  %275 = vst [vmem:[%s2286_s27 + $0x158] sm:$0xff] %v274_v43  ;;  %v278_v45 = vld [vmem:[%s2278_s26 + $0x2c8] sm:$0xff] }
  0x28   : > { %277 = vst [vmem:[%s2286_s27 + $0x160] sm:$0xff] %v276_v44  ;;  %v280_v46 = vld [vmem:[%s2278_s26 + $0x2e0] sm:$0xff]  ;;  %v282_v47 = vld [vmem:[%s2278_s26 + $0x2e8] sm:$0xff]  ;;  %279 = vst [vmem:[%s2286_s27 + $0x168] sm:$0xff] %v278_v45 }
  0x29   : > { %281 = vst [vmem:[%s2286_s27 + $0x170] sm:$0xff] %v280_v46  ;;  %283 = vst [vmem:[%s2286_s27 + $0x178] sm:$0xff] %v282_v47  ;;  %v284_v48 = vld [vmem:[%s2278_s26 + $0x300] sm:$0xff]  ;;  %v286_v49 = vld [vmem:[%s2278_s26 + $0x308] sm:$0xff] }
  0x2a   : > { %285 = vst [vmem:[%s2286_s27 + $0x180] sm:$0xff] %v284_v48  ;;  %287 = vst [vmem:[%s2286_s27 + $0x188] sm:$0xff] %v286_v49 }
  0x2b PF: > { %p1690_p6 = scmp.ge.s32.totalorder %s2212_s16, 1  ;;  %p304_p7 = scmp.lt.s32.totalorder %s2212_s16, 3 }
  0x2d   : > { %p305_p8 = pnand %p1690_p6, %p304_p7 }
  0x2e   : > { %s311_s28 = sand.u32 (!%p305_p8), 1, %s2196_s12   ;;  %s1691_s29 = sshll.u32 (!%p305_p8), %s2204_s14, 6 }
  0x2f   : > { %308 = sbr.rel (%p305_p8) target bundleno = 435 (0x1b3), region = 51  ;;  %p351_p9 = scmp.lt.s32.totalorder (!%p305_p8), %s1691_s29, 127 }
  0x30   : > { %s2024_s30 = smul.u32 (!%p305_p8), 400, %s311_s28  ;;  %p1693_p10 = scmp.ne.s32.totalorder (!%p305_p8), %s2204_s14, 0 }
  0x32   : > { %s2391_s8 = scalar_lea.vmem (!%p305_p8), [#allocation3], %s2024_s30 }
  0x36   : > { %s2684_s29 = smov (!%p351_p9, %s1691_s29), 127  ;;  %375 = sbr.rel (%p1693_p10) target bundleno = 69 (0x45), region = 59 }
  0x37   : > { %s1692_s4 = sshll.u32 %s2684_s29, 2  ;;  %vm376_vm0 = vcmask (!%p1693_p10), 523264   ;;  %v2214_v50 = vmov (!%p1693_p10), 0.0  }
  0x38   : > { %s2389_s7 = scalar_lea.vmem %s2674_s1, %s1692_s4  ;;  %377 = vst.msk [vmem:[#allocation2] sm:$0xff] (!%p1693_p10), %vm376_vm0, %v2214_v50  ;;  %378 = vst.msk [vmem:[#allocation2 + $0x8] sm:$0xff] (!%p1693_p10), %vm376_vm0, %v2214_v50 }
  0x39   : > { %379 = vst.msk [vmem:[#allocation2 + $0x10] sm:$0xff] (!%p1693_p10), %vm376_vm0, %v2214_v50  ;;  %380 = vst.msk [vmem:[#allocation2 + $0x18] sm:$0xff] (!%p1693_p10), %vm376_vm0, %v2214_v50 }
  0x3a   : > { %381 = vst.msk [vmem:[#allocation2 + $0x20] sm:$0xff] (!%p1693_p10), %vm376_vm0, %v2214_v50  ;;  %382 = vst.msk [vmem:[#allocation2 + $0x28] sm:$0xff] (!%p1693_p10), %vm376_vm0, %v2214_v50 }
  0x3b   : > { %383 = vst.msk [vmem:[#allocation2 + $0x30] sm:$0xff] (!%p1693_p10), %vm376_vm0, %v2214_v50  ;;  %384 = vst.msk [vmem:[#allocation2 + $0x38] sm:$0xff] (!%p1693_p10), %vm376_vm0, %v2214_v50 }
  0x3c   : > { %385 = vst.msk [vmem:[#allocation2 + $0x40] sm:$0xff] (!%p1693_p10), %vm376_vm0, %v2214_v50  ;;  %386 = vst.msk [vmem:[#allocation2 + $0x48] sm:$0xff] (!%p1693_p10), %vm376_vm0, %v2214_v50 }
  0x3d   : > { %387 = vst.msk [vmem:[#allocation2 + $0x50] sm:$0xff] %vm376_vm0, %v2214_v50  ;;  %388 = vst.msk [vmem:[#allocation2 + $0x58] sm:$0xff] %vm376_vm0, %v2214_v50 }
  0x3e   : > { %389 = vst.msk [vmem:[#allocation2 + $0x60] sm:$0xff] %vm376_vm0, %v2214_v50  ;;  %390 = vst.msk [vmem:[#allocation2 + $0x68] sm:$0xff] %vm376_vm0, %v2214_v50 }
  0x3f   : > { %391 = vst.msk [vmem:[#allocation2 + $0x70] sm:$0xff] %vm376_vm0, %v2214_v50  ;;  %392 = vst.msk [vmem:[#allocation2 + $0x78] sm:$0xff] %vm376_vm0, %v2214_v50 }
  0x40   : > { %393 = vst.msk [vmem:[#allocation2 + $0x80] sm:$0xff] %vm376_vm0, %v2214_v50  ;;  %394 = vst.msk [vmem:[#allocation2 + $0x88] sm:$0xff] %vm376_vm0, %v2214_v50 }
  0x41   : > { %395 = vst.msk [vmem:[#allocation2 + $0x90] sm:$0xff] %vm376_vm0, %v2214_v50  ;;  %396 = vst.msk [vmem:[#allocation2 + $0x98] sm:$0xff] %vm376_vm0, %v2214_v50 }
  0x42   : > { %397 = vst.msk [vmem:[#allocation2 + $0xa0] sm:$0xff] %vm376_vm0, %v2214_v50  ;;  %398 = vst.msk [vmem:[#allocation2 + $0xa8] sm:$0xff] %vm376_vm0, %v2214_v50 }
  0x43   : > { %399 = vst.msk [vmem:[#allocation2 + $0xb0] sm:$0xff] %vm376_vm0, %v2214_v50  ;;  %400 = vst.msk [vmem:[#allocation2 + $0xb8] sm:$0xff] %vm376_vm0, %v2214_v50 }
  0x44   : > { %401 = vst.msk [vmem:[#allocation2 + $0xc0] sm:$0xff] %vm376_vm0, %v2214_v50 }
  0x45 PF: > { %v2066_v51 = vld [vmem:[%s2389_s7 + $0x40] sm:$0xff]   ;;  %v2070_v55 = vld [vmem:[%s2389_s7 + $0x48] sm:$0xff]   ;;  %v2074_v59 = vld [vmem:[%s2389_s7 + $0x50] sm:$0xff]   ;;  %vm1284_vm1 = vcmask 523264   ;;  %p1778_p11 = scmp.ne.s32.totalorder %s2204_s14, 1 }
  0x46   : > { %v2067_v52 = vld [vmem:[%s2389_s7 + $0xc0] sm:$0xff]   ;;  %1835 = vmatprep.subr.bf16.mxu0 %v2066_v51  ;;  %v2071_v56 = vld [vmem:[%s2389_s7 + $0xc8] sm:$0xff]   ;;  %v2075_v60 = vld [vmem:[%s2389_s7 + $0xd0] sm:$0xff]   ;;  %vm1547_vm2 = vcmask (!%p1778_p11), 519168  }
  0x47   : > { %v2068_v53 = vld [vmem:[%s2389_s7] sm:$0xff]   ;;  %1929 = vmatprep.subr.bf16.mxu1 %v2067_v52  ;;  %v2072_v57 = vld [vmem:[%s2389_s7 + $0x8] sm:$0xff]   ;;  %v2076_v61 = vld [vmem:[%s2389_s7 + $0x10] sm:$0xff]  }
  0x48   : > { %v2069_v54 = vld [vmem:[%s2389_s7 + $0x80] sm:$0xff]   ;;  %1836 = vmatpush3.bf16.msra.mxu0 %v2068_v53  ;;  %v2073_v58 = vld [vmem:[%s2389_s7 + $0x88] sm:$0xff]   ;;  %v2077_v62 = vld [vmem:[%s2389_s7 + $0x90] sm:$0xff]  }
  0x49   : > { %1930 = vmatpush3.bf16.msra.mxu1 %v2069_v54  ;;  %1837 = vmatprep.subr.bf16.mxu0 %v2070_v55  ;;  %v2078_v63 = vld [vmem:[%s2389_s7 + $0x58] sm:$0xff]   ;;  %v2082_v3 = vld [vmem:[%s2389_s7 + $0x60] sm:$0xff]   ;;  %v2086_v7 = vld [vmem:[%s2389_s7 + $0x68] sm:$0xff]  }
  0x4a   : > { %1931 = vmatprep.subr.bf16.mxu1 %v2071_v56  ;;  %v2079_v0 = vld [vmem:[%s2389_s7 + $0xd8] sm:$0xff]   ;;  %v2083_v4 = vld [vmem:[%s2389_s7 + $0xe0] sm:$0xff]   ;;  %v2087_v8 = vld [vmem:[%s2389_s7 + $0xe8] sm:$0xff]  }
  0x4b   : > { %v2080_v1 = vld [vmem:[%s2389_s7 + $0x18] sm:$0xff]   ;;  %v2084_v5 = vld [vmem:[%s2389_s7 + $0x20] sm:$0xff]   ;;  %v2088_v9 = vld [vmem:[%s2389_s7 + $0x28] sm:$0xff]  }
  0x4c   : > { %1838 = vmatpush3.bf16.msra.mxu0 %v2072_v57  ;;  %v2081_v2 = vld [vmem:[%s2389_s7 + $0x98] sm:$0xff]   ;;  %v2085_v6 = vld [vmem:[%s2389_s7 + $0xa0] sm:$0xff]   ;;  %v2089_v10 = vld [vmem:[%s2389_s7 + $0xa8] sm:$0xff]  }
  0x4d   : > { %1932 = vmatpush3.bf16.msra.mxu1 %v2073_v58  ;;  %1839 = vmatprep.subr.bf16.mxu0 %v2074_v59  ;;  %v2090_v11 = vld [vmem:[%s2389_s7 + $0x70] sm:$0xff]   ;;  %v2094_v15 = vld [vmem:[%s2389_s7 + $0x78] sm:$0xff]  }
  0x4e   : > { %1933 = vmatprep.subr.bf16.mxu1 %v2075_v60  ;;  %v2091_v12 = vld [vmem:[%s2389_s7 + $0xf0] sm:$0xff]   ;;  %v2095_v16 = vld [vmem:[%s2389_s7 + $0xf8] sm:$0xff]  }
  0x4f   : > { %v2092_v13 = vld [vmem:[%s2389_s7 + $0x30] sm:$0xff]   ;;  %v2096_v17 = vld [vmem:[%s2389_s7 + $0x38] sm:$0xff]  }
  0x50   : > { %1840 = vmatpush3.bf16.msra.mxu0 %v2076_v61  ;;  %v2093_v14 = vld [vmem:[%s2389_s7 + $0xb0] sm:$0xff]   ;;  %v2097_v18 = vld [vmem:[%s2389_s7 + $0xb8] sm:$0xff]  }
  0x51   : > { %1934 = vmatpush3.bf16.msra.mxu1 %v2077_v62  ;;  %1841 = vmatprep.subr.bf16.mxu0 %v2078_v63  ;;  %v2098_v19 = vld [vmem:[%s2391_s8] ss:$16 sps:$4 sm:$0xff]   ;;  %v2100_v20 = vld [vmem:[%s2391_s8 + $0x4] ss:$16 sps:$4 sm:$0xff]   ;;  %v2101_v21 = vld [vmem:[%s2391_s8 + $0x8] ss:$16 sps:$4 sm:$0xff]  }
  0x52   : > { %1935 = vmatprep.subr.bf16.mxu1 %v2079_v0  ;;  %v2103_v22 = vld [vmem:[%s2391_s8 + $0xc] ss:$16 sps:$4 sm:$0xff]   ;;  %1019 = vmatprep.mubr.bf16.mxu0 %v2100_v20  ;;  %v2104_v23 = vld [vmem:[%s2391_s8 + $0x24] ss:$16 sps:$4 sm:$0xff]   ;;  %v2108_v25 = vld [vmem:[%s2391_s8 + $0x20] ss:$16 sps:$4 sm:$0xff]  }
  0x53   : > { %1155 = vmatprep.mubr.bf16.mxu1 %v2103_v22  ;;  %v2106_v24 = vld [vmem:[%s2391_s8 + $0x2c] ss:$16 sps:$4 sm:$0xff]   ;;  %v2109_v26 = vld [vmem:[%s2391_s8 + $0x28] ss:$16 sps:$4 sm:$0xff]   ;;  %v2110_v27 = vld [vmem:[%s2391_s8 + $0x44] ss:$16 sps:$4 sm:$0xff]  }
  0x54   : > { %1842 = vmatpush3.bf16.msra.mxu0 %v2080_v1  ;;  %v2112_v28 = vld [vmem:[%s2391_s8 + $0x4c] ss:$16 sps:$4 sm:$0xff]   ;;  %v2114_v29 = vld [vmem:[%s2391_s8 + $0x40] ss:$16 sps:$4 sm:$0xff]   ;;  %v2115_v30 = vld [vmem:[%s2391_s8 + $0x48] ss:$16 sps:$4 sm:$0xff]  }
  0x55   : > { %1936 = vmatpush3.bf16.msra.mxu1 %v2081_v2  ;;  %1843 = vmatprep.subr.bf16.mxu0 %v2082_v3  ;;  %v2116_v31 = vld [vmem:[%s2391_s8 + $0x64] ss:$16 sps:$4 sm:$0xff]   ;;  %v2118_v32 = vld [vmem:[%s2391_s8 + $0x6c] ss:$16 sps:$4 sm:$0xff]   ;;  %v2120_v33 = vld [vmem:[%s2391_s8 + $0x60] ss:$16 sps:$4 sm:$0xff]  }
  0x56   : > { %1937 = vmatprep.subr.bf16.mxu1 %v2083_v4  ;;  %v2121_v34 = vld [vmem:[%s2391_s8 + $0x68] ss:$16 sps:$4 sm:$0xff]   ;;  %v2122_v35 = vld [vmem:[%s2391_s8 + $0x84] ss:$16 sps:$4 sm:$0xff]   ;;  %v2124_v36 = vld [vmem:[%s2391_s8 + $0x8c] ss:$16 sps:$4 sm:$0xff]  }
  0x57   : > { %v2126_v37 = vld [vmem:[%s2391_s8 + $0x80] ss:$16 sps:$4 sm:$0xff]   ;;  %v2127_v38 = vld [vmem:[%s2391_s8 + $0x88] ss:$16 sps:$4 sm:$0xff]   ;;  %v2128_v39 = vld [vmem:[%s2391_s8 + $0xa4] ss:$16 sps:$4 sm:$0xff]  }
  0x58   : > { %1844 = vmatpush3.bf16.msra.mxu0 %v2084_v5  ;;  %v2130_v40 = vld [vmem:[%s2391_s8 + $0xac] ss:$16 sps:$4 sm:$0xff]   ;;  %v2132_v41 = vld [vmem:[%s2391_s8 + $0xa0] ss:$16 sps:$4 sm:$0xff]   ;;  %v2133_v42 = vld [vmem:[%s2391_s8 + $0xa8] ss:$16 sps:$4 sm:$0xff]  }
  0x59   : > { %1938 = vmatpush3.bf16.msra.mxu1 %v2085_v6  ;;  %1845 = vmatprep.subr.bf16.mxu0 %v2086_v7  ;;  %v2134_v43 = vld [vmem:[%s2391_s8 + $0xc4] ss:$16 sps:$4 sm:$0xff]   ;;  %v2136_v44 = vld [vmem:[%s2391_s8 + $0xcc] ss:$16 sps:$4 sm:$0xff]   ;;  %v2138_v45 = vld [vmem:[%s2391_s8 + $0xc0] ss:$16 sps:$4 sm:$0xff]  }
  0x5a   : > { %1939 = vmatprep.subr.bf16.mxu1 %v2087_v8  ;;  %v2139_v46 = vld [vmem:[%s2391_s8 + $0xc8] ss:$16 sps:$4 sm:$0xff]   ;;  %v2140_v47 = vld [vmem:[%s2391_s8 + $0xe4] ss:$16 sps:$4 sm:$0xff]   ;;  %v2142_v48 = vld [vmem:[%s2391_s8 + $0xec] ss:$16 sps:$4 sm:$0xff]  }
  0x5b   : > { %v2144_v49 = vld [vmem:[%s2391_s8 + $0xe0] ss:$16 sps:$4 sm:$0xff]   ;;  %v2145_v50 = vld [vmem:[%s2391_s8 + $0xe8] ss:$16 sps:$4 sm:$0xff]   ;;  %v2146_v51 = vld [vmem:[%s2391_s8 + $0x104] ss:$16 sps:$4 sm:$0xff]  }
  0x5c   : > { %1846 = vmatpush3.bf16.msra.mxu0 %v2088_v9  ;;  %v2148_v52 = vld [vmem:[%s2391_s8 + $0x10c] ss:$16 sps:$4 sm:$0xff]   ;;  %v2150_v53 = vld [vmem:[%s2391_s8 + $0x100] ss:$16 sps:$4 sm:$0xff]   ;;  %v2151_v54 = vld [vmem:[%s2391_s8 + $0x108] ss:$16 sps:$4 sm:$0xff]  }
  0x5d   : > { %1940 = vmatpush3.bf16.msra.mxu1 %v2089_v10  ;;  %1847 = vmatprep.subr.bf16.mxu0 %v2090_v11  ;;  %v2152_v55 = vld [vmem:[%s2391_s8 + $0x124] ss:$16 sps:$4 sm:$0xff]   ;;  %v2154_v56 = vld [vmem:[%s2391_s8 + $0x12c] ss:$16 sps:$4 sm:$0xff]   ;;  %v2156_v57 = vld [vmem:[%s2391_s8 + $0x120] ss:$16 sps:$4 sm:$0xff]  }
  0x5e   : > { %1941 = vmatprep.subr.bf16.mxu1 %v2091_v12  ;;  %v2157_v58 = vld [vmem:[%s2391_s8 + $0x128] ss:$16 sps:$4 sm:$0xff]   ;;  %v2158_v59 = vld [vmem:[%s2391_s8 + $0x144] ss:$16 sps:$4 sm:$0xff]   ;;  %v2160_v60 = vld [vmem:[%s2391_s8 + $0x14c] ss:$16 sps:$4 sm:$0xff]  }
  0x5f   : > { %v2162_v61 = vld [vmem:[%s2391_s8 + $0x140] ss:$16 sps:$4 sm:$0xff]   ;;  %v2163_v62 = vld [vmem:[%s2391_s8 + $0x148] ss:$16 sps:$4 sm:$0xff]   ;;  %v2164_v63 = vld [vmem:[%s2391_s8 + $0x164] ss:$16 sps:$4 sm:$0xff]  }
  0x60   : > { %1848 = vmatpush3.bf16.msra.mxu0 %v2092_v13  ;;  %v2166_v0 = vld [vmem:[%s2391_s8 + $0x16c] ss:$16 sps:$4 sm:$0xff]   ;;  %v475_v1 = vld [vmem:[%s2391_s8 + $0x180] sm:$0xff]  ;;  %v2169_v4 = vld [vmem:[%s2391_s8 + $0x168] ss:$16 sps:$4 sm:$0xff]  }
  0x61   : > { %1942 = vmatpush3.bf16.msra.mxu1 %v2093_v14  ;;  %1849 = vmatprep.subr.bf16.mxu0 %v2094_v15  ;;  %v476_v2 = vld [vmem:[%s2391_s8 + $0x188] sm:$0xff]  ;;  %v2168_v3 = vld [vmem:[%s2391_s8 + $0x160] ss:$16 sps:$4 sm:$0xff]   ;;  %v1743_v5 = vcombine.high %v475_v1, %v475_v1  ;;  %v1742_v7 = vcombine.low %v475_v1, %v475_v1 }
  0x62   : > { %1943 = vmatprep.subr.bf16.mxu1 %v2095_v16  ;;  %v1745_v6 = vcombine.high %v476_v2, %v476_v2  ;;  %v1744_v8 = vcombine.low %v476_v2, %v476_v2 }
  0x64   : > { %1850 = vmatpush3.bf16.msra.mxu0 %v2096_v17 }
  0x65   : > { %1944 = vmatpush3.bf16.msra.mxu1 %v2097_v18  ;;  %v402_v18 = vld [vmem:[#allocation2] sm:$0xff] }
  0x67   : > { %1020 = vmatmul.mubr.bf16.vlgmr.msra.gmra.mrb[0].mxu0 %v2098_v19 }
  0x68   : > { %1156 = vmatmul.mubr.bf16.vlgmr.msra.gmra.mrb[0].mxu1 %v2101_v21  ;;  %1027 = vmatprep.mubr.bf16.mxu0 %v2104_v23  ;;  %v403_v23 = vld [vmem:[#allocation2 + $0x8] sm:$0xff] }
  0x69   : > { %1163 = vmatprep.mubr.bf16.mxu1 %v2106_v24 }
  0x6f   : > { %1028 = vmatmul.mubr.bf16.gmra.mrb[4].mxu0 %v2108_v25 }
  0x70   : > { %1164 = vmatmul.mubr.bf16.gmra.mrb[4].mxu1 %v2109_v26  ;;  %1035 = vmatprep.mubr.bf16.mxu0 %v2110_v27 }
  0x71   : > { %1171 = vmatprep.mubr.bf16.mxu1 %v2112_v28 }
  0x77   : > { %1036 = vmatmul.mubr.bf16.gmra.mrb[8].mxu0 %v2114_v29 }
  0x78   : > { %1172 = vmatmul.mubr.bf16.gmra.mrb[8].mxu1 %v2115_v30  ;;  %1043 = vmatprep.mubr.bf16.mxu0 %v2116_v31 }
  0x79   : > { %1179 = vmatprep.mubr.bf16.mxu1 %v2118_v32 }
  0x7f   : > { %1044 = vmatmul.mubr.bf16.gmra.mrb[12].mxu0 %v2120_v33 }
  0x80   : > { %1180 = vmatmul.mubr.bf16.gmra.mrb[12].mxu1 %v2121_v34  ;;  %1051 = vmatprep.mubr.bf16.mxu0 %v2122_v35 }
  0x81   : > { %1187 = vmatprep.mubr.bf16.mxu1 %v2124_v36  ;;  %v404_v36 = vld [vmem:[#allocation2 + $0x10] sm:$0xff] }
  0x87   : > { %1052 = vmatmul.mubr.bf16.gmra.mrb[16].mxu0 %v2126_v37 }
  0x88   : > { %1188 = vmatmul.mubr.bf16.gmra.mrb[16].mxu1 %v2127_v38  ;;  %1059 = vmatprep.mubr.bf16.mxu0 %v2128_v39 }
  0x89   : > { %1195 = vmatprep.mubr.bf16.mxu1 %v2130_v40 }
  0x8f   : > { %1060 = vmatmul.mubr.bf16.gmra.mrb[20].mxu0 %v2132_v41  ;;  %v405_v41 = vld [vmem:[#allocation2 + $0x18] sm:$0xff] }
  0x90   : > { %1196 = vmatmul.mubr.bf16.gmra.mrb[20].mxu1 %v2133_v42  ;;  %1067 = vmatprep.mubr.bf16.mxu0 %v2134_v43 }
  0x91   : > { %1203 = vmatprep.mubr.bf16.mxu1 %v2136_v44 }
  0x97   : > { %1068 = vmatmul.mubr.bf16.gmra.mrb[24].mxu0 %v2138_v45 }
  0x98   : > { %1204 = vmatmul.mubr.bf16.gmra.mrb[24].mxu1 %v2139_v46  ;;  %1075 = vmatprep.mubr.bf16.mxu0 %v2140_v47 }
  0x99   : > { %1211 = vmatprep.mubr.bf16.mxu1 %v2142_v48 }
  0x9f   : > { %1076 = vmatmul.mubr.bf16.gmra.mrb[28].mxu0 %v2144_v49 }
  0xa0   : > { %1212 = vmatmul.mubr.bf16.gmra.mrb[28].mxu1 %v2145_v50  ;;  %1083 = vmatprep.mubr.bf16.mxu0 %v2146_v51 }
  0xa1   : > { %1219 = vmatprep.mubr.bf16.mxu1 %v2148_v52 }
  0xa7   : > { %1084 = vmatmul.mubr.bf16.gmra.mrb[32].mxu0 %v2150_v53 }
  0xa8   : > { %1220 = vmatmul.mubr.bf16.gmra.mrb[32].mxu1 %v2151_v54  ;;  %1091 = vmatprep.mubr.bf16.mxu0 %v2152_v55  ;;  %v406_v54 = vld [vmem:[#allocation2 + $0x20] sm:$0xff] }
  0xa9   : > { %1227 = vmatprep.mubr.bf16.mxu1 %v2154_v56 }
  0xaf   : > { %1092 = vmatmul.mubr.bf16.gmra.mrb[36].mxu0 %v2156_v57 }
  0xb0   : > { %1228 = vmatmul.mubr.bf16.gmra.mrb[36].mxu1 %v2157_v58  ;;  %1099 = vmatprep.mubr.bf16.mxu0 %v2158_v59  ;;  %v407_v59 = vld [vmem:[#allocation2 + $0x28] sm:$0xff] }
  0xb1   : > { %1235 = vmatprep.mubr.bf16.mxu1 %v2160_v60 }
  0xb7   : > { %1100 = vmatmul.mubr.bf16.gmra.mrb[40].mxu0 %v2162_v61 }
  0xb8   : > { %1236 = vmatmul.mubr.bf16.gmra.mrb[40].mxu1 %v2163_v62  ;;  %1107 = vmatprep.mubr.bf16.mxu0 %v2164_v63 }
  0xb9   : > { %1243 = vmatprep.mubr.bf16.mxu1 %v2166_v0 }
  0xbf   : > { %1108 = vmatmul.mubr.bf16.gmra.mrb[44].mxu0 %v2168_v3 }
  0xc0   : > { %1244 = vmatmul.mubr.bf16.gmra.mrb[44].mxu1 %v2169_v4  ;;  %1115 = vmatprep.mubr.bf16.mxu0 %v1743_v5 }
  0xc1   : > { %1251 = vmatprep.mubr.bf16.mxu1 %v1745_v6 }
  0xc7   : > { %1116 = vmatmul.mubr.bf16.gmra.mrb[48].mxu0 %v1742_v7 }
  0xc8   : > { %1252 = vmatmul.mubr.bf16.gmra.mrb[48].mxu1 %v1744_v8  ;;  %v408_v8 = vld [vmem:[#allocation2 + $0x30] sm:$0xff] }
 0x13a   : > { %v1851_v9 = vpop.f32.mrb[0].mxu0 }
 0x13b   : > { %v1945_v10 = vpop.f32.mrb[0].mxu1  ;;  %v1852_v11 = vpop.f32.mrb[1].mxu0 }
 0x13c   : > { %v1853_v12 = vadd.f32 %v1852_v11, %v1851_v9  ;;  %v1946_v13 = vpop.f32.mrb[1].mxu1  ;;  %v1854_v14 = vpop.f32.mrb[2].mxu0 }
 0x13d   : > { %v1947_v15 = vadd.f32 %v1946_v13, %v1945_v10  ;;  %v1948_v16 = vpop.f32.mrb[2].mxu1  ;;  %v1855_v17 = vpop.f32.mrb[3].mxu0  ;;  %v409_v13 = vld [vmem:[#allocation2 + $0x38] sm:$0xff] }
 0x13e   : > { %v1856_v19 = vadd.f32 %v1855_v17, %v1854_v14  ;;  %v1949_v20 = vpop.f32.mrb[3].mxu1 }
 0x13f   : > { %v1158_v21 = vadd.f32 %v1947_v15, %v1853_v12  ;;  %v1950_v22 = vadd.f32 %v1949_v20, %v1948_v16 }
 0x141   : > { %v1259_v24 = vadd.f32 %v1158_v21, %v402_v18  ;;  %v1161_v25 = vadd.f32 %v1950_v22, %v1856_v19 }
 0x142   : > { %v1857_v26 = vpop.f32.mrb[4].mxu0 }
 0x143   : > { %1285 = vst.msk [vmem:[#allocation2] sm:$0xff] %vm1284_vm1, %v1259_v24  ;;  %v1260_v27 = vadd.f32 %v1161_v25, %v403_v23  ;;  %v1951_v28 = vpop.f32.mrb[4].mxu1  ;;  %v1858_v29 = vpop.f32.mrb[5].mxu0 }
 0x144   : > { %v1859_v30 = vadd.f32 %v1858_v29, %v1857_v26  ;;  %v1952_v31 = vpop.f32.mrb[5].mxu1  ;;  %v1860_v32 = vpop.f32.mrb[6].mxu0  ;;  %v410_v26 = vld [vmem:[#allocation2 + $0x40] sm:$0xff] }
 0x145   : > { %1286 = vst.msk [vmem:[#allocation2 + $0x8] sm:$0xff] %vm1284_vm1, %v1260_v27  ;;  %v1953_v33 = vadd.f32 %v1952_v31, %v1951_v28  ;;  %v1954_v34 = vpop.f32.mrb[6].mxu1  ;;  %v1861_v35 = vpop.f32.mrb[7].mxu0  ;;  %v411_v31 = vld [vmem:[#allocation2 + $0x48] sm:$0xff] }
 0x146   : > { %v1862_v37 = vadd.f32 %v1861_v35, %v1860_v32  ;;  %v1955_v38 = vpop.f32.mrb[7].mxu1 }
 0x147   : > { %v1166_v39 = vadd.f32 %v1953_v33, %v1859_v30  ;;  %v1956_v40 = vadd.f32 %v1955_v38, %v1954_v34 }
 0x149   : > { %v1261_v42 = vadd.f32 %v1166_v39, %v404_v36  ;;  %v1169_v43 = vadd.f32 %v1956_v40, %v1862_v37 }
 0x14a   : > { %v1863_v44 = vpop.f32.mrb[8].mxu0 }
 0x14b   : > { %1287 = vst.msk [vmem:[#allocation2 + $0x10] sm:$0xff] %vm1284_vm1, %v1261_v42  ;;  %v1262_v45 = vadd.f32 %v1169_v43, %v405_v41  ;;  %v1957_v46 = vpop.f32.mrb[8].mxu1  ;;  %v1864_v47 = vpop.f32.mrb[9].mxu0 }
 0x14c   : > { %v1865_v48 = vadd.f32 %v1864_v47, %v1863_v44  ;;  %v1958_v49 = vpop.f32.mrb[9].mxu1  ;;  %v1866_v50 = vpop.f32.mrb[10].mxu0  ;;  %v412_v44 = vld [vmem:[#allocation2 + $0x50] sm:$0xff] }
 0x14d   : > { %1288 = vst.msk [vmem:[#allocation2 + $0x18] sm:$0xff] %vm1284_vm1, %v1262_v45  ;;  %v1959_v51 = vadd.f32 %v1958_v49, %v1957_v46  ;;  %v1960_v52 = vpop.f32.mrb[10].mxu1  ;;  %v1867_v53 = vpop.f32.mrb[11].mxu0  ;;  %v413_v49 = vld [vmem:[#allocation2 + $0x58] sm:$0xff] }
 0x14e   : > { %v1868_v55 = vadd.f32 %v1867_v53, %v1866_v50  ;;  %v1961_v56 = vpop.f32.mrb[11].mxu1 }
 0x14f   : > { %v1174_v57 = vadd.f32 %v1959_v51, %v1865_v48  ;;  %v1962_v58 = vadd.f32 %v1961_v56, %v1960_v52 }
 0x151   : > { %v1263_v60 = vadd.f32 %v1174_v57, %v406_v54  ;;  %v1177_v61 = vadd.f32 %v1962_v58, %v1868_v55 }
 0x152   : > { %v1869_v62 = vpop.f32.mrb[12].mxu0 }
 0x153   : > { %1289 = vst.msk [vmem:[#allocation2 + $0x20] sm:$0xff] %vm1284_vm1, %v1263_v60  ;;  %v1264_v63 = vadd.f32 %v1177_v61, %v407_v59  ;;  %v1963_v0 = vpop.f32.mrb[12].mxu1  ;;  %v1870_v1 = vpop.f32.mrb[13].mxu0 }
 0x154   : > { %v1871_v2 = vadd.f32 %v1870_v1, %v1869_v62  ;;  %v1964_v3 = vpop.f32.mrb[13].mxu1  ;;  %v1872_v4 = vpop.f32.mrb[14].mxu0  ;;  %v414_v62 = vld [vmem:[#allocation2 + $0x60] sm:$0xff] }
 0x155   : > { %1290 = vst.msk [vmem:[#allocation2 + $0x28] sm:$0xff] %vm1284_vm1, %v1264_v63  ;;  %v1965_v5 = vadd.f32 %v1964_v3, %v1963_v0  ;;  %v1966_v6 = vpop.f32.mrb[14].mxu1  ;;  %v1873_v7 = vpop.f32.mrb[15].mxu0  ;;  %v415_v3 = vld [vmem:[#allocation2 + $0x68] sm:$0xff] }
 0x156   : > { %v1874_v9 = vadd.f32 %v1873_v7, %v1872_v4  ;;  %v1967_v10 = vpop.f32.mrb[15].mxu1 }
 0x157   : > { %v1182_v11 = vadd.f32 %v1965_v5, %v1871_v2  ;;  %v1968_v12 = vadd.f32 %v1967_v10, %v1966_v6 }
 0x159   : > { %v1265_v14 = vadd.f32 %v1182_v11, %v408_v8  ;;  %v1185_v15 = vadd.f32 %v1968_v12, %v1874_v9 }
 0x15a   : > { %v1875_v16 = vpop.f32.mrb[16].mxu0 }
 0x15b   : > { %1291 = vst.msk [vmem:[#allocation2 + $0x30] sm:$0xff] %vm1284_vm1, %v1265_v14  ;;  %v1266_v17 = vadd.f32 %v1185_v15, %v409_v13  ;;  %v1969_v18 = vpop.f32.mrb[16].mxu1  ;;  %v1876_v19 = vpop.f32.mrb[17].mxu0 }
 0x15c   : > { %v1877_v20 = vadd.f32 %v1876_v19, %v1875_v16  ;;  %v1970_v21 = vpop.f32.mrb[17].mxu1  ;;  %v1878_v22 = vpop.f32.mrb[18].mxu0  ;;  %v416_v16 = vld [vmem:[#allocation2 + $0x70] sm:$0xff] }
 0x15d   : > { %1292 = vst.msk [vmem:[#allocation2 + $0x38] sm:$0xff] %vm1284_vm1, %v1266_v17  ;;  %v1971_v23 = vadd.f32 %v1970_v21, %v1969_v18  ;;  %v1972_v24 = vpop.f32.mrb[18].mxu1  ;;  %v1879_v25 = vpop.f32.mrb[19].mxu0  ;;  %v417_v21 = vld [vmem:[#allocation2 + $0x78] sm:$0xff] }
 0x15e   : > { %v1880_v27 = vadd.f32 %v1879_v25, %v1878_v22  ;;  %v1973_v28 = vpop.f32.mrb[19].mxu1 }
 0x15f   : > { %v1190_v29 = vadd.f32 %v1971_v23, %v1877_v20  ;;  %v1974_v30 = vadd.f32 %v1973_v28, %v1972_v24 }
 0x161   : > { %v1267_v32 = vadd.f32 %v1190_v29, %v410_v26  ;;  %v1193_v33 = vadd.f32 %v1974_v30, %v1880_v27 }
 0x162   : > { %v1881_v34 = vpop.f32.mrb[20].mxu0 }
 0x163   : > { %1293 = vst.msk [vmem:[#allocation2 + $0x40] sm:$0xff] %vm1284_vm1, %v1267_v32  ;;  %v1268_v35 = vadd.f32 %v1193_v33, %v411_v31  ;;  %v1975_v36 = vpop.f32.mrb[20].mxu1  ;;  %v1882_v37 = vpop.f32.mrb[21].mxu0 }
 0x164   : > { %v1883_v38 = vadd.f32 %v1882_v37, %v1881_v34  ;;  %v1976_v39 = vpop.f32.mrb[21].mxu1  ;;  %v1884_v40 = vpop.f32.mrb[22].mxu0  ;;  %v418_v34 = vld [vmem:[#allocation2 + $0x80] sm:$0xff] }
 0x165   : > { %1294 = vst.msk [vmem:[#allocation2 + $0x48] sm:$0xff] %vm1284_vm1, %v1268_v35  ;;  %v1977_v41 = vadd.f32 %v1976_v39, %v1975_v36  ;;  %v1978_v42 = vpop.f32.mrb[22].mxu1  ;;  %v1885_v43 = vpop.f32.mrb[23].mxu0  ;;  %v419_v39 = vld [vmem:[#allocation2 + $0x88] sm:$0xff] }
 0x166   : > { %v1886_v45 = vadd.f32 %v1885_v43, %v1884_v40  ;;  %v1979_v46 = vpop.f32.mrb[23].mxu1 }
 0x167   : > { %v1198_v47 = vadd.f32 %v1977_v41, %v1883_v38  ;;  %v1980_v48 = vadd.f32 %v1979_v46, %v1978_v42 }
 0x169   : > { %v1269_v50 = vadd.f32 %v1198_v47, %v412_v44  ;;  %v1201_v51 = vadd.f32 %v1980_v48, %v1886_v45 }
 0x16a   : > { %v1887_v52 = vpop.f32.mrb[24].mxu0 }
 0x16b   : > { %1295 = vst.msk [vmem:[#allocation2 + $0x50] sm:$0xff] %vm1284_vm1, %v1269_v50  ;;  %v1270_v53 = vadd.f32 %v1201_v51, %v413_v49  ;;  %v1981_v54 = vpop.f32.mrb[24].mxu1  ;;  %v1888_v55 = vpop.f32.mrb[25].mxu0 }
 0x16c   : > { %v1889_v56 = vadd.f32 %v1888_v55, %v1887_v52  ;;  %v1982_v57 = vpop.f32.mrb[25].mxu1  ;;  %v1890_v58 = vpop.f32.mrb[26].mxu0  ;;  %v420_v52 = vld [vmem:[#allocation2 + $0x90] sm:$0xff] }
 0x16d   : > { %1296 = vst.msk [vmem:[#allocation2 + $0x58] sm:$0xff] %vm1284_vm1, %v1270_v53  ;;  %v1983_v59 = vadd.f32 %v1982_v57, %v1981_v54  ;;  %v1984_v60 = vpop.f32.mrb[26].mxu1  ;;  %v1891_v61 = vpop.f32.mrb[27].mxu0  ;;  %v421_v57 = vld [vmem:[#allocation2 + $0x98] sm:$0xff] }
 0x16e   : > { %v1892_v63 = vadd.f32 %v1891_v61, %v1890_v58  ;;  %v1985_v0 = vpop.f32.mrb[27].mxu1 }
 0x16f   : > { %v1206_v1 = vadd.f32 %v1983_v59, %v1889_v56  ;;  %v1986_v2 = vadd.f32 %v1985_v0, %v1984_v60 }
 0x171   : > { %v1271_v4 = vadd.f32 %v1206_v1, %v414_v62  ;;  %v1209_v5 = vadd.f32 %v1986_v2, %v1892_v63 }
 0x172   : > { %v1893_v6 = vpop.f32.mrb[28].mxu0 }
 0x173   : > { %1297 = vst.msk [vmem:[#allocation2 + $0x60] sm:$0xff] %vm1284_vm1, %v1271_v4  ;;  %v1272_v7 = vadd.f32 %v1209_v5, %v415_v3  ;;  %v1987_v8 = vpop.f32.mrb[28].mxu1  ;;  %v1894_v9 = vpop.f32.mrb[29].mxu0 }
 0x174   : > { %v1895_v10 = vadd.f32 %v1894_v9, %v1893_v6  ;;  %v1988_v11 = vpop.f32.mrb[29].mxu1  ;;  %v1896_v12 = vpop.f32.mrb[30].mxu0  ;;  %v422_v6 = vld [vmem:[#allocation2 + $0xa0] sm:$0xff] }
 0x175   : > { %1298 = vst.msk [vmem:[#allocation2 + $0x68] sm:$0xff] %vm1284_vm1, %v1272_v7  ;;  %v1989_v13 = vadd.f32 %v1988_v11, %v1987_v8  ;;  %v1990_v14 = vpop.f32.mrb[30].mxu1  ;;  %v1897_v15 = vpop.f32.mrb[31].mxu0  ;;  %v423_v11 = vld [vmem:[#allocation2 + $0xa8] sm:$0xff] }
 0x176   : > { %v1898_v17 = vadd.f32 %v1897_v15, %v1896_v12  ;;  %v1991_v18 = vpop.f32.mrb[31].mxu1 }
 0x177   : > { %v1214_v19 = vadd.f32 %v1989_v13, %v1895_v10  ;;  %v1992_v20 = vadd.f32 %v1991_v18, %v1990_v14 }
 0x179   : > { %v1273_v22 = vadd.f32 %v1214_v19, %v416_v16  ;;  %v1217_v23 = vadd.f32 %v1992_v20, %v1898_v17 }
 0x17a   : > { %v1899_v24 = vpop.f32.mrb[32].mxu0 }
 0x17b   : > { %1299 = vst.msk [vmem:[#allocation2 + $0x70] sm:$0xff] %vm1284_vm1, %v1273_v22  ;;  %v1274_v25 = vadd.f32 %v1217_v23, %v417_v21  ;;  %v1993_v26 = vpop.f32.mrb[32].mxu1  ;;  %v1900_v27 = vpop.f32.mrb[33].mxu0 }
 0x17c   : > { %v1901_v28 = vadd.f32 %v1900_v27, %v1899_v24  ;;  %v1994_v29 = vpop.f32.mrb[33].mxu1  ;;  %v1902_v30 = vpop.f32.mrb[34].mxu0  ;;  %v424_v24 = vld [vmem:[#allocation2 + $0xb0] sm:$0xff] }
 0x17d   : > { %1300 = vst.msk [vmem:[#allocation2 + $0x78] sm:$0xff] %vm1284_vm1, %v1274_v25  ;;  %v1995_v31 = vadd.f32 %v1994_v29, %v1993_v26  ;;  %v1996_v32 = vpop.f32.mrb[34].mxu1  ;;  %v1903_v33 = vpop.f32.mrb[35].mxu0  ;;  %v425_v29 = vld [vmem:[#allocation2 + $0xb8] sm:$0xff] }
 0x17e   : > { %v1904_v35 = vadd.f32 %v1903_v33, %v1902_v30  ;;  %v1997_v36 = vpop.f32.mrb[35].mxu1 }
 0x17f   : > { %v1222_v37 = vadd.f32 %v1995_v31, %v1901_v28  ;;  %v1998_v38 = vadd.f32 %v1997_v36, %v1996_v32 }
 0x181   : > { %v1275_v40 = vadd.f32 %v1222_v37, %v418_v34  ;;  %v1225_v41 = vadd.f32 %v1998_v38, %v1904_v35 }
 0x182   : > { %v1905_v42 = vpop.f32.mrb[36].mxu0 }
 0x183   : > { %1301 = vst.msk [vmem:[#allocation2 + $0x80] sm:$0xff] %vm1284_vm1, %v1275_v40  ;;  %v1276_v43 = vadd.f32 %v1225_v41, %v419_v39  ;;  %v1999_v44 = vpop.f32.mrb[36].mxu1  ;;  %v1906_v45 = vpop.f32.mrb[37].mxu0 }
 0x184   : > { %v1907_v46 = vadd.f32 %v1906_v45, %v1905_v42  ;;  %v2000_v47 = vpop.f32.mrb[37].mxu1  ;;  %v1908_v48 = vpop.f32.mrb[38].mxu0  ;;  %v426_v42 = vld [vmem:[#allocation2 + $0xc0] sm:$0xff] }
 0x185   : > { %1302 = vst.msk [vmem:[#allocation2 + $0x88] sm:$0xff] %vm1284_vm1, %v1276_v43  ;;  %v2001_v49 = vadd.f32 %v2000_v47, %v1999_v44  ;;  %v2002_v50 = vpop.f32.mrb[38].mxu1  ;;  %v1909_v51 = vpop.f32.mrb[39].mxu0  ;;  %v2530_v47 = vld [vmem:[%s2675_s2] ss:$0 sm:$0xff] (!%p1778_p11) }
 0x186   : > { %v1910_v53 = vadd.f32 %v1909_v51, %v1908_v48  ;;  %v2003_v54 = vpop.f32.mrb[39].mxu1  ;;  %v1315_v48 = vld [vmem:[#allocation2 + $0x8] sm:$0xff] (!%p1778_p11)  ;;  %v1316_v51 = vld [vmem:[#allocation2 + $0x10] sm:$0xff] (!%p1778_p11) }
 0x187   : > { %v1230_v55 = vadd.f32 %v2001_v49, %v1907_v46  ;;  %v2004_v56 = vadd.f32 %v2003_v54, %v2002_v50  ;;  %v1314_v46 = vld [vmem:[#allocation2] sm:$0xff] (!%p1778_p11)  ;;  %v1347_v50 = vadd.f32 (!%p1778_p11), %v2530_v47, %v1315_v48  ;;  %v1348_v54 = vadd.f32 (!%p1778_p11), %v2530_v47, %v1316_v51 }
 0x188   : > { %v1346_v49 = vadd.f32 (!%p1778_p11), %v2530_v47, %v1314_v46 }
 0x189   : > { %v1277_v58 = vadd.f32 %v1230_v55, %v420_v52  ;;  %v1233_v59 = vadd.f32 %v2004_v56, %v1910_v53  ;;  %v1317_v52 = vld [vmem:[#allocation2 + $0x18] sm:$0xff] (!%p1778_p11)  ;;  %v1318_v53 = vld [vmem:[#allocation2 + $0x20] sm:$0xff] (!%p1778_p11)  ;;  %vm1372_vm4 = vcmp.ge.f32.partialorder (!%p1778_p11), %v1347_v50, 0.0  ;;  %vm1373_vm5 = vcmp.ge.f32.partialorder (!%p1778_p11), %v1348_v54, 0.0 }
 0x18a   : > { %v1911_v60 = vpop.f32.mrb[40].mxu0  ;;  %v1349_v55 = vadd.f32 (!%p1778_p11), %v2530_v47, %v1317_v52  ;;  %v1350_v56 = vadd.f32 (!%p1778_p11), %v2530_v47, %v1318_v53  ;;  %vm1371_vm3 = vcmp.ge.f32.partialorder (!%p1778_p11), %v1346_v49, 0.0  ;;  %v1330_v51 = vld [vmem:[#allocation2 + $0x80] sm:$0xff] (!%p1778_p11) }
 0x18b   : > { %1303 = vst.msk [vmem:[#allocation2 + $0x90] sm:$0xff] %vm1284_vm1, %v1277_v58  ;;  %v1278_v61 = vadd.f32 %v1233_v59, %v421_v57  ;;  %v2005_v62 = vpop.f32.mrb[40].mxu1  ;;  %v1912_v63 = vpop.f32.mrb[41].mxu0  ;;  %v1396_v57 = vmul.f32 (!%p1778_p11), 0.25, %v1346_v49  ;;  %v1397_v58 = vmul.f32 (!%p1778_p11), 0.25, %v1347_v50  ;;  %v1398_v59 = vmul.f32 (!%p1778_p11), 0.25, %v1348_v54 }
 0x18c   : > { %v1913_v0 = vadd.f32 %v1912_v63, %v1911_v60  ;;  %v2006_v1 = vpop.f32.mrb[41].mxu1  ;;  %v1914_v2 = vpop.f32.mrb[42].mxu0  ;;  %vm1374_vm6 = vcmp.ge.f32.partialorder (!%p1778_p11), %v1349_v55, 0.0  ;;  %v1399_v60 = vmul.f32 (!%p1778_p11), 0.25, %v1349_v55  ;;  %vm1375_vm7 = vcmp.ge.f32.partialorder (!%p1778_p11), %v1350_v56, 0.0 }
 0x18d   : > { %1304 = vst.msk [vmem:[#allocation2 + $0x98] sm:$0xff] %vm1284_vm1, %v1278_v61  ;;  %v2007_v3 = vadd.f32 %v2006_v1, %v2005_v62  ;;  %v2008_v4 = vpop.f32.mrb[42].mxu1  ;;  %v1915_v5 = vpop.f32.mrb[43].mxu0  ;;  %v1319_v61 = vld [vmem:[#allocation2 + $0x28] sm:$0xff] (!%p1778_p11)  ;;  %v1421_v62 = vsel (!%p1778_p11), %vm1371_vm3, %v1346_v49, %v1396_v57  ;;  %v1422_v63 = vsel (!%p1778_p11), %vm1372_vm4, %v1347_v50, %v1397_v58  ;;  %v1320_v1 = vld [vmem:[#allocation2 + $0x30] sm:$0xff] (!%p1778_p11) }
 0x18e   : > { %v1916_v7 = vadd.f32 %v1915_v5, %v1914_v2  ;;  %v2009_v8 = vpop.f32.mrb[43].mxu1  ;;  %v1321_v2 = vld [vmem:[#allocation2 + $0x38] sm:$0xff] (!%p1778_p11)  ;;  %v1811_v5 = vpack.c.bf16 (!%p1778_p11), %v1422_v63, %v1422_v63  ;;  %v1362_v63 = vadd.f32 (!%p1778_p11), %v2530_v47, %v1330_v51 }
 0x18f   : > { %v1238_v9 = vadd.f32 %v2007_v3, %v1913_v0  ;;  %v2010_v10 = vadd.f32 %v2009_v8, %v2008_v4  ;;  %v1400_v0 = vmul.f32 (!%p1778_p11), 0.25, %v1350_v56  ;;  %v1322_v3 = vld [vmem:[#allocation2 + $0x40] sm:$0xff] (!%p1778_p11)  ;;  %v1810_v4 = vpack.c.bf16 (!%p1778_p11), %v1421_v62, %v1421_v62  ;;  %v1323_v8 = vld [vmem:[#allocation2 + $0x48] sm:$0xff] (!%p1778_p11) }
 0x190   : > { %1549 = vst.msk [vmem:[%s2676_s3 + $0x4] sm:$0xf] (!%p1778_p11), %vm1547_vm2, %v1811_v5  ;;  %vm1387_vm4 = vcmp.ge.f32.partialorder (!%p1778_p11), %v1362_v63, 0.0 }
 0x191   : > { %v1279_v12 = vadd.f32 %v1238_v9, %v422_v6  ;;  %v1241_v13 = vadd.f32 %v2010_v10, %v1916_v7  ;;  %v1423_v6 = vsel (!%p1778_p11), %vm1373_vm5, %v1348_v54, %v1398_v59  ;;  %v1424_v7 = vsel (!%p1778_p11), %vm1374_vm6, %v1349_v55, %v1399_v60  ;;  %v1324_v9 = vld [vmem:[#allocation2 + $0x50] sm:$0xff] (!%p1778_p11)  ;;  %1548 = vst.msk [vmem:[%s2676_s3] sm:$0xf] (!%p1778_p11), %vm1547_vm2, %v1810_v4  ;;  %v1331_v55 = vld [vmem:[#allocation2 + $0x88] sm:$0xff] (!%p1778_p11) }
 0x192   : > { %v1917_v14 = vpop.f32.mrb[44].mxu0  ;;  %v1812_v10 = vpack.c.bf16 (!%p1778_p11), %v1423_v6, %v1423_v6  ;;  %v1332_v59 = vld [vmem:[#allocation2 + $0x90] sm:$0xff] (!%p1778_p11)  ;;  %v1363_v5 = vadd.f32 (!%p1778_p11), %v2530_v47, %v1331_v55 }
 0x193   : > { %1305 = vst.msk [vmem:[#allocation2 + $0xa0] sm:$0xff] %vm1284_vm1, %v1279_v12  ;;  %v1280_v15 = vadd.f32 %v1241_v13, %v423_v11  ;;  %v2011_v16 = vpop.f32.mrb[44].mxu1  ;;  %v1918_v17 = vpop.f32.mrb[45].mxu0  ;;  %v1813_v11 = vpack.c.bf16 (!%p1778_p11), %v1424_v7, %v1424_v7  ;;  %v1425_v12 = vsel (!%p1778_p11), %vm1375_vm7, %v1350_v56, %v1400_v0  ;;  %v1351_v13 = vadd.f32 (!%p1778_p11), %v2530_v47, %v1319_v61 }
 0x194   : > { %v1919_v18 = vadd.f32 %v1918_v17, %v1917_v14  ;;  %v2012_v19 = vpop.f32.mrb[45].mxu1  ;;  %v1920_v20 = vpop.f32.mrb[46].mxu0  ;;  %v1814_v14 = vpack.c.bf16 (!%p1778_p11), %v1425_v12, %v1425_v12  ;;  %v1354_v17 = vadd.f32 (!%p1778_p11), %v2530_v47, %v1322_v3  ;;  %1550 = vst.msk [vmem:[%s2676_s3 + $0x8] sm:$0xf] (!%p1778_p11), %vm1547_vm2, %v1812_v10  ;;  %v1333_v0 = vld [vmem:[#allocation2 + $0x98] sm:$0xff] (!%p1778_p11)  ;;  %vm1388_vm5 = vcmp.ge.f32.partialorder (!%p1778_p11), %v1363_v5, 0.0 }
 0x195   : > { %1306 = vst.msk [vmem:[#allocation2 + $0xa8] sm:$0xff] %vm1284_vm1, %v1280_v15  ;;  %v2013_v21 = vadd.f32 %v2012_v19, %v2011_v16  ;;  %v2014_v22 = vpop.f32.mrb[46].mxu1  ;;  %v1921_v23 = vpop.f32.mrb[47].mxu0  ;;  %v1352_v15 = vadd.f32 (!%p1778_p11), %v2530_v47, %v1320_v1  ;;  %v1353_v16 = vadd.f32 (!%p1778_p11), %v2530_v47, %v1321_v2  ;;  %vm1376_vm8 = vcmp.ge.f32.partialorder (!%p1778_p11), %v1351_v13, 0.0 }
 0x196   : > { %v1922_v25 = vadd.f32 %v1921_v23, %v1920_v20  ;;  %v2015_v26 = vpop.f32.mrb[47].mxu1  ;;  %1551 = vst.msk [vmem:[%s2676_s3 + $0xc] sm:$0xf] (!%p1778_p11), %vm1547_vm2, %v1813_v11  ;;  %v1355_v19 = vadd.f32 (!%p1778_p11), %v2530_v47, %v1323_v8  ;;  %v1356_v20 = vadd.f32 (!%p1778_p11), %v2530_v47, %v1324_v9  ;;  %1552 = vst.msk [vmem:[%s2676_s3 + $0x10] sm:$0xf] (!%p1778_p11), %vm1547_vm2, %v1814_v14  ;;  %vm1379_vm11 = vcmp.ge.f32.partialorder (!%p1778_p11), %v1354_v17, 0.0 }
 0x197   : > { %v1246_v27 = vadd.f32 %v2013_v21, %v1919_v18  ;;  %v2016_v28 = vadd.f32 %v2015_v26, %v2014_v22  ;;  %v1401_v18 = vmul.f32 (!%p1778_p11), 0.25, %v1351_v13  ;;  %vm1377_vm9 = vcmp.ge.f32.partialorder (!%p1778_p11), %v1352_v15, 0.0 }
 0x198   : > { %v1402_v21 = vmul.f32 (!%p1778_p11), 0.25, %v1352_v15  ;;  %vm1378_vm10 = vcmp.ge.f32.partialorder (!%p1778_p11), %v1353_v16, 0.0  ;;  %v1403_v22 = vmul.f32 (!%p1778_p11), 0.25, %v1353_v16  ;;  %vm1380_vm12 = vcmp.ge.f32.partialorder (!%p1778_p11), %v1355_v19, 0.0 }
 0x199   : > { %v1281_v30 = vadd.f32 %v1246_v27, %v424_v24  ;;  %v1249_v31 = vadd.f32 %v2016_v28, %v1922_v25  ;;  %v1426_v23 = vsel (!%p1778_p11), %vm1376_vm8, %v1351_v13, %v1401_v18  ;;  %v1404_v24 = vmul.f32 (!%p1778_p11), 0.25, %v1354_v17  ;;  %v1325_v25 = vld [vmem:[#allocation2 + $0x58] sm:$0xff] (!%p1778_p11) }
 0x19a   : > { %v1923_v32 = vpop.f32.mrb[48].mxu0  ;;  %v1815_v26 = vpack.c.bf16 (!%p1778_p11), %v1426_v23, %v1426_v23  ;;  %v1427_v27 = vsel (!%p1778_p11), %vm1377_vm9, %v1352_v15, %v1402_v21  ;;  %v1428_v28 = vsel (!%p1778_p11), %vm1378_vm10, %v1353_v16, %v1403_v22  ;;  %vm1381_vm13 = vcmp.ge.f32.partialorder (!%p1778_p11), %v1356_v20, 0.0  ;;  %v1334_v1 = vld [vmem:[#allocation2 + $0xa0] sm:$0xff] (!%p1778_p11) }
 0x19b   : > { %1307 = vst.msk [vmem:[#allocation2 + $0xb0] sm:$0xff] %vm1284_vm1, %v1281_v30  ;;  %v1282_v33 = vadd.f32 %v1249_v31, %v425_v29  ;;  %v2017_v34 = vpop.f32.mrb[48].mxu1  ;;  %v1924_v35 = vpop.f32.mrb[49].mxu0  ;;  %v1405_v29 = vmul.f32 (!%p1778_p11), 0.25, %v1355_v19  ;;  %v1326_v30 = vld [vmem:[#allocation2 + $0x60] sm:$0xff] (!%p1778_p11)  ;;  %v1327_v31 = vld [vmem:[#allocation2 + $0x68] sm:$0xff] (!%p1778_p11)  ;;  %v1364_v9 = vadd.f32 (!%p1778_p11), %v2530_v47, %v1332_v59  ;;  %v1365_v11 = vadd.f32 (!%p1778_p11), %v2530_v47, %v1333_v0 }
 0x19c   : > { %v1925_v36 = vadd.f32 %v1924_v35, %v1923_v32  ;;  %v2018_v37 = vpop.f32.mrb[49].mxu1  ;;  %v1926_v38 = vpop.f32.mrb[50].mxu0  ;;  %v1328_v32 = vld [vmem:[#allocation2 + $0x70] sm:$0xff] (!%p1778_p11)  ;;  %v1429_v35 = vsel (!%p1778_p11), %vm1379_vm11, %v1354_v17, %v1404_v24  ;;  %1553 = vst.msk [vmem:[%s2676_s3 + $0x14] sm:$0xf] (!%p1778_p11), %vm1547_vm2, %v1815_v26  ;;  %v1335_v6 = vld [vmem:[#allocation2 + $0xa8] sm:$0xff] (!%p1778_p11)  ;;  %v1366_v12 = vadd.f32 (!%p1778_p11), %v2530_v47, %v1334_v1 }
 0x19d   : > { %1308 = vst.msk [vmem:[#allocation2 + $0xb8] sm:$0xff] %vm1284_vm1, %v1282_v33  ;;  %v2019_v39 = vadd.f32 %v2018_v37, %v2017_v34  ;;  %v2020_v40 = vpop.f32.mrb[50].mxu1  ;;  %v1927_v41 = vpop.f32.mrb[51].mxu0  ;;  %1313 = sbr.rel (%p1778_p11) target bundleno = 435 (0x1b3), region = 63  ;;  %v1816_v33 = vpack.c.bf16 (!%p1778_p11), %v1427_v27, %v1427_v27  ;;  %v1817_v34 = vpack.c.bf16 (!%p1778_p11), %v1428_v28, %v1428_v28  ;;  %v1818_v37 = vpack.c.bf16 (!%p1778_p11), %v1429_v35, %v1429_v35 }
 0x19e   : > { %v2021_v43 = vpop.f32.mrb[51].mxu1  ;;  %v1430_v38 = vsel (!%p1778_p11), %vm1380_vm12, %v1355_v19, %v1405_v29  ;;  %v1357_v40 = vadd.f32 (!%p1778_p11), %v2530_v47, %v1325_v25  ;;  %v1412_v8 = vmul.f32 (!%p1778_p11), 0.25, %v1362_v63  ;;  %v1413_v10 = vmul.f32 (!%p1778_p11), 0.25, %v1363_v5 }
 0x19f   : > { %v1254_v44 = vadd.f32 %v2019_v39, %v1925_v36  ;;  %v1329_v36 = vld [vmem:[#allocation2 + $0x78] sm:$0xff] (!%p1778_p11)  ;;  %v1406_v39 = vmul.f32 (!%p1778_p11), 0.25, %v1356_v20  ;;  %1554 = vst.msk [vmem:[%s2676_s3 + $0x18] sm:$0xf] (!%p1778_p11), %vm1547_vm2, %v1816_v33  ;;  %1555 = vst.msk [vmem:[%s2676_s3 + $0x1c] sm:$0xf] (!%p1778_p11), %vm1547_vm2, %v1817_v34  ;;  %v1819_v41 = vpack.c.bf16 (!%p1778_p11), %v1430_v38, %v1430_v38  ;;  %v1359_v43 = vadd.f32 (!%p1778_p11), %v2530_v47, %v1327_v31 }
 0x1a0   : > { %1556 = vst.msk [vmem:[%s2676_s3 + $0x20] sm:$0xf] (!%p1778_p11), %vm1547_vm2, %v1818_v37  ;;  %vm1382_vm14 = vcmp.ge.f32.partialorder (!%p1778_p11), %v1357_v40, 0.0  ;;  %v1407_v46 = vmul.f32 (!%p1778_p11), 0.25, %v1357_v40  ;;  %v1361_v48 = vadd.f32 (!%p1778_p11), %v2530_v47, %v1329_v36  ;;  %v1437_v13 = vsel (!%p1778_p11), %vm1387_vm4, %v1362_v63, %v1412_v8 }
 0x1a1   : > { %v1283_v45 = vadd.f32 %v1254_v44, %v426_v42  ;;  %v1358_v42 = vadd.f32 (!%p1778_p11), %v2530_v47, %v1326_v30  ;;  %v1360_v44 = vadd.f32 (!%p1778_p11), %v2530_v47, %v1328_v32  ;;  %1557 = vst.msk [vmem:[%s2676_s3 + $0x24] sm:$0xf] (!%p1778_p11), %vm1547_vm2, %v1819_v41  ;;  %vm1384_vm0 = vcmp.ge.f32.partialorder (!%p1778_p11), %v1359_v43, 0.0 }
 0x1a2   : > { %v1432_v52 = vsel (!%p1778_p11), %vm1382_vm14, %v1357_v40, %v1407_v46  ;;  %v1409_v53 = vmul.f32 (!%p1778_p11), 0.25, %v1359_v43  ;;  %vm1386_vm3 = vcmp.ge.f32.partialorder (!%p1778_p11), %v1361_v48, 0.0  ;;  %v1411_v58 = vmul.f32 (!%p1778_p11), 0.25, %v1361_v48  ;;  %v1336_v19 = vld [vmem:[#allocation2 + $0xb0] sm:$0xff] (!%p1778_p11) }
 0x1a3   : > { %1309 = vst.msk [vmem:[#allocation2 + $0xc0] sm:$0xff] %vm1284_vm1, %v1283_v45  ;;  %v1431_v45 = vsel (!%p1778_p11), %vm1381_vm13, %v1356_v20, %v1406_v39  ;;  %vm1383_vm15 = vcmp.ge.f32.partialorder (!%p1778_p11), %v1358_v42, 0.0  ;;  %v1408_v50 = vmul.f32 (!%p1778_p11), 0.25, %v1358_v42  ;;  %vm1385_vm1 = vcmp.ge.f32.partialorder (!%p1778_p11), %v1360_v44, 0.0 }
 0x1a4   : > { %v1820_v49 = vpack.c.bf16 %v1431_v45, %v1431_v45  ;;  %v1410_v54 = vmul.f32 0.25, %v1360_v44  ;;  %v1821_v56 = vpack.c.bf16 %v1432_v52, %v1432_v52  ;;  %v1434_v61 = vsel %vm1384_vm0, %v1359_v43, %v1409_v53  ;;  %v1337_v20 = vld [vmem:[#allocation2 + $0xb8] sm:$0xff] }
 0x1a5   : > { %v1433_v57 = vsel %vm1383_vm15, %v1358_v42, %v1408_v50  ;;  %v1823_v2 = vpack.c.bf16 %v1434_v61, %v1434_v61  ;;  %v1436_v4 = vsel %vm1386_vm3, %v1361_v48, %v1411_v58  ;;  %vm1389_vm6 = vcmp.ge.f32.partialorder %v1364_v9, 0.0 }
 0x1a6   : > { %1558 = vst.msk [vmem:[%s2676_s3 + $0x28] sm:$0xf] %vm1547_vm2, %v1820_v49  ;;  %v1822_v60 = vpack.c.bf16 %v1433_v57, %v1433_v57  ;;  %v1435_v62 = vsel %vm1385_vm1, %v1360_v44, %v1410_v54  ;;  %1559 = vst.msk [vmem:[%s2676_s3 + $0x2c] sm:$0xf] %vm1547_vm2, %v1821_v56  ;;  %v1825_v7 = vpack.c.bf16 %v1436_v4, %v1436_v4  ;;  %v1414_v14 = vmul.f32 0.25, %v1364_v9 }
 0x1a7   : > { %v1824_v3 = vpack.c.bf16 %v1435_v62, %v1435_v62  ;;  %1561 = vst.msk [vmem:[%s2676_s3 + $0x34] sm:$0xf] %vm1547_vm2, %v1823_v2  ;;  %v1367_v15 = vadd.f32 %v2530_v47, %v1335_v6  ;;  %v1826_v16 = vpack.c.bf16 %v1437_v13, %v1437_v13  ;;  %v1438_v17 = vsel %vm1388_vm5, %v1363_v5, %v1413_v10 }
 0x1a8   : > { %1560 = vst.msk [vmem:[%s2676_s3 + $0x30] sm:$0xf] %vm1547_vm2, %v1822_v60  ;;  %1563 = vst.msk [vmem:[%s2676_s3 + $0x3c] sm:$0xf] %vm1547_vm2, %v1825_v7  ;;  %vm1390_vm7 = vcmp.ge.f32.partialorder %v1365_v11, 0.0  ;;  %v1415_v18 = vmul.f32 0.25, %v1365_v11  ;;  %v1827_v21 = vpack.c.bf16 %v1438_v17, %v1438_v17  ;;  %v1439_v22 = vsel %vm1389_vm6, %v1364_v9, %v1414_v14 }
 0x1a9   : > { %1562 = vst.msk [vmem:[%s2676_s3 + $0x38] sm:$0xf] %vm1547_vm2, %v1824_v3  ;;  %vm1391_vm8 = vcmp.ge.f32.partialorder %v1366_v12, 0.0  ;;  %v1416_v23 = vmul.f32 0.25, %v1366_v12  ;;  %1564 = vst.msk [vmem:[%s2676_s3 + $0x40] sm:$0xf] %vm1547_vm2, %v1826_v16  ;;  %v1828_v25 = vpack.c.bf16 %v1439_v22, %v1439_v22  ;;  %v1368_v30 = vadd.f32 %v2530_v47, %v1336_v19 }
 0x1aa   : > { %v1338_v24 = vld [vmem:[#allocation2 + $0xc0] sm:$0xff]  ;;  %v1440_v26 = vsel %vm1390_vm7, %v1365_v11, %v1415_v18  ;;  %vm1392_vm9 = vcmp.ge.f32.partialorder %v1367_v15, 0.0  ;;  %v1417_v27 = vmul.f32 0.25, %v1367_v15  ;;  %1565 = vst.msk [vmem:[%s2676_s3 + $0x44] sm:$0xf] %vm1547_vm2, %v1827_v21  ;;  %v1369_v31 = vadd.f32 %v2530_v47, %v1337_v20 }
 0x1ab   : > { %v1829_v28 = vpack.c.bf16 %v1440_v26, %v1440_v26  ;;  %v1441_v29 = vsel %vm1391_vm8, %v1366_v12, %v1416_v23  ;;  %1566 = vst.msk [vmem:[%s2676_s3 + $0x48] sm:$0xf] %vm1547_vm2, %v1828_v25  ;;  %v1370_v34 = vadd.f32 %v2530_v47, %v1338_v24  ;;  %vm1393_vm10 = vcmp.ge.f32.partialorder %v1368_v30, 0.0 }
 0x1ac   : > { %v1830_v32 = vpack.c.bf16 %v1441_v29, %v1441_v29  ;;  %v1442_v33 = vsel %vm1392_vm9, %v1367_v15, %v1417_v27  ;;  %v1418_v36 = vmul.f32 0.25, %v1368_v30  ;;  %vm1394_vm11 = vcmp.ge.f32.partialorder %v1369_v31, 0.0 }
 0x1ad   : > { %1567 = vst.msk [vmem:[%s2676_s3 + $0x4c] sm:$0xf] %vm1547_vm2, %v1829_v28  ;;  %v1831_v35 = vpack.c.bf16 %v1442_v33, %v1442_v33  ;;  %v1419_v37 = vmul.f32 0.25, %v1369_v31  ;;  %vm1395_vm12 = vcmp.ge.f32.partialorder %v1370_v34, 0.0  ;;  %v1420_v38 = vmul.f32 0.25, %v1370_v34 }
 0x1ae   : > { %1568 = vst.msk [vmem:[%s2676_s3 + $0x50] sm:$0xf] %vm1547_vm2, %v1830_v32  ;;  %v1443_v47 = vsel %vm1393_vm10, %v1368_v30, %v1418_v36 }
 0x1af   : > { %1569 = vst.msk [vmem:[%s2676_s3 + $0x54] sm:$0xf] %vm1547_vm2, %v1831_v35  ;;  %v1832_v39 = vpack.c.bf16 %v1443_v47, %v1443_v47  ;;  %v1444_v40 = vsel %vm1394_vm11, %v1369_v31, %v1419_v37  ;;  %v1445_v41 = vsel %vm1395_vm12, %v1370_v34, %v1420_v38 }
 0x1b0   : > { %v1833_v42 = vpack.c.bf16 %v1444_v40, %v1444_v40  ;;  %v1834_v43 = vpack.c.bf16 %v1445_v41, %v1445_v41 }
 0x1b1   : > { %1570 = vst.msk [vmem:[%s2676_s3 + $0x58] sm:$0xf] %vm1547_vm2, %v1832_v39 }
 0x1b2   : > { %1571 = vst.msk [vmem:[%s2676_s3 + $0x5c] sm:$0xf] %vm1547_vm2, %v1833_v42  ;;  %1572 = vst.msk [vmem:[%s2676_s3 + $0x60] sm:$0xf] %vm1547_vm2, %v1834_v43 }
 0x1b3 PF: > { %s13_s16 = sadd.s32 1, %s2212_s16   ;;  %s2677_s12 = smov %s2200_s13 }
 0x1b4   : > { %p10_p12 = scmp.ge.s32.totalorder %s13_s16, 4   ;;  %s2678_s13 = smov %s2270_s20 }
 0x1b5   : > { %s2679_s14 = smov %s2208_s15  ;;  %s2680_s15 = smov %s2682_s17 }
 0x1b6   :  { %12 = sbr.rel (!%p10_p12) target bundleno = 3 (0x3), region = 104 }

// kernel: a_call__.9
= control target key start
LH: loop header
LB: loop body
LE: loop exit
PB: predicated region body
PF: predicated region fallthrough
CT: control target
= control target key end

     0   :  { %vm46_vm0 = vcmask 519168   ;;  %vm49_vm1 = vcmask 516096   ;;  %s141_s0 = inlined_call_operand.vmem [shape: bf16[10,320], index: 0, kind: input, shape index: {}]   ;;  %s142_s1 = inlined_call_operand.vmem [shape: bf16[10,320], index: 1, kind: input, shape index: {}]   ;;  %s143_s2 = inlined_call_operand.vmem [shape: bf16[10,320], index: 2, kind: input, shape index: {}]   ;;  %s144_s3 = inlined_call_operand.vmem [shape: bf16[10,320], index: 3, kind: input, shape index: {}]   ;;  %s145_s4 = inlined_call_operand.vmem [shape: bf16[10,320], index: 4, kind: output, shape index: {}]  }
   0x1   :  { %v17_v0 = vld [vmem:[%s141_s0] sm:$0xff]  ;;  %v18_v5 = vld [vmem:[%s141_s0 + $0x8] sm:$0xf]  ;;  %v19_v11 = vld [vmem:[%s141_s0 + $0xc] sm:$0x11] }
   0x2   :  { %v21_v1 = vld [vmem:[%s142_s1] sm:$0xff]  ;;  %v22_v6 = vld [vmem:[%s142_s1 + $0x8] sm:$0xf]  ;;  %v23_v13 = vld [vmem:[%s142_s1 + $0xc] sm:$0x11] }
   0x3   :  { %v29_v2 = vld [vmem:[%s143_s2] sm:$0xff]  ;;  %v25_v3 = vmax.bf16 %v21_v1, %v17_v0  ;;  %v26_v8 = vmax.bf16 %v22_v6, %v18_v5  ;;  %v30_v9 = vld [vmem:[%s143_s2 + $0x8] sm:$0xf]  ;;  %v31_v14 = vld [vmem:[%s143_s2 + $0xc] sm:$0x11]  ;;  %v27_v17 = vmax.bf16 %v23_v13, %v19_v11 }
   0x4   :  { %v33_v4 = vld [vmem:[%s144_s3] sm:$0xff]  ;;  %v34_v10 = vld [vmem:[%s144_s3 + $0x8] sm:$0xf]  ;;  %v35_v15 = vld [vmem:[%s144_s3 + $0xc] sm:$0x11] }
   0x5   :  { %v37_v7 = vmax.bf16 %v33_v4, %v29_v2  ;;  %v38_v12 = vmax.bf16 %v34_v10, %v30_v9  ;;  %v39_v18 = vmax.bf16 %v35_v15, %v31_v14  ;;  %v20_v19 = vld [vmem:[%s141_s0 + $0x14] sm:$0x1] }
   0x6   :  { %v24_v20 = vld [vmem:[%s142_s1 + $0x14] sm:$0x1] }
   0x7   :  { %v41_v16 = vmax.bf16 %v37_v7, %v25_v3  ;;  %v32_v21 = vld [vmem:[%s143_s2 + $0x14] sm:$0x1]  ;;  %v42_v22 = vmax.bf16 %v38_v12, %v26_v8  ;;  %v28_v23 = vmax.bf16 %v24_v20, %v20_v19  ;;  %v43_v25 = vmax.bf16 %v39_v18, %v27_v17 }
   0x8   :  { %v36_v24 = vld [vmem:[%s144_s3 + $0x14] sm:$0x1] }
   0x9   :  { %45 = vst [vmem:[%s145_s4] sm:$0xff] %v41_v16  ;;  %v40_v26 = vmax.bf16 %v36_v24, %v32_v21  ;;  %47 = vst.msk [vmem:[%s145_s4 + $0x8] sm:$0xf] %vm46_vm0, %v42_v22 }
   0xa   :  { %48 = vst [vmem:[%s145_s4 + $0xc] sm:$0x11] %v43_v25 }
   0xb   :  { %v44_v27 = vmax.bf16 %v40_v26, %v28_v23 }
   0xd   :  { %50 = vst.msk [vmem:[%s145_s4 + $0x14] sm:$0x1] %vm49_vm1, %v44_v27 }

// kernel: a_call__.11
= control target key start
LH: loop header
LB: loop body
LE: loop exit
PB: predicated region body
PF: predicated region fallthrough
CT: control target
= control target key end

     0   :  { %v100_v30 = vlaneseq  ;;  %v556_v34 = vmov 1966171168   ;;  %s696_s0 = inlined_call_operand.vmem [shape: bf16[2,512], index: 0, kind: input, shape index: {}]   ;;  %s697_s1 = inlined_call_operand.vmem [shape: bf16[512,64], index: 1, kind: input, shape index: {}]   ;;  %s698_s2 = inlined_call_operand.vmem [shape: f32[1,64], index: 2, kind: input, shape index: {}]   ;;  %s699_s3 = inlined_call_operand.hbm [shape: f32[2,64], index: 3, kind: output, shape index: {}]  }
   0x1   :  { %v500_v0 = vld [vmem:[%s697_s1 + $0x40] sm:$0xff]   ;;  %v504_v4 = vld [vmem:[%s697_s1 + $0x48] sm:$0xff]   ;;  %v508_v8 = vld [vmem:[%s697_s1 + $0x50] sm:$0xff]   ;;  %v98_v35 = vunpack.c.l.s4 %v556_v34 }
   0x2   :  { %v501_v1 = vld [vmem:[%s697_s1 + $0xc0] sm:$0xff]   ;;  %453 = vmatprep.subr.bf16.mxu0 %v500_v0  ;;  %v505_v5 = vld [vmem:[%s697_s1 + $0xc8] sm:$0xff]   ;;  %v509_v9 = vld [vmem:[%s697_s1 + $0xd0] sm:$0xff]   ;;  %v101_v36 = vshrl.u32 %v100_v30, 7 }
   0x3   :  { %v502_v2 = vld [vmem:[%s697_s1] sm:$0xff]   ;;  %475 = vmatprep.subr.bf16.mxu1 %v501_v1  ;;  %v506_v6 = vld [vmem:[%s697_s1 + $0x8] sm:$0xff]   ;;  %v510_v10 = vld [vmem:[%s697_s1 + $0x10] sm:$0xff]  }
   0x4   :  { %v503_v3 = vld [vmem:[%s697_s1 + $0x80] sm:$0xff]   ;;  %454 = vmatpush3.bf16.msra.mxu0 %v502_v2  ;;  %v507_v7 = vld [vmem:[%s697_s1 + $0x88] sm:$0xff]   ;;  %v511_v11 = vld [vmem:[%s697_s1 + $0x90] sm:$0xff]  }
   0x5   :  { %476 = vmatpush3.bf16.msra.mxu1 %v503_v3  ;;  %455 = vmatprep.subr.bf16.mxu0 %v504_v4  ;;  %v512_v12 = vld [vmem:[%s697_s1 + $0x58] sm:$0xff]   ;;  %v516_v16 = vld [vmem:[%s697_s1 + $0x60] sm:$0xff]   ;;  %v520_v20 = vld [vmem:[%s697_s1 + $0x68] sm:$0xff]  }
   0x6   :  { %477 = vmatprep.subr.bf16.mxu1 %v505_v5  ;;  %v513_v13 = vld [vmem:[%s697_s1 + $0xd8] sm:$0xff]   ;;  %v517_v17 = vld [vmem:[%s697_s1 + $0xe0] sm:$0xff]   ;;  %v521_v21 = vld [vmem:[%s697_s1 + $0xe8] sm:$0xff]  }
   0x7   :  { %v514_v14 = vld [vmem:[%s697_s1 + $0x18] sm:$0xff]   ;;  %v518_v18 = vld [vmem:[%s697_s1 + $0x20] sm:$0xff]   ;;  %v522_v22 = vld [vmem:[%s697_s1 + $0x28] sm:$0xff]  }
   0x8   :  { %456 = vmatpush3.bf16.msra.mxu0 %v506_v6  ;;  %v515_v15 = vld [vmem:[%s697_s1 + $0x98] sm:$0xff]   ;;  %v519_v19 = vld [vmem:[%s697_s1 + $0xa0] sm:$0xff]   ;;  %v523_v23 = vld [vmem:[%s697_s1 + $0xa8] sm:$0xff]  }
   0x9   :  { %478 = vmatpush3.bf16.msra.mxu1 %v507_v7  ;;  %457 = vmatprep.subr.bf16.mxu0 %v508_v8  ;;  %v524_v24 = vld [vmem:[%s697_s1 + $0x70] sm:$0xff]   ;;  %v528_v28 = vld [vmem:[%s697_s1 + $0x78] sm:$0xff]   ;;  %v419_v33 = vld.sshfl [vmem:[%s696_s0] sm:$0x33 pattern:$0x75316420] }
   0xa   :  { %479 = vmatprep.subr.bf16.mxu1 %v509_v9  ;;  %v525_v25 = vld [vmem:[%s697_s1 + $0xf0] sm:$0xff]   ;;  %v529_v29 = vld [vmem:[%s697_s1 + $0xf8] sm:$0xff]  }
   0xb   :  { %v526_v26 = vld [vmem:[%s697_s1 + $0x30] sm:$0xff]   ;;  %v530_v31 = vld [vmem:[%s697_s1 + $0x38] sm:$0xff]  }
   0xc   :  { %458 = vmatpush3.bf16.msra.mxu0 %v510_v10  ;;  %v527_v27 = vld [vmem:[%s697_s1 + $0xb0] sm:$0xff]   ;;  %v531_v32 = vld [vmem:[%s697_s1 + $0xb8] sm:$0xff]  }
   0xd   :  { %480 = vmatpush3.bf16.msra.mxu1 %v511_v11  ;;  %459 = vmatprep.subr.bf16.mxu0 %v512_v12 }
   0xe   :  { %481 = vmatprep.subr.bf16.mxu1 %v513_v13 }
  0x10   :  { %460 = vmatpush3.bf16.msra.mxu0 %v514_v14 }
  0x11   :  { %482 = vmatpush3.bf16.msra.mxu1 %v515_v15  ;;  %461 = vmatprep.subr.bf16.mxu0 %v516_v16 }
  0x12   :  { %483 = vmatprep.subr.bf16.mxu1 %v517_v17 }
  0x14   :  { %462 = vmatpush3.bf16.msra.mxu0 %v518_v18 }
  0x15   :  { %484 = vmatpush3.bf16.msra.mxu1 %v519_v19  ;;  %463 = vmatprep.subr.bf16.mxu0 %v520_v20 }
  0x16   :  { %485 = vmatprep.subr.bf16.mxu1 %v521_v21 }
  0x18   :  { %464 = vmatpush3.bf16.msra.mxu0 %v522_v22 }
  0x19   :  { %486 = vmatpush3.bf16.msra.mxu1 %v523_v23  ;;  %465 = vmatprep.subr.bf16.mxu0 %v524_v24 }
  0x1a   :  { %487 = vmatprep.subr.bf16.mxu1 %v525_v25 }
  0x1c   :  { %466 = vmatpush3.bf16.msra.mxu0 %v526_v26 }
  0x1d   :  { %488 = vmatpush3.bf16.msra.mxu1 %v527_v27  ;;  %467 = vmatprep.subr.bf16.mxu0 %v528_v28 }
  0x1e   :  { %489 = vmatprep.subr.bf16.mxu1 %v529_v29 }
  0x20   :  { %468 = vmatpush3.bf16.msra.mxu0 %v530_v31 }
  0x21   :  { %490 = vmatpush3.bf16.msra.mxu1 %v531_v32 }
  0x22   :  { %8 = vsyncpa [#allocation4], 0  ;;  %v96_v37 = vcombine.high %v419_v33, %v419_v33  ;;  %v99_v38 = vunpack.c.0.s8 %v98_v35  ;;  %vm20_vm0 = vcmask 517120   ;;  %v557_v44 = vmov 0.0   ;;  %v452_v58 = vld [vmem:[%s698_s2] ss:$0 sm:$0xff] }
  0x23   :  { %21 = vst.msk [vmem:[#allocation2] sm:$0x3] %vm20_vm0, %v557_v44  ;;  %s558_s24 = smov [#allocation3]  }
  0x24   :  { %v102_v39 = vsub.s32 %v99_v38, %v101_v36  ;;  %s411_s25 = sshll.u32 %s558_s24, 4  ;;  %s412_s25 = int_to_ptr.vmem [resolvable:$true] %s411_s25 }
  0x25   :  { %s532_s26 = scalar_lea.vmem %s412_s25, 32  ;;  %p537_p1 = scmp.lt.s32.totalorder %s412_s25, %s412_s25 }
  0x26   :  { %v110_v40 = vrot.slane %v96_v37, %v102_v39  ;;  %v103_v41 = vrot.slane %v419_v33, %v102_v39  ;;  %p533_p0 = scmp.ne.s32.totalorder %s412_s25, %s532_s26  ;;  %p538_p2 = scmp.lt.s32.totalorder %s532_s26, %s532_s26 }
  0x28   :  { %341 = vmatprep.mubr.bf16.mxu0 %v110_v40  ;;  %v112_v42 = vcombine.high %v110_v40, %v110_v40  ;;  %v111_v43 = vcombine.high %v103_v41, %v103_v41  ;;  %p539_p3 = por %p538_p2, %p537_p1 }
  0x29   :  { %342 = vmatmul.mubr.bf16.vlgmr.msra.gmra.mrb[0].mxu0 %v103_v41 }
  0x2a   :  { %381 = vmatprep.mubr.bf16.mxu1 %v112_v42  ;;  %v22_v55 = vld [vmem:[#allocation2] sm:$0x3]  ;;  %p540_p4 = pnand %p539_p3, %p533_p0 }
  0x2b   :  { %382 = vmatmul.mubr.bf16.vlgmr.msra.gmra.mrb[0].mxu1 %v111_v43 }
  0xfc   :  { %v469_v45 = vpop.f32.mrb[0].mxu0 }
  0xfd   :  { %v470_v46 = vpop.f32.mrb[1].mxu0 }
  0xfe   :  { %v491_v47 = vpop.f32.mrb[0].mxu1  ;;  %v471_v48 = vadd.f32 %v470_v46, %v469_v45  ;;  %v472_v49 = vpop.f32.mrb[2].mxu0 }
  0xff   :  { %v492_v50 = vpop.f32.mrb[1].mxu1  ;;  %v473_v51 = vpop.f32.mrb[3].mxu0 }
 0x100   :  { %v493_v52 = vadd.f32 %v492_v50, %v491_v47  ;;  %v494_v53 = vpop.f32.mrb[2].mxu1 }
 0x101   :  { %v495_v54 = vpop.f32.mrb[3].mxu1 }
 0x102   :  { %v384_v56 = vadd.f32 %v493_v52, %v471_v48 }
 0x104   :  { %v389_v57 = vadd.f32 %v384_v56, %v22_v55 }
 0x106   :  { %391 = vst.msk [vmem:[#allocation2] sm:$0x3] %vm20_vm0, %v389_v57 }
 0x10d   :  { %v395_v59 = vld [vmem:[#allocation2] sm:$0x3] }
 0x10e   :  { %v403_v60 = vadd.f32 %v452_v58, %v395_v59 }
 0x110   :  { %404 = vst.msk [vmem:[#allocation3] sm:$0x3] %vm20_vm0, %v403_v60 }
 0x111   :  { %543 = shalt.err (!%p540_p4)
}
 0x112   :  { %s544_s29 = scalar_lea.hbm %s699_s3, 32 }
 0x113   :  { %p545_p5 = scmp.ne.s32.totalorder %s699_s3, %s544_s29  ;;  %p548_p6 = scmp.lt.u32.totalorder %s544_s29, %s699_s3 }
 0x115   :  { %p550_p7 = pnand %p548_p6, %p545_p5 }
 0x117   :  { %553 = shalt.err (!%p550_p7)
}
 0x118   :  { %414 = dma.vmem_to_hbm [thread:$0]  %s412_s25, 32, %s699_s3, [#allocation4]  }
 0x119   :  { %554 = dma.done.wait [#allocation4], 32  }
 0x11a   :  { %555 = vsyncadd [#allocation4], 4294967264 }
 0x11b   :  { %418 = vsyncpa [#allocation4], 1 }

// kernel: a_call__.10
= control target key start
LH: loop header
LB: loop body
LE: loop exit
PB: predicated region body
PF: predicated region fallthrough
CT: control target
= control target key end

     0   :  { %s1895_s12 = smov 0   ;;  %s1897_s13 = smov 0   ;;  %s2098_s0 = inlined_call_operand.vmem [shape: bf16[2,2048], index: 0, kind: input, shape index: {}]   ;;  %s2099_s1 = inlined_call_operand.vmem [shape: bf16[2048,512], index: 1, kind: input, shape index: {}]   ;;  %s2100_s2 = inlined_call_operand.vmem [shape: f32[1,512], index: 2, kind: input, shape index: {}]   ;;  %s2101_s3 = inlined_call_operand.vmem [shape: bf16[2,512], index: 3, kind: output, shape index: {}]  }
   0x1   :  { %s1899_s14 = smov 0  }
   0x2 LB: > { %s25_s15 = sadd.s32 1, %s1866_s13  ;;  %p1477_p0 = scmp.ge.s32.totalorder %s1870_s14, 1  ;;  %s1870_s14 = sphi %s1899_s14, %s13_s14   ;;  %s1866_s13 = sphi %s1897_s13, %s2103_s13   ;;  %s1862_s12 = sphi %s1895_s12, %s2102_s12  }
   0x3   : > { %p26_p1 = scmp.ge.s32.totalorder %s25_s15, 4  ;;  %p193_p2 = scmp.lt.s32.totalorder %s1870_s14, 5 }
   0x5   : > { %s2105_s15 = smov (%p26_p1, %s25_s15), 0  ;;  %p194_p3 = pnand %p1477_p0, %p193_p2 }
   0x6   : > { %s1478_s16 = sshll.u32 (!%p194_p3), %s1862_s12, 2  ;;  %s1479_s17 = sshll.u32 (!%p194_p3), %s1862_s12, 6 }
   0x7   : > { %197 = sbr.rel (%p194_p3) target bundleno = 399 (0x18f), region = 32  ;;  %p240_p4 = scmp.lt.s32.totalorder (!%p194_p3), %s1478_s16, 15 }
   0x8   : > { %p248_p5 = scmp.lt.s32.totalorder (!%p194_p3), %s1479_s17, 255  ;;  %p1482_p6 = scmp.ne.s32.totalorder (!%p194_p3), %s1862_s12, 0 }
   0xe   : > { %s2107_s16 = smov (!%p240_p4, %s1478_s16), 15  ;;  %s2109_s17 = smov (!%p248_p5, %s1479_s17), 255 }
   0xf   : > { %s244_s20 = scalar_lea.vmem %s2098_s0, %s2107_s16  ;;  %s1620_s21 = sshll.u32 %s2109_s17, 4  ;;  %v1872_v0 = vmov (!%p1482_p6), 0.0  }
  0x10   : > { %s1926_s24 = scalar_lea.vmem %s2099_s1, %s1620_s21  ;;  %275 = sbr.rel (%p1482_p6) target bundleno = 23 (0x17), region = 36  ;;  %276 = vst [vmem:[#allocation2] sm:$0xff] (!%p1482_p6), %v1872_v0 }
  0x17 PF: > { %v1656_v1 = vld [vmem:[%s1926_s24 + $0x4] ss:$16 sps:$4 sm:$0xff]   ;;  %v1658_v2 = vld [vmem:[%s1926_s24 + $0xc] ss:$16 sps:$4 sm:$0xff]   ;;  %v1660_v3 = vld [vmem:[%s1926_s24] ss:$16 sps:$4 sm:$0xff]   ;;  %v419_v41 = vlaneseq }
  0x18   : > { %1076 = vmatprep.subr.bf16.mxu0 %v1656_v1  ;;  %v1661_v4 = vld [vmem:[%s1926_s24 + $0x8] ss:$16 sps:$4 sm:$0xff]   ;;  %1158 = vmatprep.subr.bf16.mxu1 %v1658_v2  ;;  %v1662_v5 = vld [vmem:[%s1926_s24 + $0x24] ss:$16 sps:$4 sm:$0xff]   ;;  %v1664_v6 = vld [vmem:[%s1926_s24 + $0x2c] ss:$16 sps:$4 sm:$0xff]  }
  0x19   : > { %1077 = vmatpush1.bf16.msra.mxu0 %v1660_v3  ;;  %1159 = vmatpush1.bf16.msra.mxu1 %v1661_v4  ;;  %v1666_v7 = vld [vmem:[%s1926_s24 + $0x20] ss:$16 sps:$4 sm:$0xff]   ;;  %v1667_v8 = vld [vmem:[%s1926_s24 + $0x28] ss:$16 sps:$4 sm:$0xff]   ;;  %v1668_v9 = vld [vmem:[%s1926_s24 + $0x44] ss:$16 sps:$4 sm:$0xff]  }
  0x1a   : > { %1078 = vmatprep.subr.bf16.mxu0 %v1662_v5  ;;  %1160 = vmatprep.subr.bf16.mxu1 %v1664_v6  ;;  %v1670_v10 = vld [vmem:[%s1926_s24 + $0x4c] ss:$16 sps:$4 sm:$0xff]   ;;  %v1672_v11 = vld [vmem:[%s1926_s24 + $0x40] ss:$16 sps:$4 sm:$0xff]   ;;  %v1673_v12 = vld [vmem:[%s1926_s24 + $0x48] ss:$16 sps:$4 sm:$0xff]  }
  0x1b   : > { %v1674_v13 = vld [vmem:[%s1926_s24 + $0x64] ss:$16 sps:$4 sm:$0xff]   ;;  %v1676_v14 = vld [vmem:[%s1926_s24 + $0x6c] ss:$16 sps:$4 sm:$0xff]   ;;  %v1678_v15 = vld [vmem:[%s1926_s24 + $0x60] ss:$16 sps:$4 sm:$0xff]  }
  0x1c   : > { %v1679_v16 = vld [vmem:[%s1926_s24 + $0x68] ss:$16 sps:$4 sm:$0xff]   ;;  %v1680_v17 = vld [vmem:[%s1926_s24 + $0x84] ss:$16 sps:$4 sm:$0xff]   ;;  %v1682_v18 = vld [vmem:[%s1926_s24 + $0x8c] ss:$16 sps:$4 sm:$0xff]  }
  0x1d   : > { %1079 = vmatpush1.bf16.msra.mxu0 %v1666_v7  ;;  %1161 = vmatpush1.bf16.msra.mxu1 %v1667_v8  ;;  %v1684_v19 = vld [vmem:[%s1926_s24 + $0x80] ss:$16 sps:$4 sm:$0xff]   ;;  %v1685_v20 = vld [vmem:[%s1926_s24 + $0x88] ss:$16 sps:$4 sm:$0xff]   ;;  %v1686_v21 = vld [vmem:[%s1926_s24 + $0xa4] ss:$16 sps:$4 sm:$0xff]  }
  0x1e   : > { %1080 = vmatprep.subr.bf16.mxu0 %v1668_v9  ;;  %1162 = vmatprep.subr.bf16.mxu1 %v1670_v10  ;;  %v1688_v22 = vld [vmem:[%s1926_s24 + $0xac] ss:$16 sps:$4 sm:$0xff]   ;;  %v1690_v23 = vld [vmem:[%s1926_s24 + $0xa0] ss:$16 sps:$4 sm:$0xff]   ;;  %v1691_v24 = vld [vmem:[%s1926_s24 + $0xa8] ss:$16 sps:$4 sm:$0xff]  }
  0x1f   : > { %v1692_v25 = vld [vmem:[%s1926_s24 + $0xc4] ss:$16 sps:$4 sm:$0xff]   ;;  %v1694_v26 = vld [vmem:[%s1926_s24 + $0xcc] ss:$16 sps:$4 sm:$0xff]   ;;  %v1696_v27 = vld [vmem:[%s1926_s24 + $0xc0] ss:$16 sps:$4 sm:$0xff]  }
  0x20   : > { %v1697_v28 = vld [vmem:[%s1926_s24 + $0xc8] ss:$16 sps:$4 sm:$0xff]   ;;  %v1698_v29 = vld [vmem:[%s1926_s24 + $0xe4] ss:$16 sps:$4 sm:$0xff]   ;;  %v1700_v30 = vld [vmem:[%s1926_s24 + $0xec] ss:$16 sps:$4 sm:$0xff]  }
  0x21   : > { %1081 = vmatpush1.bf16.msra.mxu0 %v1672_v11  ;;  %1163 = vmatpush1.bf16.msra.mxu1 %v1673_v12  ;;  %v1702_v31 = vld [vmem:[%s1926_s24 + $0xe0] ss:$16 sps:$4 sm:$0xff]   ;;  %v1703_v32 = vld [vmem:[%s1926_s24 + $0xe8] ss:$16 sps:$4 sm:$0xff]   ;;  %v1704_v33 = vld [vmem:[%s1926_s24 + $0x104] ss:$16 sps:$4 sm:$0xff]  }
  0x22   : > { %1082 = vmatprep.subr.bf16.mxu0 %v1674_v13  ;;  %1164 = vmatprep.subr.bf16.mxu1 %v1676_v14  ;;  %v1706_v34 = vld [vmem:[%s1926_s24 + $0x10c] ss:$16 sps:$4 sm:$0xff]   ;;  %v1708_v35 = vld [vmem:[%s1926_s24 + $0x100] ss:$16 sps:$4 sm:$0xff]   ;;  %v1709_v36 = vld [vmem:[%s1926_s24 + $0x108] ss:$16 sps:$4 sm:$0xff]  }
  0x23   : > { %v1710_v37 = vld [vmem:[%s1926_s24 + $0x124] ss:$16 sps:$4 sm:$0xff]   ;;  %v1712_v38 = vld [vmem:[%s1926_s24 + $0x12c] ss:$16 sps:$4 sm:$0xff]   ;;  %v1873_v39 = vmov 1966171168  }
  0x24   : > { %v417_v40 = vunpack.c.l.s4 %v1873_v39  ;;  %v1714_v42 = vld [vmem:[%s1926_s24 + $0x120] ss:$16 sps:$4 sm:$0xff]   ;;  %v1715_v43 = vld [vmem:[%s1926_s24 + $0x128] ss:$16 sps:$4 sm:$0xff]   ;;  %v1716_v44 = vld [vmem:[%s1926_s24 + $0x144] ss:$16 sps:$4 sm:$0xff]  }
  0x25   : > { %1083 = vmatpush1.bf16.msra.mxu0 %v1678_v15  ;;  %1165 = vmatpush1.bf16.msra.mxu1 %v1679_v16  ;;  %v1718_v45 = vld [vmem:[%s1926_s24 + $0x14c] ss:$16 sps:$4 sm:$0xff]   ;;  %v1971_v47 = vshrl.u32 %v419_v41, 7  ;;  %v1720_v48 = vld [vmem:[%s1926_s24 + $0x140] ss:$16 sps:$4 sm:$0xff]   ;;  %p1612_p7 = scmp.ne.s32.totalorder %s1862_s12, 3 }
  0x26   : > { %1084 = vmatprep.subr.bf16.mxu0 %v1680_v17  ;;  %1166 = vmatprep.subr.bf16.mxu1 %v1682_v18  ;;  %v418_v46 = vunpack.c.0.s8 %v417_v40  ;;  %v1721_v49 = vld [vmem:[%s1926_s24 + $0x148] ss:$16 sps:$4 sm:$0xff]   ;;  %v1722_v50 = vld [vmem:[%s1926_s24 + $0x164] ss:$16 sps:$4 sm:$0xff]   ;;  %v1724_v51 = vld [vmem:[%s1926_s24 + $0x16c] ss:$16 sps:$4 sm:$0xff]  }
  0x27   : > { %v1483_v53 = vld.sshfl [vmem:[%s244_s20] sm:$0x33 pattern:$0x75316420]  ;;  %v1727_v55 = vld [vmem:[%s1926_s24 + $0x168] ss:$16 sps:$4 sm:$0xff]  }
  0x28   : > { %v1978_v52 = vsub.s32 %v418_v46, %v1971_v47  ;;  %v1726_v54 = vld [vmem:[%s1926_s24 + $0x160] ss:$16 sps:$4 sm:$0xff]   ;;  %v415_v56 = vcombine.high %v1483_v53, %v1483_v53  ;;  %v1728_v57 = vld [vmem:[%s1926_s24 + $0x184] ss:$16 sps:$4 sm:$0xff]   ;;  %v1730_v58 = vld [vmem:[%s1926_s24 + $0x18c] ss:$16 sps:$4 sm:$0xff]  }
  0x29   : > { %1085 = vmatpush1.bf16.msra.mxu0 %v1684_v19  ;;  %1167 = vmatpush1.bf16.msra.mxu1 %v1685_v20  ;;  %v1732_v60 = vld [vmem:[%s1926_s24 + $0x180] ss:$16 sps:$4 sm:$0xff]   ;;  %v1733_v61 = vld [vmem:[%s1926_s24 + $0x188] ss:$16 sps:$4 sm:$0xff]   ;;  %v1734_v62 = vld [vmem:[%s1926_s24 + $0x1a4] ss:$16 sps:$4 sm:$0xff]  }
  0x2a   : > { %1086 = vmatprep.subr.bf16.mxu0 %v1686_v21  ;;  %1168 = vmatprep.subr.bf16.mxu1 %v1688_v22  ;;  %v429_v59 = vrot.slane %v415_v56, %v1978_v52  ;;  %v1736_v63 = vld [vmem:[%s1926_s24 + $0x1ac] ss:$16 sps:$4 sm:$0xff]   ;;  %v1738_v0 = vld [vmem:[%s1926_s24 + $0x1a0] ss:$16 sps:$4 sm:$0xff]   ;;  %v1739_v1 = vld [vmem:[%s1926_s24 + $0x1a8] ss:$16 sps:$4 sm:$0xff]   ;;  %v2008_v13 = vrot.slane %v1483_v53, %v1978_v52 }
  0x2b   : > { %v1740_v2 = vld [vmem:[%s1926_s24 + $0x1c4] ss:$16 sps:$4 sm:$0xff]   ;;  %v1742_v3 = vld [vmem:[%s1926_s24 + $0x1cc] ss:$16 sps:$4 sm:$0xff]   ;;  %v1744_v4 = vld [vmem:[%s1926_s24 + $0x1c0] ss:$16 sps:$4 sm:$0xff]  }
  0x2c   : > { %1108 = vmatprep.mubr.bf16.mxu0 %v429_v59  ;;  %1190 = vmatprep.mubr.bf16.mxu1 %v429_v59  ;;  %v1745_v5 = vld [vmem:[%s1926_s24 + $0x1c8] ss:$16 sps:$4 sm:$0xff]   ;;  %v1746_v6 = vld [vmem:[%s1926_s24 + $0x1e4] ss:$16 sps:$4 sm:$0xff]   ;;  %v1748_v7 = vld [vmem:[%s1926_s24 + $0x1ec] ss:$16 sps:$4 sm:$0xff]   ;;  %v431_v17 = vcombine.high %v429_v59, %v429_v59 }
  0x2d   : > { %1087 = vmatpush1.bf16.msra.mxu0 %v1690_v23  ;;  %1169 = vmatpush1.bf16.msra.mxu1 %v1691_v24  ;;  %v1750_v8 = vld [vmem:[%s1926_s24 + $0x1e0] ss:$16 sps:$4 sm:$0xff]   ;;  %v1751_v9 = vld [vmem:[%s1926_s24 + $0x1e8] ss:$16 sps:$4 sm:$0xff]   ;;  %v1754_v10 = vld [vmem:[%s1926_s24 + $0x204] ss:$16 sps:$4 sm:$0xff]  }
  0x2e   : > { %1088 = vmatprep.subr.bf16.mxu0 %v1692_v25  ;;  %1170 = vmatprep.subr.bf16.mxu1 %v1694_v26  ;;  %v1757_v11 = vld [vmem:[%s1926_s24 + $0x20c] ss:$16 sps:$4 sm:$0xff]   ;;  %v1752_v12 = vld [vmem:[%s1926_s24 + $0x200] ss:$16 sps:$4 sm:$0xff]   ;;  %v1755_v14 = vld [vmem:[%s1926_s24 + $0x208] ss:$16 sps:$4 sm:$0xff]  }
  0x2f   : > { %v1760_v15 = vld [vmem:[%s1926_s24 + $0x224] ss:$16 sps:$4 sm:$0xff]   ;;  %v1763_v16 = vld [vmem:[%s1926_s24 + $0x22c] ss:$16 sps:$4 sm:$0xff]   ;;  %v1758_v18 = vld [vmem:[%s1926_s24 + $0x220] ss:$16 sps:$4 sm:$0xff]  }
  0x30   : > { %v1761_v19 = vld [vmem:[%s1926_s24 + $0x228] ss:$16 sps:$4 sm:$0xff]   ;;  %v1766_v20 = vld [vmem:[%s1926_s24 + $0x244] ss:$16 sps:$4 sm:$0xff]   ;;  %v1769_v21 = vld [vmem:[%s1926_s24 + $0x24c] ss:$16 sps:$4 sm:$0xff]  }
  0x31   : > { %1089 = vmatpush1.bf16.msra.mxu0 %v1696_v27  ;;  %1171 = vmatpush1.bf16.msra.mxu1 %v1697_v28  ;;  %v1764_v22 = vld [vmem:[%s1926_s24 + $0x240] ss:$16 sps:$4 sm:$0xff]   ;;  %v1767_v23 = vld [vmem:[%s1926_s24 + $0x248] ss:$16 sps:$4 sm:$0xff]   ;;  %v1772_v24 = vld [vmem:[%s1926_s24 + $0x264] ss:$16 sps:$4 sm:$0xff]  }
  0x32   : > { %1090 = vmatprep.subr.bf16.mxu0 %v1698_v29  ;;  %1172 = vmatprep.subr.bf16.mxu1 %v1700_v30  ;;  %v1775_v25 = vld [vmem:[%s1926_s24 + $0x26c] ss:$16 sps:$4 sm:$0xff]   ;;  %v1770_v26 = vld [vmem:[%s1926_s24 + $0x260] ss:$16 sps:$4 sm:$0xff]   ;;  %v1773_v27 = vld [vmem:[%s1926_s24 + $0x268] ss:$16 sps:$4 sm:$0xff]  }
  0x33   : > { %v1778_v28 = vld [vmem:[%s1926_s24 + $0x284] ss:$16 sps:$4 sm:$0xff]   ;;  %v1781_v29 = vld [vmem:[%s1926_s24 + $0x28c] ss:$16 sps:$4 sm:$0xff]   ;;  %v1776_v30 = vld [vmem:[%s1926_s24 + $0x280] ss:$16 sps:$4 sm:$0xff]  }
  0x34   : > { %v1791_v39 = vld [vmem:[%s1926_s24 + $0x2c8] ss:$16 sps:$4 sm:$0xff]   ;;  %v1796_v40 = vld [vmem:[%s1926_s24 + $0x2e4] ss:$16 sps:$4 sm:$0xff]   ;;  %v1799_v41 = vld [vmem:[%s1926_s24 + $0x2ec] ss:$16 sps:$4 sm:$0xff]  }
  0x35   : > { %1091 = vmatpush1.bf16.msra.mxu0 %v1702_v31  ;;  %1173 = vmatpush1.bf16.msra.mxu1 %v1703_v32  ;;  %v1779_v31 = vld [vmem:[%s1926_s24 + $0x288] ss:$16 sps:$4 sm:$0xff]   ;;  %v1784_v32 = vld [vmem:[%s1926_s24 + $0x2a4] ss:$16 sps:$4 sm:$0xff]   ;;  %v1800_v46 = vld [vmem:[%s1926_s24 + $0x300] ss:$16 sps:$4 sm:$0xff]  }
  0x36   : > { %1092 = vmatprep.subr.bf16.mxu0 %v1704_v33  ;;  %1174 = vmatprep.subr.bf16.mxu1 %v1706_v34  ;;  %v1787_v33 = vld [vmem:[%s1926_s24 + $0x2ac] ss:$16 sps:$4 sm:$0xff]   ;;  %v1782_v34 = vld [vmem:[%s1926_s24 + $0x2a0] ss:$16 sps:$4 sm:$0xff]   ;;  %v1809_v53 = vld [vmem:[%s1926_s24 + $0x328] ss:$16 sps:$4 sm:$0xff]  }
  0x37   : > { %v1812_v56 = vld [vmem:[%s1926_s24 + $0x340] ss:$16 sps:$4 sm:$0xff]   ;;  %v1823_v59 = vld [vmem:[%s1926_s24 + $0x36c] ss:$16 sps:$4 sm:$0xff]  }
  0x39   : > { %1093 = vmatpush1.bf16.msra.mxu0 %v1708_v35  ;;  %1175 = vmatpush1.bf16.msra.mxu1 %v1709_v36  ;;  %v1785_v35 = vld [vmem:[%s1926_s24 + $0x2a8] ss:$16 sps:$4 sm:$0xff]   ;;  %v1790_v36 = vld [vmem:[%s1926_s24 + $0x2c4] ss:$16 sps:$4 sm:$0xff]  }
  0x3a   : > { %1094 = vmatprep.subr.bf16.mxu0 %v1710_v37  ;;  %1176 = vmatprep.subr.bf16.mxu1 %v1712_v38  ;;  %v1793_v37 = vld [vmem:[%s1926_s24 + $0x2cc] ss:$16 sps:$4 sm:$0xff]   ;;  %v1788_v38 = vld [vmem:[%s1926_s24 + $0x2c0] ss:$16 sps:$4 sm:$0xff]  }
  0x3d   : > { %1095 = vmatpush1.bf16.msra.mxu0 %v1714_v42  ;;  %1177 = vmatpush1.bf16.msra.mxu1 %v1715_v43  ;;  %v1794_v42 = vld [vmem:[%s1926_s24 + $0x2e0] ss:$16 sps:$4 sm:$0xff]   ;;  %v1797_v43 = vld [vmem:[%s1926_s24 + $0x2e8] ss:$16 sps:$4 sm:$0xff]  }
  0x3e   : > { %1096 = vmatprep.subr.bf16.mxu0 %v1716_v44  ;;  %1178 = vmatprep.subr.bf16.mxu1 %v1718_v45  ;;  %v1802_v44 = vld [vmem:[%s1926_s24 + $0x304] ss:$16 sps:$4 sm:$0xff]   ;;  %v1805_v45 = vld [vmem:[%s1926_s24 + $0x30c] ss:$16 sps:$4 sm:$0xff]  }
  0x41   : > { %1097 = vmatpush1.bf16.msra.mxu0 %v1720_v48  ;;  %1179 = vmatpush1.bf16.msra.mxu1 %v1721_v49  ;;  %v1803_v48 = vld [vmem:[%s1926_s24 + $0x308] ss:$16 sps:$4 sm:$0xff]   ;;  %v1808_v49 = vld [vmem:[%s1926_s24 + $0x324] ss:$16 sps:$4 sm:$0xff]  }
  0x42   : > { %1098 = vmatprep.subr.bf16.mxu0 %v1722_v50  ;;  %1180 = vmatprep.subr.bf16.mxu1 %v1724_v51  ;;  %v1811_v50 = vld [vmem:[%s1926_s24 + $0x32c] ss:$16 sps:$4 sm:$0xff]   ;;  %v1806_v51 = vld [vmem:[%s1926_s24 + $0x320] ss:$16 sps:$4 sm:$0xff]  }
  0x45   : > { %1099 = vmatpush1.bf16.msra.mxu0 %v1726_v54  ;;  %1181 = vmatpush1.bf16.msra.mxu1 %v1727_v55  ;;  %v1814_v54 = vld [vmem:[%s1926_s24 + $0x344] ss:$16 sps:$4 sm:$0xff]   ;;  %v1817_v55 = vld [vmem:[%s1926_s24 + $0x34c] ss:$16 sps:$4 sm:$0xff]  }
  0x46   : > { %1100 = vmatprep.subr.bf16.mxu0 %v1728_v57  ;;  %1182 = vmatprep.subr.bf16.mxu1 %v1730_v58  ;;  %v1815_v57 = vld [vmem:[%s1926_s24 + $0x348] ss:$16 sps:$4 sm:$0xff]   ;;  %v1820_v58 = vld [vmem:[%s1926_s24 + $0x364] ss:$16 sps:$4 sm:$0xff]  }
  0x49   : > { %1101 = vmatpush1.bf16.msra.mxu0 %v1732_v60  ;;  %1183 = vmatpush1.bf16.msra.mxu1 %v1733_v61  ;;  %v1818_v60 = vld [vmem:[%s1926_s24 + $0x360] ss:$16 sps:$4 sm:$0xff]   ;;  %v1821_v61 = vld [vmem:[%s1926_s24 + $0x368] ss:$16 sps:$4 sm:$0xff]  }
  0x4a   : > { %1102 = vmatprep.subr.bf16.mxu0 %v1734_v62  ;;  %1184 = vmatprep.subr.bf16.mxu1 %v1736_v63  ;;  %v1826_v62 = vld [vmem:[%s1926_s24 + $0x384] ss:$16 sps:$4 sm:$0xff]   ;;  %v1829_v63 = vld [vmem:[%s1926_s24 + $0x38c] ss:$16 sps:$4 sm:$0xff]  }
  0x4d   : > { %1103 = vmatpush1.bf16.msra.mxu0 %v1738_v0  ;;  %1185 = vmatpush1.bf16.msra.mxu1 %v1739_v1  ;;  %v1824_v0 = vld [vmem:[%s1926_s24 + $0x380] ss:$16 sps:$4 sm:$0xff]   ;;  %v1827_v1 = vld [vmem:[%s1926_s24 + $0x388] ss:$16 sps:$4 sm:$0xff]  }
  0x4e   : > { %1104 = vmatprep.subr.bf16.mxu0 %v1740_v2  ;;  %1186 = vmatprep.subr.bf16.mxu1 %v1742_v3  ;;  %v1832_v2 = vld [vmem:[%s1926_s24 + $0x3a4] ss:$16 sps:$4 sm:$0xff]   ;;  %v1835_v3 = vld [vmem:[%s1926_s24 + $0x3ac] ss:$16 sps:$4 sm:$0xff]  }
  0x51   : > { %1105 = vmatpush1.bf16.msra.mxu0 %v1744_v4  ;;  %1187 = vmatpush1.bf16.msra.mxu1 %v1745_v5  ;;  %v1830_v4 = vld [vmem:[%s1926_s24 + $0x3a0] ss:$16 sps:$4 sm:$0xff]   ;;  %v1833_v5 = vld [vmem:[%s1926_s24 + $0x3a8] ss:$16 sps:$4 sm:$0xff]  }
  0x52   : > { %1106 = vmatprep.subr.bf16.mxu0 %v1746_v6  ;;  %1188 = vmatprep.subr.bf16.mxu1 %v1748_v7  ;;  %v1838_v6 = vld [vmem:[%s1926_s24 + $0x3c4] ss:$16 sps:$4 sm:$0xff]   ;;  %v1841_v7 = vld [vmem:[%s1926_s24 + $0x3cc] ss:$16 sps:$4 sm:$0xff]  }
  0x55   : > { %1107 = vmatpush1.bf16.msra.mxu0 %v1750_v8  ;;  %1189 = vmatpush1.bf16.msra.mxu1 %v1751_v9  ;;  %v1836_v8 = vld [vmem:[%s1926_s24 + $0x3c0] ss:$16 sps:$4 sm:$0xff]   ;;  %v1839_v9 = vld [vmem:[%s1926_s24 + $0x3c8] ss:$16 sps:$4 sm:$0xff]  }
  0x56   : > { %1117 = vmatprep.subr.bf16.mxu0 %v1754_v10  ;;  %1199 = vmatprep.subr.bf16.mxu1 %v1757_v11  ;;  %v1844_v10 = vld [vmem:[%s1926_s24 + $0x3e4] ss:$16 sps:$4 sm:$0xff]   ;;  %v1847_v11 = vld [vmem:[%s1926_s24 + $0x3ec] ss:$16 sps:$4 sm:$0xff]  }
  0x58   : > { %1109 = vmatmul.mubr.bf16.vlgmr.msra.gmra.mrb[0].mxu0 %v2008_v13  ;;  %1191 = vmatmul.mubr.bf16.vlgmr.msra.gmra.mrb[0].mxu1 %v2008_v13 }
  0x59   : > { %1118 = vmatpush1.bf16.msra.mxu0 %v1752_v12  ;;  %1200 = vmatpush1.bf16.msra.mxu1 %v1755_v14  ;;  %v1842_v12 = vld [vmem:[%s1926_s24 + $0x3e0] ss:$16 sps:$4 sm:$0xff]   ;;  %v1845_v14 = vld [vmem:[%s1926_s24 + $0x3e8] ss:$16 sps:$4 sm:$0xff]  }
  0x5a   : > { %1119 = vmatprep.subr.bf16.mxu0 %v1760_v15  ;;  %1201 = vmatprep.subr.bf16.mxu1 %v1763_v16  ;;  %v430_v15 = vcombine.high %v2008_v13, %v2008_v13  ;;  %v1874_v16 = vmov 1983009808  }
  0x5b   : > { %1149 = vmatprep.mubr.bf16.mxu0 %v431_v17  ;;  %1231 = vmatprep.mubr.bf16.mxu1 %v431_v17  ;;  %v1247_v17 = vunpack.c.l.s4 %v1874_v16 }
  0x5d   : > { %1120 = vmatpush1.bf16.msra.mxu0 %v1758_v18  ;;  %1202 = vmatpush1.bf16.msra.mxu1 %v1761_v19  ;;  %v1248_v18 = vunpack.c.0.s8 %v1247_v17 }
  0x5e   : > { %1121 = vmatprep.subr.bf16.mxu0 %v1766_v20  ;;  %1203 = vmatprep.subr.bf16.mxu1 %v1769_v21 }
  0x5f   : > { %v1251_v21 = vsub.s32 %v1248_v18, %v1971_v47 }
  0x61   : > { %1122 = vmatpush1.bf16.msra.mxu0 %v1764_v22  ;;  %1204 = vmatpush1.bf16.msra.mxu1 %v1767_v23 }
  0x62   : > { %1123 = vmatprep.subr.bf16.mxu0 %v1772_v24  ;;  %1205 = vmatprep.subr.bf16.mxu1 %v1775_v25 }
  0x65   : > { %1124 = vmatpush1.bf16.msra.mxu0 %v1770_v26  ;;  %1206 = vmatpush1.bf16.msra.mxu1 %v1773_v27 }
  0x66   : > { %1125 = vmatprep.subr.bf16.mxu0 %v1778_v28  ;;  %1207 = vmatprep.subr.bf16.mxu1 %v1781_v29 }
  0x69   : > { %1126 = vmatpush1.bf16.msra.mxu0 %v1776_v30  ;;  %1208 = vmatpush1.bf16.msra.mxu1 %v1779_v31  ;;  %v277_v31 = vld [vmem:[#allocation2] sm:$0xff] }
  0x6a   : > { %1127 = vmatprep.subr.bf16.mxu0 %v1784_v32  ;;  %1209 = vmatprep.subr.bf16.mxu1 %v1787_v33 }
  0x6d   : > { %1128 = vmatpush1.bf16.msra.mxu0 %v1782_v34  ;;  %1210 = vmatpush1.bf16.msra.mxu1 %v1785_v35  ;;  %v1269_v34 = vld [vmem:[%s2100_s2] sm:$0xf] (!%p1612_p7)  ;;  %v1273_v35 = vsub.s32 (!%p1612_p7), 0, %v1971_v47 }
  0x6e   : > { %1129 = vmatprep.subr.bf16.mxu0 %v1790_v36  ;;  %1211 = vmatprep.subr.bf16.mxu1 %v1793_v37  ;;  %v1277_v36 = vsub.s32 (!%p1612_p7), 1, %v1971_v47  ;;  %v1281_v37 = vsub.s32 (!%p1612_p7), 2, %v1971_v47 }
  0x71   : > { %1130 = vmatpush1.bf16.msra.mxu0 %v1788_v38  ;;  %1212 = vmatpush1.bf16.msra.mxu1 %v1791_v39  ;;  %v1285_v38 = vsub.s32 (!%p1612_p7), 3, %v1971_v47  ;;  %v1274_v39 = vrot.slane (!%p1612_p7), %v1269_v34, %v1273_v35 }
  0x72   : > { %1131 = vmatprep.subr.bf16.mxu0 %v1796_v40  ;;  %1213 = vmatprep.subr.bf16.mxu1 %v1799_v41  ;;  %v1278_v40 = vrot.slane (!%p1612_p7), %v1269_v34, %v1277_v36  ;;  %v1282_v41 = vrot.slane (!%p1612_p7), %v1269_v34, %v1281_v37 }
  0x75   : > { %1132 = vmatpush1.bf16.msra.mxu0 %v1794_v42  ;;  %1214 = vmatpush1.bf16.msra.mxu1 %v1797_v43  ;;  %v1286_v42 = vrot.slane (!%p1612_p7), %v1269_v34, %v1285_v38  ;;  %v1287_v43 = vcombine.low (!%p1612_p7), %v1274_v39, %v1278_v40 }
  0x76   : > { %1133 = vmatprep.subr.bf16.mxu0 %v1802_v44  ;;  %1215 = vmatprep.subr.bf16.mxu1 %v1805_v45 }
  0x77   : > { %v1288_v44 = vcombine.low (!%p1612_p7), %v1282_v41, %v1286_v42  ;;  %v1295_v45 = vrot.slane (!%p1612_p7), %v1287_v43, %v1251_v21 }
  0x79   : > { %1134 = vmatpush1.bf16.msra.mxu0 %v1800_v46  ;;  %1216 = vmatpush1.bf16.msra.mxu1 %v1803_v48  ;;  %v1302_v46 = vrot.slane (!%p1612_p7), %v1288_v44, %v1251_v21 }
  0x7a   : > { %1135 = vmatprep.subr.bf16.mxu0 %v1808_v49  ;;  %1217 = vmatprep.subr.bf16.mxu1 %v1811_v50 }
  0x7b   : > { %v1303_v49 = vcombine.low (!%p1612_p7), %v1295_v45, %v1302_v46 }
  0x7d   : > { %1136 = vmatpush1.bf16.msra.mxu0 %v1806_v51  ;;  %1218 = vmatpush1.bf16.msra.mxu1 %v1809_v53 }
  0x7e   : > { %1137 = vmatprep.subr.bf16.mxu0 %v1814_v54  ;;  %1219 = vmatprep.subr.bf16.mxu1 %v1817_v55 }
  0x81   : > { %1138 = vmatpush1.bf16.msra.mxu0 %v1812_v56  ;;  %1220 = vmatpush1.bf16.msra.mxu1 %v1815_v57 }
  0x82   : > { %1139 = vmatprep.subr.bf16.mxu0 %v1820_v58  ;;  %1221 = vmatprep.subr.bf16.mxu1 %v1823_v59 }
  0x85   : > { %1140 = vmatpush1.bf16.msra.mxu0 %v1818_v60  ;;  %1222 = vmatpush1.bf16.msra.mxu1 %v1821_v61 }
  0x86   : > { %1141 = vmatprep.subr.bf16.mxu0 %v1826_v62  ;;  %1223 = vmatprep.subr.bf16.mxu1 %v1829_v63 }
  0x89   : > { %1142 = vmatpush1.bf16.msra.mxu0 %v1824_v0  ;;  %1224 = vmatpush1.bf16.msra.mxu1 %v1827_v1 }
  0x8a   : > { %1143 = vmatprep.subr.bf16.mxu0 %v1832_v2  ;;  %1225 = vmatprep.subr.bf16.mxu1 %v1835_v3 }
  0x8d   : > { %1144 = vmatpush1.bf16.msra.mxu0 %v1830_v4  ;;  %1226 = vmatpush1.bf16.msra.mxu1 %v1833_v5 }
  0x8e   : > { %1145 = vmatprep.subr.bf16.mxu0 %v1838_v6  ;;  %1227 = vmatprep.subr.bf16.mxu1 %v1841_v7 }
  0x91   : > { %1146 = vmatpush1.bf16.msra.mxu0 %v1836_v8  ;;  %1228 = vmatpush1.bf16.msra.mxu1 %v1839_v9 }
  0x92   : > { %1147 = vmatprep.subr.bf16.mxu0 %v1844_v10  ;;  %1229 = vmatprep.subr.bf16.mxu1 %v1847_v11 }
  0x95   : > { %1148 = vmatpush1.bf16.msra.mxu0 %v1842_v12  ;;  %1230 = vmatpush1.bf16.msra.mxu1 %v1845_v14 }
  0x98   : > { %1150 = vmatmul.mubr.bf16.vlgmr.msra.gmra.mrb[0].mxu0 %v430_v15  ;;  %1232 = vmatmul.mubr.bf16.vlgmr.msra.gmra.mrb[0].mxu1 %v430_v15 }
 0x16b   : > { %v1151_v19 = vpop.f32.mrb[0].mxu0  ;;  %v1233_v20 = vpop.f32.mrb[0].mxu1 }
 0x16c   : > { %v1153_v22 = vpop.f32.mrb[1].mxu0  ;;  %v1235_v23 = vpop.f32.mrb[1].mxu1 }
 0x16d   : > { %v1244_v24 = vcombine.low %v1151_v19, %v1153_v22  ;;  %v1245_v25 = vcombine.low %v1233_v20, %v1235_v23  ;;  %v1155_v26 = vpop.f32.mrb[2].mxu0  ;;  %v1237_v27 = vpop.f32.mrb[2].mxu1 }
 0x16e   : > { %v1156_v28 = vpop.f32.mrb[3].mxu0  ;;  %v1238_v29 = vpop.f32.mrb[3].mxu1 }
 0x16f   : > { %v1252_v13 = vrot.slane %v1244_v24, %v1251_v21  ;;  %v1259_v30 = vrot.slane %v1245_v25, %v1251_v21  ;;  %1267 = sbr.rel (%p1612_p7) target bundleno = 399 (0x18f), region = 40 }
 0x171   : > { %v1260_v32 = vcombine.low %v1252_v13, %v1259_v30 }
 0x173   : > { %v1262_v33 = vadd.f32 %v1260_v32, %v277_v31 }
 0x175   : > { %1263 = vst [vmem:[#allocation2] sm:$0xff] %v1262_v33 }
 0x17c   : > { %v1268_v48 = vld [vmem:[#allocation2] sm:$0xff] }
 0x17d   : > { %v1305_v50 = vadd.f32 %v1303_v49, %v1268_v48 }
 0x17f   : > { %vm1306_vm0 = vcmp.ge.f32.partialorder %v1305_v50, 0.0  ;;  %v1307_v51 = vmul.f32 0.25, %v1305_v50 }
 0x181   : > { %v1308_v53 = vsel %vm1306_vm0, %v1305_v50, %v1307_v51 }
 0x182   : > { %v1310_v54 = vcombine.high %v1308_v53, %v1308_v53  ;;  %v1317_v55 = vrot.slane %v1308_v53, %v1251_v21 }
 0x184   : > { %v1324_v56 = vrot.slane %v1310_v54, %v1251_v21  ;;  %v1325_v57 = vcombine.high %v1317_v55, %v1317_v55 }
 0x186   : > { %v1326_v58 = vcombine.high %v1324_v56, %v1324_v56  ;;  %v1613_v47 = vpack.c.bf16 %v1325_v57, %v1317_v55 }
 0x188   : > { %v1614_v59 = vpack.c.bf16 %v1326_v58, %v1324_v56  ;;  %v1347_v60 = vrot.slane %v1613_v47, %v1978_v52 }
 0x18a   : > { %v1354_v61 = vrot.slane %v1614_v59, %v1978_v52 }
 0x18c   : > { %v1355_v62 = vcombine.low %v1347_v60, %v1354_v61 }
 0x18e   : > { %1615 = vst.sshfl [vmem:[%s2101_s3] sm:$0x55 pattern:$0x73625140] %v1355_v62 }
 0x18f PF: > { %s13_s14 = sadd.s32 1, %s1870_s14   ;;  %s2102_s12 = smov %s1866_s13 }
 0x190   : > { %p10_p8 = scmp.ge.s32.totalorder %s13_s14, 6   ;;  %s2103_s13 = smov %s2105_s15 }
 0x192   :  { %12 = sbr.rel (!%p10_p8) target bundleno = 2 (0x2), region = 76 }

</bundles_post_ra>
